<compile_context>
chip_gen: v7x
topology: tpu7x:2x2x1
jax: 0.10.0
libtpu: 0.0.40
codegen_flags: <defaults>
</compile_context>

<pallas_src>
import math

import numpy as np
import jax
import jax.numpy as jnp
from jax.experimental import pallas as pl
from jax.experimental.pallas import tpu as pltpu


# ---------------------------------------------------------------------------
# Parameter construction (deterministic, mirrors PytorchSTFT.__init__)
# ---------------------------------------------------------------------------
def _hann_periodic(win_len: int) -> np.ndarray:
    # scipy.signal.get_window('hann', Nx) default = periodic (fftbins=True)
    n = np.arange(win_len)
    return 0.5 - 0.5 * np.cos(2.0 * np.pi * n / win_len)


def _pad_center(data: np.ndarray, size: int) -> np.ndarray:
    lpad = (size - data.shape[0]) // 2
    rpad = size - data.shape[0] - lpad
    return np.pad(data, (lpad, rpad), mode="constant")


def make_stft_basis_np(n_fft: int, win_len: int, cutoff_p: int) -> np.ndarray:
    """Concatenated [real | imag] windowed Fourier basis, (n_fft, 2*cutoff_p) f32.

    Columns [0, cutoff) hold the real basis, [cutoff_p, cutoff_p+cutoff) the imag
    basis; remaining (padding) columns are zero so their magnitude is 0.
    """
    cutoff = n_fft // 2 + 1
    fft_basis = np.fft.fft(np.eye(n_fft))                 # (n_fft, n_fft) complex
    win = _pad_center(_hann_periodic(win_len), n_fft)     # (n_fft,)
    bre = np.real(fft_basis[:cutoff, :]) * win[None, :]   # (cutoff, n_fft)
    bim = np.imag(fft_basis[:cutoff, :]) * win[None, :]   # (cutoff, n_fft)
    basis = np.zeros((n_fft, 2 * cutoff_p), dtype=np.float32)
    basis[:, :cutoff] = bre.T.astype(np.float32)
    basis[:, cutoff_p:cutoff_p + cutoff] = bim.T.astype(np.float32)
    return basis


# ---------------------------------------------------------------------------
# Pallas kernels
# ---------------------------------------------------------------------------
def _make_stft_kernel(tf, s, g, r, n_fft, cutoff_p, cutoff_r, ov, ov_pad,
                      phase_loop):
    tfs = tf * s  # folded rows owned by one frame tile

    def _load_phase(slab_ref, j):
        # rows j, j+s, ..., j+(tf-1)*s of the slab == phase-j band of all frames
        if s == 1:
            return slab_ref[j:j + tf, :]
        return slab_ref[pl.ds(j, tf, stride=s), :]

    def _fill_slab(xa_ref, head_ref, slab_ref):
        # rows [0, tfs): this tile's folded rows; [tfs, tfs+ov_pad): overlap head
        slab_ref[0:tfs, :] = xa_ref[0]
        if ov > 0:
            slab_ref[tfs:tfs + ov_pad, :] = head_ref[0, 0]

    def _emit(acc, out_ref):
        # Only the round_up(cutoff, 8) useful rows are squared / transposed /
        # stored -- the 128-padding of the basis columns never leaves the MXU.
        re = acc[:, 0:cutoff_r]
        im = acc[:, cutoff_p:cutoff_p + cutoff_r]
        mag = jnp.sqrt(re * re + im * im)                 # (tf, cutoff_r)
        out_ref[0] = mag.T.astype(out_ref.dtype)          # NCW, lane dim = tf

    if phase_loop:
        # g is already MXU-deep (multiple of 256): skip frame materialization.
        def kernel(xa_ref, head_ref, basis_ref, out_ref, slab_ref):
            _fill_slab(xa_ref, head_ref, slab_ref)
            acc = jnp.zeros((tf, 2 * cutoff_p), jnp.float32)
            for j in range(r):
                xj = _load_phase(slab_ref, j).astype(jnp.bfloat16)
                acc = acc + jnp.dot(xj, basis_ref[j],
                                    preferred_element_type=jnp.float32)
            _emit(acc, out_ref)
    else:
        # Build the lane-dense (tf, n_fft) frame tile once, then a single dot.
        def kernel(xa_ref, head_ref, basis_ref, out_ref, slab_ref, frames_ref):
            _fill_slab(xa_ref, head_ref, slab_ref)
            for j in range(r):
                frames_ref[:, j * g:(j + 1) * g] = _load_phase(slab_ref, j)
            acc = jnp.dot(frames_ref[...].astype(jnp.bfloat16), basis_ref[...],
                          preferred_element_type=jnp.float32)
            _emit(acc, out_ref)

    return kernel


# ---------------------------------------------------------------------------
# Wrapper
# ---------------------------------------------------------------------------
def pallas_stft(x: jnp.ndarray, n_fft: int, hop_len: int, win_len: int,
                frames_per_tile: int | None = None) -> jnp.ndarray:
    """x: (batch, timestamps) -> (batch, n_fft // 2 + 1, n_frames) float32."""
    n_fft, hop_len, win_len = int(n_fft), int(hop_len), int(win_len)
    assert n_fft >= win_len
    B, T = x.shape
    assert T > n_fft // 2, "reflect padding requires timestamps > n_fft // 2"

    cutoff = n_fft // 2 + 1
    cutoff_p = 128 * pl.cdiv(cutoff, 128)   # lane/MXU aligned basis columns
    cutoff_r = 8 * pl.cdiv(cutoff, 8)       # sublane-aligned rows actually stored

    # Hop-fold geometry: with g = gcd(n_fft, hop), frames start every s folded
    # rows and span r consecutive folded rows.
    g = math.gcd(n_fft, hop_len)
    r = n_fft // g
    s = hop_len // g
    ov = max(r - s, 0)                      # folded rows borrowed from next tile
    ov_pad = 8 * pl.cdiv(ov, 8)
    head_rows = max(ov_pad, 8)

    pad = n_fft // 2
    x = x.astype(jnp.float32)
    x_pad = jnp.pad(x, ((0, 0), (pad, pad)), mode="reflect")
    t_pad = T + 2 * pad
    n_frames = (t_pad - n_fft) // hop_len + 1

    if frames_per_tile is None:
        frames_per_tile = 128 if (n_frames <= 128 or n_fft >= 1024) else 256
    tf = 128 * pl.cdiv(max(int(frames_per_tile), pl.cdiv(n_fft, hop_len)), 128)
    tfs = tf * s

    n_tiles = pl.cdiv(n_frames, tf)
    n_frames_pad = n_tiles * tf

    # Zero-extend so the folded signal holds exactly (n_tiles + 1) blocks of
    # tfs rows (the "+1" provides the overlap head read by the last tile).
    total_samples = (n_tiles + 1) * tf * hop_len
    assert total_samples >= t_pad
    x_ext = jnp.pad(x_pad, ((0, 0), (0, total_samples - t_pad)))
    x_folded = x_ext.reshape(B, (n_tiles + 1) * tfs, g)

    # Tiny "overlap heads" array: first head_rows folded rows of each NEXT tile.
    # Replaces the previous full duplicate fetch of the next tile.
    heads = x_folded.reshape(B, n_tiles + 1, tfs, g)[:, 1:, :head_rows, :]

    # bf16 basis: native MXU input dtype, halves basis VMEM and DMA.
    basis = jnp.asarray(make_stft_basis_np(n_fft, win_len, cutoff_p),
                        dtype=jnp.bfloat16)

    prefer_phase_loop = (g % 256 == 0)

    # ---- VMEM budget (generation-aware) -----------------------------------
    lane = lambda c: 128 * pl.cdiv(c, 128)
    ncol = 2 * cutoff_p
    est = (2 * tfs * lane(g) * 4             # folded input, double-buffered
           + 2 * head_rows * lane(g) * 4     # overlap heads, double-buffered
           + 2 * n_fft * ncol * 2            # bf16 basis (worst case 2 bufs)
           + 2 * cutoff_r * tf * 4           # output tile, double-buffered
           + (tfs + ov_pad) * lane(g) * 4    # slab scratch
           + tf * lane(n_fft) * 4            # frame scratch (f32)
           + tf * lane(n_fft) * 2            # bf16 frame operand temp
           + tf * ncol * 4)                  # f32 matmul result temp
    try:
        vmem_cap = int(pltpu.get_tpu_info().vmem_capacity_bytes)
    except Exception:
        vmem_cap = 64 << 20                  # conservative (v7x per-core size)
    want = max(32 << 20, 2 * est + (8 << 20))
    vmem_limit = int(min(want, max(int(0.75 * vmem_cap), est + (4 << 20))))

    # ---- build + run ------------------------------------------------------
    def _run(phase_loop: bool, single_buffer_basis: bool):
        kernel = _make_stft_kernel(tf, s, g, r, n_fft, cutoff_p, cutoff_r,
                                   ov, ov_pad, phase_loop)
        scratch = [pltpu.VMEM((tfs + ov_pad, g), jnp.float32)]
        if not phase_loop:
            scratch.append(pltpu.VMEM((tf, n_fft), jnp.float32))

        if phase_loop:
            basis_op = basis.reshape(r, g, ncol)
            basis_shape = (r, g, ncol)
            basis_idx = lambda b, ft: (0, 0, 0)
        else:
            basis_op = basis
            basis_shape = (n_fft, ncol)
            basis_idx = lambda b, ft: (0, 0)
        bkw = (dict(pipeline_mode=pl.Buffered(1))
               if single_buffer_basis else {})

        grid_spec = pltpu.PrefetchScalarGridSpec(
            num_scalar_prefetch=0,
            grid=(B, n_tiles),
            in_specs=[
                # this tile's folded rows
                pl.BlockSpec((1, tfs, g), lambda b, ft: (b, ft, 0)),
                # tiny overlap head borrowed from the next tile
                pl.BlockSpec((1, 1, head_rows, g), lambda b, ft: (b, ft, 0, 0)),
                # constant [re|im] basis
                pl.BlockSpec(basis_shape, basis_idx, **bkw),
            ],
            out_specs=pl.BlockSpec((1, cutoff_r, tf), lambda b, ft: (b, 0, ft)),
            scratch_shapes=scratch,
        )
        fn = pl.pallas_call(
            kernel,
            out_shape=jax.ShapeDtypeStruct((B, cutoff_r, n_frames_pad),
                                           jnp.float32),
            grid_spec=grid_spec,
            compiler_params=pltpu.CompilerParams(
                dimension_semantics=("parallel", "parallel"),
                vmem_limit_bytes=vmem_limit,
            ),
        )
        return jax.block_until_ready(fn(x_folded, heads, basis_op))

    # Preferred config first; graceful fallback if pl.Buffered(1) (or the
    # single-dot frame assembly) is rejected by the running jax/Mosaic version.
    if prefer_phase_loop:
        attempts = ((True, True), (True, False))
    else:
        attempts = ((False, True), (False, False), (True, True), (True, False))
    out_padded, last_err = None, None
    for phase_loop, single_buf in attempts:
        try:
            out_padded = _run(phase_loop, single_buf)
            break
        except Exception as err:       # fall back to the next configuration
            last_err = err
    if out_padded is None:
        raise last_err

    # Only padding removal remains host-side (kernel already wrote NCW layout).
    return out_padded[:, :cutoff, :n_frames]


# ---------------------------------------------------------------------------
if __name__ == "__main__":
    n_fft, hop_len, win_len = 16, 4, 16
    batch, timestamps = 2, 560   # 141 frames -> 2 frame tiles (exercises overlap heads)

    key = jax.random.PRNGKey(0)
    x = jax.random.normal(key, (batch, timestamps), dtype=jnp.float32)

    out = pallas_stft(x, n_fft, hop_len, win_len, frames_per_tile=128)
    out = jax.block_until_ready(out)

    # ---- references -------------------------------------------------------
    cutoff = n_fft // 2 + 1
    cutoff_p = 128 * pl.cdiv(cutoff, 128)
    basis_f32 = make_stft_basis_np(n_fft, win_len, cutoff_p)
    bre = jnp.asarray(basis_f32[:, :cutoff])
    bim = jnp.asarray(basis_f32[:, cutoff_p:cutoff_p + cutoff])

    pad = n_fft // 2
    x_pad = jnp.pad(x, ((0, 0), (pad, pad)), mode="reflect")
    n_frames = (timestamps + 2 * pad - n_fft) // hop_len + 1
    idx = jnp.arange(n_frames)[:, None] * hop_len + jnp.arange(n_fft)[None, :]
    frames = x_pad[:, idx]                                 # (B, n_frames, n_fft)

    # exact f32 module semantics
    re32 = jnp.einsum("bfn,nc->bfc", frames, bre)
    im32 = jnp.einsum("bfn,nc->bfc", frames, bim)
    ref32 = jnp.transpose(jnp.sqrt(re32 * re32 + im32 * im32), (0, 2, 1))

    # bf16-operand-matched reference (same MXU feed precision as the kernel)
    fb = frames.astype(jnp.bfloat16)
    re16 = jnp.einsum("bfn,nc->bfc", fb, bre.astype(jnp.bfloat16),
                      preferred_element_type=jnp.float32)
    im16 = jnp.einsum("bfn,nc->bfc", fb, bim.astype(jnp.bfloat16),
                      preferred_element_type=jnp.float32)
    ref16 = jnp.transpose(jnp.sqrt(re16 * re16 + im16 * im16), (0, 2, 1))

    assert out.shape == (batch, cutoff, n_frames), out.shape
    np.testing.assert_allclose(np.asarray(out), np.asarray(ref16),
                               rtol=2e-3, atol=2e-3)
    np.testing.assert_allclose(np.asarray(out), np.asarray(ref32),
                               rtol=5e-2, atol=5e-2)
    print("KERNEL_OK")
</pallas_src>

<mosaic_0001>
module attributes {stable_mosaic.version = 11 : i64} {
  func.func @kernel(%arg0: i32, %arg1: i32, %arg2: memref<1x128x4xf32, #tpu.memory_space<vmem>>, %arg3: memref<1x1x8x4xf32, #tpu.memory_space<vmem>>, %arg4: memref<16x256xbf16, #tpu.memory_space<vmem>>, %arg5: memref<1x16x128xf32, #tpu.memory_space<vmem>>, %arg6: memref<136x4xf32, #tpu.memory_space<vmem>>, %arg7: memref<128x16xf32, #tpu.memory_space<vmem>>) attributes {dimension_semantics = [#tpu.dimension_semantics<parallel>, #tpu.dimension_semantics<parallel>], iteration_bounds = array<i64: 2, 2>, scalar_prefetch = 0 : i64, scratch_operands = 2 : i64, tpu.core_type = #tpu.core_type<tc>, window_params = [{transform_indices = @transform_0, window_bounds = array<i64: 1, 128, 4>}, {transform_indices = @transform_1, window_bounds = array<i64: 1, 1, 8, 4>}, {pipeline_mode = #tpu.pipeline_mode<synchronous>, transform_indices = @transform_2, window_bounds = array<i64: 16, 256>}, {transform_indices = @transform_3, window_bounds = array<i64: 1, 16, 128>}]} {
    %c0 = arith.constant 0 : index
    %c0_0 = arith.constant 0 : index
    %c0_1 = arith.constant 0 : index
    %0 = vector.load %arg2[%c0, %c0_0, %c0_1] : memref<1x128x4xf32, #tpu.memory_space<vmem>>, vector<1x128x4xf32>
    %1 = vector.shape_cast %0 : vector<1x128x4xf32> to vector<128x4xf32>
    %c0_2 = arith.constant 0 : index
    %c0_3 = arith.constant 0 : index
    %2 = vector.load %arg6[%c0_2, %c0_3] : memref<136x4xf32, #tpu.memory_space<vmem>>, vector<128x4xf32>
    tpu.vector_store %arg6[%c0_2, %c0_3], %1 {strides = array<i32>} : memref<136x4xf32, #tpu.memory_space<vmem>>, vector<128x4xf32>,
    %c0_4 = arith.constant 0 : index
    %c0_5 = arith.constant 0 : index
    %c0_6 = arith.constant 0 : index
    %c0_7 = arith.constant 0 : index
    %3 = vector.load %arg3[%c0_4, %c0_5, %c0_6, %c0_7] : memref<1x1x8x4xf32, #tpu.memory_space<vmem>>, vector<1x1x8x4xf32>
    %4 = vector.shape_cast %3 : vector<1x1x8x4xf32> to vector<8x4xf32>
    %c128 = arith.constant 128 : index
    %c0_8 = arith.constant 0 : index
    %5 = vector.load %arg6[%c128, %c0_8] : memref<136x4xf32, #tpu.memory_space<vmem>>, vector<8x4xf32>
    tpu.vector_store %arg6[%c128, %c0_8], %4 {strides = array<i32>} : memref<136x4xf32, #tpu.memory_space<vmem>>, vector<8x4xf32>,
    %c0_9 = arith.constant 0 : index
    %c0_10 = arith.constant 0 : index
    %6 = vector.load %arg6[%c0_9, %c0_10] : memref<136x4xf32, #tpu.memory_space<vmem>>, vector<128x4xf32>
    %c0_11 = arith.constant 0 : index
    %c0_12 = arith.constant 0 : index
    %7 = vector.load %arg7[%c0_11, %c0_12] : memref<128x16xf32, #tpu.memory_space<vmem>>, vector<128x4xf32>
    tpu.vector_store %arg7[%c0_11, %c0_12], %6 {strides = array<i32>} : memref<128x16xf32, #tpu.memory_space<vmem>>, vector<128x4xf32>,
    %c1 = arith.constant 1 : index
    %c0_13 = arith.constant 0 : index
    %8 = vector.load %arg6[%c1, %c0_13] : memref<136x4xf32, #tpu.memory_space<vmem>>, vector<128x4xf32>
    %c0_14 = arith.constant 0 : index
    %c4 = arith.constant 4 : index
    %9 = vector.load %arg7[%c0_14, %c4] : memref<128x16xf32, #tpu.memory_space<vmem>>, vector<128x4xf32>
    tpu.vector_store %arg7[%c0_14, %c4], %8 {strides = array<i32>} : memref<128x16xf32, #tpu.memory_space<vmem>>, vector<128x4xf32>,
    %c2 = arith.constant 2 : index
    %c0_15 = arith.constant 0 : index
    %10 = vector.load %arg6[%c2, %c0_15] : memref<136x4xf32, #tpu.memory_space<vmem>>, vector<128x4xf32>
    %c0_16 = arith.constant 0 : index
    %c8 = arith.constant 8 : index
    %11 = vector.load %arg7[%c0_16, %c8] : memref<128x16xf32, #tpu.memory_space<vmem>>, vector<128x4xf32>
    tpu.vector_store %arg7[%c0_16, %c8], %10 {strides = array<i32>} : memref<128x16xf32, #tpu.memory_space<vmem>>, vector<128x4xf32>,
    %c3 = arith.constant 3 : index
    %c0_17 = arith.constant 0 : index
    %12 = vector.load %arg6[%c3, %c0_17] : memref<136x4xf32, #tpu.memory_space<vmem>>, vector<128x4xf32>
    %c0_18 = arith.constant 0 : index
    %c12 = arith.constant 12 : index
    %13 = vector.load %arg7[%c0_18, %c12] : memref<128x16xf32, #tpu.memory_space<vmem>>, vector<128x4xf32>
    tpu.vector_store %arg7[%c0_18, %c12], %12 {strides = array<i32>} : memref<128x16xf32, #tpu.memory_space<vmem>>, vector<128x4xf32>,
    %c0_19 = arith.constant 0 : index
    %c0_20 = arith.constant 0 : index
    %14 = vector.load %arg7[%c0_19, %c0_20] : memref<128x16xf32, #tpu.memory_space<vmem>>, vector<128x16xf32>
    %15 = arith.truncf %14 : vector<128x16xf32> to vector<128x16xbf16>
    %c0_21 = arith.constant 0 : index
    %c0_22 = arith.constant 0 : index
    %16 = vector.load %arg4[%c0_21, %c0_22] : memref<16x256xbf16, #tpu.memory_space<vmem>>, vector<16x256xbf16>
    %cst = arith.constant dense<0.000000e+00> : vector<128x256xf32>
    %17 = tpu.matmul %15, %16, %cst {dimension_numbers = #tpu.dot_dimension_numbers<[1], [0], [0], [1], [0, 0, 1, 1], [], []>} : vector<128x16xbf16>, vector<16x256xbf16>, vector<128x256xf32> -> vector<128x256xf32>
    %18 = vector.extract_strided_slice %17 {offsets = [0, 0], sizes = [128, 16], strides = [1, 1]} : vector<128x256xf32> to vector<128x16xf32>
    %19 = vector.extract_strided_slice %17 {offsets = [0, 128], sizes = [128, 16], strides = [1, 1]} : vector<128x256xf32> to vector<128x16xf32>
    %20 = arith.mulf %18, %18 : vector<128x16xf32>
    %21 = arith.mulf %19, %19 : vector<128x16xf32>
    %22 = arith.addf %20, %21 : vector<128x16xf32>
    %23 = math.sqrt %22 : vector<128x16xf32>
    %24 = tpu.transpose %23, [1, 0] : vector<128x16xf32> -> vector<16x128xf32>
    %c0_23 = arith.constant 0 : index
    %c0_24 = arith.constant 0 : index
    %c0_25 = arith.constant 0 : index
    %25 = vector.load %arg5[%c0_23, %c0_24, %c0_25] : memref<1x16x128xf32, #tpu.memory_space<vmem>>, vector<1x16x128xf32>
    %26 = vector.shape_cast %25 : vector<1x16x128xf32> to vector<16x128xf32>
    %27 = vector.shape_cast %24 : vector<16x128xf32> to vector<1x16x128xf32>
    tpu.vector_store %arg5[%c0_23, %c0_24, %c0_25], %27 {strides = array<i32>} : memref<1x16x128xf32, #tpu.memory_space<vmem>>, vector<1x16x128xf32>,
    return
  }
  func.func @transform_0(%arg0: i32, %arg1: i32) -> (i32, i32, i32) {
    %c0_i32 = arith.constant 0 : i32
    %c0_i32_0 = arith.constant 0 : i32
    return %arg0, %arg1, %c0_i32 : i32, i32, i32
  }
  func.func @transform_1(%arg0: i32, %arg1: i32) -> (i32, i32, i32, i32) {
    %c0_i32 = arith.constant 0 : i32
    %c0_i32_0 = arith.constant 0 : i32
    %c0_i32_1 = arith.constant 0 : i32
    return %arg0, %arg1, %c0_i32, %c0_i32_0 : i32, i32, i32, i32
  }
  func.func @transform_2(%arg0: i32, %arg1: i32) -> (i32, i32) {
    %c0_i32 = arith.constant 0 : i32
    %c0_i32_0 = arith.constant 0 : i32
    %c0_i32_1 = arith.constant 0 : i32
    return %c0_i32, %c0_i32_0 : i32, i32
  }
  func.func @transform_3(%arg0: i32, %arg1: i32) -> (i32, i32, i32) {
    %c0_i32 = arith.constant 0 : i32
    %c0_i32_0 = arith.constant 0 : i32
    return %arg0, %c0_i32, %arg1 : i32, i32, i32
  }
}

module attributes {stable_mosaic.version = 11 : i64} {
  func.func @kernel(%arg0: i32, %arg1: i32, %arg2: memref<1x128x4xf32, #tpu.memory_space<vmem>>, %arg3: memref<1x1x8x4xf32, #tpu.memory_space<vmem>>, %arg4: memref<16x256xbf16, #tpu.memory_space<vmem>>, %arg5: memref<1x16x128xf32, #tpu.memory_space<vmem>>, %arg6: memref<136x4xf32, #tpu.memory_space<vmem>>, %arg7: memref<128x16xf32, #tpu.memory_space<vmem>>) attributes {dimension_semantics = [#tpu.dimension_semantics<parallel>, #tpu.dimension_semantics<parallel>], iteration_bounds = array<i64: 2, 2>, scalar_prefetch = 0 : i64, scratch_operands = 2 : i64, tpu.core_type = #tpu.core_type<tc>, window_params = [{transform_indices = @transform_0, window_bounds = array<i64: 1, 128, 4>}, {transform_indices = @transform_1, window_bounds = array<i64: 1, 1, 8, 4>}, {pipeline_mode = #tpu.pipeline_mode<synchronous>, transform_indices = @transform_2, window_bounds = array<i64: 16, 256>}, {transform_indices = @transform_3, window_bounds = array<i64: 1, 16, 128>}]} {
    %c0 = arith.constant 0 : index
    %c0_0 = arith.constant 0 : index
    %c0_1 = arith.constant 0 : index
    %0 = vector.load %arg2[%c0, %c0_0, %c0_1] : memref<1x128x4xf32, #tpu.memory_space<vmem>>, vector<1x128x4xf32>
    %1 = vector.shape_cast %0 : vector<1x128x4xf32> to vector<128x4xf32>
    %c0_2 = arith.constant 0 : index
    %c0_3 = arith.constant 0 : index
    %2 = vector.load %arg6[%c0_2, %c0_3] : memref<136x4xf32, #tpu.memory_space<vmem>>, vector<128x4xf32>
    tpu.vector_store %arg6[%c0_2, %c0_3], %1 {strides = array<i32>} : memref<136x4xf32, #tpu.memory_space<vmem>>, vector<128x4xf32>,
    %c0_4 = arith.constant 0 : index
    %c0_5 = arith.constant 0 : index
    %c0_6 = arith.constant 0 : index
    %c0_7 = arith.constant 0 : index
    %3 = vector.load %arg3[%c0_4, %c0_5, %c0_6, %c0_7] : memref<1x1x8x4xf32, #tpu.memory_space<vmem>>, vector<1x1x8x4xf32>
    %4 = vector.shape_cast %3 : vector<1x1x8x4xf32> to vector<8x4xf32>
    %c128 = arith.constant 128 : index
    %c0_8 = arith.constant 0 : index
    %5 = vector.load %arg6[%c128, %c0_8] : memref<136x4xf32, #tpu.memory_space<vmem>>, vector<8x4xf32>
    tpu.vector_store %arg6[%c128, %c0_8], %4 {strides = array<i32>} : memref<136x4xf32, #tpu.memory_space<vmem>>, vector<8x4xf32>,
    %c0_9 = arith.constant 0 : index
    %c0_10 = arith.constant 0 : index
    %6 = vector.load %arg6[%c0_9, %c0_10] : memref<136x4xf32, #tpu.memory_space<vmem>>, vector<128x4xf32>
    %c0_11 = arith.constant 0 : index
    %c0_12 = arith.constant 0 : index
    %7 = vector.load %arg7[%c0_11, %c0_12] : memref<128x16xf32, #tpu.memory_space<vmem>>, vector<128x4xf32>
    tpu.vector_store %arg7[%c0_11, %c0_12], %6 {strides = array<i32>} : memref<128x16xf32, #tpu.memory_space<vmem>>, vector<128x4xf32>,
    %c1 = arith.constant 1 : index
    %c0_13 = arith.constant 0 : index
    %8 = vector.load %arg6[%c1, %c0_13] : memref<136x4xf32, #tpu.memory_space<vmem>>, vector<128x4xf32>
    %c0_14 = arith.constant 0 : index
    %c4 = arith.constant 4 : index
    %9 = vector.load %arg7[%c0_14, %c4] : memref<128x16xf32, #tpu.memory_space<vmem>>, vector<128x4xf32>
    tpu.vector_store %arg7[%c0_14, %c4], %8 {strides = array<i32>} : memref<128x16xf32, #tpu.memory_space<vmem>>, vector<128x4xf32>,
    %c2 = arith.constant 2 : index
    %c0_15 = arith.constant 0 : index
    %10 = vector.load %arg6[%c2, %c0_15] : memref<136x4xf32, #tpu.memory_space<vmem>>, vector<128x4xf32>
    %c0_16 = arith.constant 0 : index
    %c8 = arith.constant 8 : index
    %11 = vector.load %arg7[%c0_16, %c8] : memref<128x16xf32, #tpu.memory_space<vmem>>, vector<128x4xf32>
    tpu.vector_store %arg7[%c0_16, %c8], %10 {strides = array<i32>} : memref<128x16xf32, #tpu.memory_space<vmem>>, vector<128x4xf32>,
    %c3 = arith.constant 3 : index
    %c0_17 = arith.constant 0 : index
    %12 = vector.load %arg6[%c3, %c0_17] : memref<136x4xf32, #tpu.memory_space<vmem>>, vector<128x4xf32>
    %c0_18 = arith.constant 0 : index
    %c12 = arith.constant 12 : index
    %13 = vector.load %arg7[%c0_18, %c12] : memref<128x16xf32, #tpu.memory_space<vmem>>, vector<128x4xf32>
    tpu.vector_store %arg7[%c0_18, %c12], %12 {strides = array<i32>} : memref<128x16xf32, #tpu.memory_space<vmem>>, vector<128x4xf32>,
    %c0_19 = arith.constant 0 : index
    %c0_20 = arith.constant 0 : index
    %14 = vector.load %arg7[%c0_19, %c0_20] : memref<128x16xf32, #tpu.memory_space<vmem>>, vector<128x16xf32>
    %15 = arith.truncf %14 : vector<128x16xf32> to vector<128x16xbf16>
    %c0_21 = arith.constant 0 : index
    %c0_22 = arith.constant 0 : index
    %16 = vector.load %arg4[%c0_21, %c0_22] : memref<16x256xbf16, #tpu.memory_space<vmem>>, vector<16x256xbf16>
    %cst = arith.constant dense<0.000000e+00> : vector<128x256xf32>
    %17 = tpu.matmul %15, %16, %cst {dimension_numbers = #tpu.dot_dimension_numbers<[1], [0], [0], [1], [0, 0, 1, 1], [], []>} : vector<128x16xbf16>, vector<16x256xbf16>, vector<128x256xf32> -> vector<128x256xf32>
    %18 = vector.extract_strided_slice %17 {offsets = [0, 0], sizes = [128, 16], strides = [1, 1]} : vector<128x256xf32> to vector<128x16xf32>
    %19 = vector.extract_strided_slice %17 {offsets = [0, 128], sizes = [128, 16], strides = [1, 1]} : vector<128x256xf32> to vector<128x16xf32>
    %20 = arith.mulf %18, %18 : vector<128x16xf32>
    %21 = arith.mulf %19, %19 : vector<128x16xf32>
    %22 = arith.addf %20, %21 : vector<128x16xf32>
    %23 = math.sqrt %22 : vector<128x16xf32>
    %24 = tpu.transpose %23, [1, 0] : vector<128x16xf32> -> vector<16x128xf32>
    %c0_23 = arith.constant 0 : index
    %c0_24 = arith.constant 0 : index
    %c0_25 = arith.constant 0 : index
    %25 = vector.load %arg5[%c0_23, %c0_24, %c0_25] : memref<1x16x128xf32, #tpu.memory_space<vmem>>, vector<1x16x128xf32>
    %26 = vector.shape_cast %25 : vector<1x16x128xf32> to vector<16x128xf32>
    %27 = vector.shape_cast %24 : vector<16x128xf32> to vector<1x16x128xf32>
    tpu.vector_store %arg5[%c0_23, %c0_24, %c0_25], %27 {strides = array<i32>} : memref<1x16x128xf32, #tpu.memory_space<vmem>>, vector<1x16x128xf32>,
    return
  }
  func.func @transform_0(%arg0: i32, %arg1: i32) -> (i32, i32, i32) {
    %c0_i32 = arith.constant 0 : i32
    %c0_i32_0 = arith.constant 0 : i32
    return %arg0, %arg1, %c0_i32 : i32, i32, i32
  }
  func.func @transform_1(%arg0: i32, %arg1: i32) -> (i32, i32, i32, i32) {
    %c0_i32 = arith.constant 0 : i32
    %c0_i32_0 = arith.constant 0 : i32
    %c0_i32_1 = arith.constant 0 : i32
    return %arg0, %arg1, %c0_i32, %c0_i32_0 : i32, i32, i32, i32
  }
  func.func @transform_2(%arg0: i32, %arg1: i32) -> (i32, i32) {
    %c0_i32 = arith.constant 0 : i32
    %c0_i32_0 = arith.constant 0 : i32
    %c0_i32_1 = arith.constant 0 : i32
    return %c0_i32, %c0_i32_0 : i32, i32
  }
  func.func @transform_3(%arg0: i32, %arg1: i32) -> (i32, i32, i32) {
    %c0_i32 = arith.constant 0 : i32
    %c0_i32_0 = arith.constant 0 : i32
    return %arg0, %c0_i32, %arg1 : i32, i32, i32
  }
}

module attributes {stable_mosaic.version = 11 : i64} {
  func.func @kernel(%arg0: i32, %arg1: i32, %arg2: memref<1x128x4xf32, #tpu.memory_space<vmem>>, %arg3: memref<1x1x8x4xf32, #tpu.memory_space<vmem>>, %arg4: memref<4x4x256xbf16, #tpu.memory_space<vmem>>, %arg5: memref<1x16x128xf32, #tpu.memory_space<vmem>>, %arg6: memref<136x4xf32, #tpu.memory_space<vmem>>) attributes {dimension_semantics = [#tpu.dimension_semantics<parallel>, #tpu.dimension_semantics<parallel>], iteration_bounds = array<i64: 2, 2>, scalar_prefetch = 0 : i64, scratch_operands = 1 : i64, tpu.core_type = #tpu.core_type<tc>, window_params = [{transform_indices = @transform_0, window_bounds = array<i64: 1, 128, 4>}, {transform_indices = @transform_1, window_bounds = array<i64: 1, 1, 8, 4>}, {pipeline_mode = #tpu.pipeline_mode<synchronous>, transform_indices = @transform_2, window_bounds = array<i64: 4, 4, 256>}, {transform_indices = @transform_3, window_bounds = array<i64: 1, 16, 128>}]} {
    %c0 = arith.constant 0 : index
    %c0_0 = arith.constant 0 : index
    %c0_1 = arith.constant 0 : index
    %0 = vector.load %arg2[%c0, %c0_0, %c0_1] : memref<1x128x4xf32, #tpu.memory_space<vmem>>, vector<1x128x4xf32>
    %1 = vector.shape_cast %0 : vector<1x128x4xf32> to vector<128x4xf32>
    %c0_2 = arith.constant 0 : index
    %c0_3 = arith.constant 0 : index
    %2 = vector.load %arg6[%c0_2, %c0_3] : memref<136x4xf32, #tpu.memory_space<vmem>>, vector<128x4xf32>
    tpu.vector_store %arg6[%c0_2, %c0_3], %1 {strides = array<i32>} : memref<136x4xf32, #tpu.memory_space<vmem>>, vector<128x4xf32>,
    %c0_4 = arith.constant 0 : index
    %c0_5 = arith.constant 0 : index
    %c0_6 = arith.constant 0 : index
    %c0_7 = arith.constant 0 : index
    %3 = vector.load %arg3[%c0_4, %c0_5, %c0_6, %c0_7] : memref<1x1x8x4xf32, #tpu.memory_space<vmem>>, vector<1x1x8x4xf32>
    %4 = vector.shape_cast %3 : vector<1x1x8x4xf32> to vector<8x4xf32>
    %c128 = arith.constant 128 : index
    %c0_8 = arith.constant 0 : index
    %5 = vector.load %arg6[%c128, %c0_8] : memref<136x4xf32, #tpu.memory_space<vmem>>, vector<8x4xf32>
    tpu.vector_store %arg6[%c128, %c0_8], %4 {strides = array<i32>} : memref<136x4xf32, #tpu.memory_space<vmem>>, vector<8x4xf32>,
    %cst = arith.constant 0.000000e+00 : f32
    %6 = vector.broadcast %cst : f32 to vector<128x256xf32>
    %c0_9 = arith.constant 0 : index
    %c0_10 = arith.constant 0 : index
    %7 = vector.load %arg6[%c0_9, %c0_10] : memref<136x4xf32, #tpu.memory_space<vmem>>, vector<128x4xf32>
    %8 = arith.truncf %7 : vector<128x4xf32> to vector<128x4xbf16>
    %c0_11 = arith.constant 0 : index
    %c0_12 = arith.constant 0 : index
    %c0_13 = arith.constant 0 : index
    %9 = vector.load %arg4[%c0_11, %c0_12, %c0_13] : memref<4x4x256xbf16, #tpu.memory_space<vmem>>, vector<1x4x256xbf16>
    %10 = vector.shape_cast %9 : vector<1x4x256xbf16> to vector<4x256xbf16>
    %cst_14 = arith.constant dense<0.000000e+00> : vector<128x256xf32>
    %11 = tpu.matmul %8, %10, %cst_14 {dimension_numbers = #tpu.dot_dimension_numbers<[1], [0], [0], [1], [0, 0, 1, 1], [], []>} : vector<128x4xbf16>, vector<4x256xbf16>, vector<128x256xf32> -> vector<128x256xf32>
    %12 = arith.addf %6, %11 : vector<128x256xf32>
    %c1 = arith.constant 1 : index
    %c0_15 = arith.constant 0 : index
    %13 = vector.load %arg6[%c1, %c0_15] : memref<136x4xf32, #tpu.memory_space<vmem>>, vector<128x4xf32>
    %14 = arith.truncf %13 : vector<128x4xf32> to vector<128x4xbf16>
    %c1_16 = arith.constant 1 : index
    %c0_17 = arith.constant 0 : index
    %c0_18 = arith.constant 0 : index
    %15 = vector.load %arg4[%c1_16, %c0_17, %c0_18] : memref<4x4x256xbf16, #tpu.memory_space<vmem>>, vector<1x4x256xbf16>
    %16 = vector.shape_cast %15 : vector<1x4x256xbf16> to vector<4x256xbf16>
    %cst_19 = arith.constant dense<0.000000e+00> : vector<128x256xf32>
    %17 = tpu.matmul %14, %16, %cst_19 {dimension_numbers = #tpu.dot_dimension_numbers<[1], [0], [0], [1], [0, 0, 1, 1], [], []>} : vector<128x4xbf16>, vector<4x256xbf16>, vector<128x256xf32> -> vector<128x256xf32>
    %18 = arith.addf %12, %17 : vector<128x256xf32>
    %c2 = arith.constant 2 : index
    %c0_20 = arith.constant 0 : index
    %19 = vector.load %arg6[%c2, %c0_20] : memref<136x4xf32, #tpu.memory_space<vmem>>, vector<128x4xf32>
    %20 = arith.truncf %19 : vector<128x4xf32> to vector<128x4xbf16>
    %c2_21 = arith.constant 2 : index
    %c0_22 = arith.constant 0 : index
    %c0_23 = arith.constant 0 : index
    %21 = vector.load %arg4[%c2_21, %c0_22, %c0_23] : memref<4x4x256xbf16, #tpu.memory_space<vmem>>, vector<1x4x256xbf16>
    %22 = vector.shape_cast %21 : vector<1x4x256xbf16> to vector<4x256xbf16>
    %cst_24 = arith.constant dense<0.000000e+00> : vector<128x256xf32>
    %23 = tpu.matmul %20, %22, %cst_24 {dimension_numbers = #tpu.dot_dimension_numbers<[1], [0], [0], [1], [0, 0, 1, 1], [], []>} : vector<128x4xbf16>, vector<4x256xbf16>, vector<128x256xf32> -> vector<128x256xf32>
    %24 = arith.addf %18, %23 : vector<128x256xf32>
    %c3 = arith.constant 3 : index
    %c0_25 = arith.constant 0 : index
    %25 = vector.load %arg6[%c3, %c0_25] : memref<136x4xf32, #tpu.memory_space<vmem>>, vector<128x4xf32>
    %26 = arith.truncf %25 : vector<128x4xf32> to vector<128x4xbf16>
    %c3_26 = arith.constant 3 : index
    %c0_27 = arith.constant 0 : index
    %c0_28 = arith.constant 0 : index
    %27 = vector.load %arg4[%c3_26, %c0_27, %c0_28] : memref<4x4x256xbf16, #tpu.memory_space<vmem>>, vector<1x4x256xbf16>
    %28 = vector.shape_cast %27 : vector<1x4x256xbf16> to vector<4x256xbf16>
    %cst_29 = arith.constant dense<0.000000e+00> : vector<128x256xf32>
    %29 = tpu.matmul %26, %28, %cst_29 {dimension_numbers = #tpu.dot_dimension_numbers<[1], [0], [0], [1], [0, 0, 1, 1], [], []>} : vector<128x4xbf16>, vector<4x256xbf16>, vector<128x256xf32> -> vector<128x256xf32>
    %30 = arith.addf %24, %29 : vector<128x256xf32>
    %31 = vector.extract_strided_slice %30 {offsets = [0, 0], sizes = [128, 16], strides = [1, 1]} : vector<128x256xf32> to vector<128x16xf32>
    %32 = vector.extract_strided_slice %30 {offsets = [0, 128], sizes = [128, 16], strides = [1, 1]} : vector<128x256xf32> to vector<128x16xf32>
    %33 = arith.mulf %31, %31 : vector<128x16xf32>
    %34 = arith.mulf %32, %32 : vector<128x16xf32>
    %35 = arith.addf %33, %34 : vector<128x16xf32>
    %36 = math.sqrt %35 : vector<128x16xf32>
    %37 = tpu.transpose %36, [1, 0] : vector<128x16xf32> -> vector<16x128xf32>
    %c0_30 = arith.constant 0 : index
    %c0_31 = arith.constant 0 : index
    %c0_32 = arith.constant 0 : index
    %38 = vector.load %arg5[%c0_30, %c0_31, %c0_32] : memref<1x16x128xf32, #tpu.memory_space<vmem>>, vector<1x16x128xf32>
    %39 = vector.shape_cast %38 : vector<1x16x128xf32> to vector<16x128xf32>
    %40 = vector.shape_cast %37 : vector<16x128xf32> to vector<1x16x128xf32>
    tpu.vector_store %arg5[%c0_30, %c0_31, %c0_32], %40 {strides = array<i32>} : memref<1x16x128xf32, #tpu.memory_space<vmem>>, vector<1x16x128xf32>,
    return
  }
  func.func @transform_0(%arg0: i32, %arg1: i32) -> (i32, i32, i32) {
    %c0_i32 = arith.constant 0 : i32
    %c0_i32_0 = arith.constant 0 : i32
    return %arg0, %arg1, %c0_i32 : i32, i32, i32
  }
  func.func @transform_1(%arg0: i32, %arg1: i32) -> (i32, i32, i32, i32) {
    %c0_i32 = arith.constant 0 : i32
    %c0_i32_0 = arith.constant 0 : i32
    %c0_i32_1 = arith.constant 0 : i32
    return %arg0, %arg1, %c0_i32, %c0_i32_0 : i32, i32, i32, i32
  }
  func.func @transform_2(%arg0: i32, %arg1: i32) -> (i32, i32, i32) {
    %c0_i32 = arith.constant 0 : i32
    %c0_i32_0 = arith.constant 0 : i32
    %c0_i32_1 = arith.constant 0 : i32
    %c0_i32_2 = arith.constant 0 : i32
    return %c0_i32, %c0_i32_0, %c0_i32_1 : i32, i32, i32
  }
  func.func @transform_3(%arg0: i32, %arg1: i32) -> (i32, i32, i32) {
    %c0_i32 = arith.constant 0 : i32
    %c0_i32_0 = arith.constant 0 : i32
    return %arg0, %c0_i32, %arg1 : i32, i32, i32
  }
}

module attributes {stable_mosaic.version = 11 : i64} {
  func.func @kernel(%arg0: i32, %arg1: i32, %arg2: memref<1x128x4xf32, #tpu.memory_space<vmem>>, %arg3: memref<1x1x8x4xf32, #tpu.memory_space<vmem>>, %arg4: memref<4x4x256xbf16, #tpu.memory_space<vmem>>, %arg5: memref<1x16x128xf32, #tpu.memory_space<vmem>>, %arg6: memref<136x4xf32, #tpu.memory_space<vmem>>) attributes {dimension_semantics = [#tpu.dimension_semantics<parallel>, #tpu.dimension_semantics<parallel>], iteration_bounds = array<i64: 2, 2>, scalar_prefetch = 0 : i64, scratch_operands = 1 : i64, tpu.core_type = #tpu.core_type<tc>, window_params = [{transform_indices = @transform_0, window_bounds = array<i64: 1, 128, 4>}, {transform_indices = @transform_1, window_bounds = array<i64: 1, 1, 8, 4>}, {pipeline_mode = #tpu.pipeline_mode<synchronous>, transform_indices = @transform_2, window_bounds = array<i64: 4, 4, 256>}, {transform_indices = @transform_3, window_bounds = array<i64: 1, 16, 128>}]} {
    %c0 = arith.constant 0 : index
    %c0_0 = arith.constant 0 : index
    %c0_1 = arith.constant 0 : index
    %0 = vector.load %arg2[%c0, %c0_0, %c0_1] : memref<1x128x4xf32, #tpu.memory_space<vmem>>, vector<1x128x4xf32>
    %1 = vector.shape_cast %0 : vector<1x128x4xf32> to vector<128x4xf32>
    %c0_2 = arith.constant 0 : index
    %c0_3 = arith.constant 0 : index
    %2 = vector.load %arg6[%c0_2, %c0_3] : memref<136x4xf32, #tpu.memory_space<vmem>>, vector<128x4xf32>
    tpu.vector_store %arg6[%c0_2, %c0_3], %1 {strides = array<i32>} : memref<136x4xf32, #tpu.memory_space<vmem>>, vector<128x4xf32>,
    %c0_4 = arith.constant 0 : index
    %c0_5 = arith.constant 0 : index
    %c0_6 = arith.constant 0 : index
    %c0_7 = arith.constant 0 : index
    %3 = vector.load %arg3[%c0_4, %c0_5, %c0_6, %c0_7] : memref<1x1x8x4xf32, #tpu.memory_space<vmem>>, vector<1x1x8x4xf32>
    %4 = vector.shape_cast %3 : vector<1x1x8x4xf32> to vector<8x4xf32>
    %c128 = arith.constant 128 : index
    %c0_8 = arith.constant 0 : index
    %5 = vector.load %arg6[%c128, %c0_8] : memref<136x4xf32, #tpu.memory_space<vmem>>, vector<8x4xf32>
    tpu.vector_store %arg6[%c128, %c0_8], %4 {strides = array<i32>} : memref<136x4xf32, #tpu.memory_space<vmem>>, vector<8x4xf32>,
    %cst = arith.constant 0.000000e+00 : f32
    %6 = vector.broadcast %cst : f32 to vector<128x256xf32>
    %c0_9 = arith.constant 0 : index
    %c0_10 = arith.constant 0 : index
    %7 = vector.load %arg6[%c0_9, %c0_10] : memref<136x4xf32, #tpu.memory_space<vmem>>, vector<128x4xf32>
    %8 = arith.truncf %7 : vector<128x4xf32> to vector<128x4xbf16>
    %c0_11 = arith.constant 0 : index
    %c0_12 = arith.constant 0 : index
    %c0_13 = arith.constant 0 : index
    %9 = vector.load %arg4[%c0_11, %c0_12, %c0_13] : memref<4x4x256xbf16, #tpu.memory_space<vmem>>, vector<1x4x256xbf16>
    %10 = vector.shape_cast %9 : vector<1x4x256xbf16> to vector<4x256xbf16>
    %cst_14 = arith.constant dense<0.000000e+00> : vector<128x256xf32>
    %11 = tpu.matmul %8, %10, %cst_14 {dimension_numbers = #tpu.dot_dimension_numbers<[1], [0], [0], [1], [0, 0, 1, 1], [], []>} : vector<128x4xbf16>, vector<4x256xbf16>, vector<128x256xf32> -> vector<128x256xf32>
    %12 = arith.addf %6, %11 : vector<128x256xf32>
    %c1 = arith.constant 1 : index
    %c0_15 = arith.constant 0 : index
    %13 = vector.load %arg6[%c1, %c0_15] : memref<136x4xf32, #tpu.memory_space<vmem>>, vector<128x4xf32>
    %14 = arith.truncf %13 : vector<128x4xf32> to vector<128x4xbf16>
    %c1_16 = arith.constant 1 : index
    %c0_17 = arith.constant 0 : index
    %c0_18 = arith.constant 0 : index
    %15 = vector.load %arg4[%c1_16, %c0_17, %c0_18] : memref<4x4x256xbf16, #tpu.memory_space<vmem>>, vector<1x4x256xbf16>
    %16 = vector.shape_cast %15 : vector<1x4x256xbf16> to vector<4x256xbf16>
    %cst_19 = arith.constant dense<0.000000e+00> : vector<128x256xf32>
    %17 = tpu.matmul %14, %16, %cst_19 {dimension_numbers = #tpu.dot_dimension_numbers<[1], [0], [0], [1], [0, 0, 1, 1], [], []>} : vector<128x4xbf16>, vector<4x256xbf16>, vector<128x256xf32> -> vector<128x256xf32>
    %18 = arith.addf %12, %17 : vector<128x256xf32>
    %c2 = arith.constant 2 : index
    %c0_20 = arith.constant 0 : index
    %19 = vector.load %arg6[%c2, %c0_20] : memref<136x4xf32, #tpu.memory_space<vmem>>, vector<128x4xf32>
    %20 = arith.truncf %19 : vector<128x4xf32> to vector<128x4xbf16>
    %c2_21 = arith.constant 2 : index
    %c0_22 = arith.constant 0 : index
    %c0_23 = arith.constant 0 : index
    %21 = vector.load %arg4[%c2_21, %c0_22, %c0_23] : memref<4x4x256xbf16, #tpu.memory_space<vmem>>, vector<1x4x256xbf16>
    %22 = vector.shape_cast %21 : vector<1x4x256xbf16> to vector<4x256xbf16>
    %cst_24 = arith.constant dense<0.000000e+00> : vector<128x256xf32>
    %23 = tpu.matmul %20, %22, %cst_24 {dimension_numbers = #tpu.dot_dimension_numbers<[1], [0], [0], [1], [0, 0, 1, 1], [], []>} : vector<128x4xbf16>, vector<4x256xbf16>, vector<128x256xf32> -> vector<128x256xf32>
    %24 = arith.addf %18, %23 : vector<128x256xf32>
    %c3 = arith.constant 3 : index
    %c0_25 = arith.constant 0 : index
    %25 = vector.load %arg6[%c3, %c0_25] : memref<136x4xf32, #tpu.memory_space<vmem>>, vector<128x4xf32>
    %26 = arith.truncf %25 : vector<128x4xf32> to vector<128x4xbf16>
    %c3_26 = arith.constant 3 : index
    %c0_27 = arith.constant 0 : index
    %c0_28 = arith.constant 0 : index
    %27 = vector.load %arg4[%c3_26, %c0_27, %c0_28] : memref<4x4x256xbf16, #tpu.memory_space<vmem>>, vector<1x4x256xbf16>
    %28 = vector.shape_cast %27 : vector<1x4x256xbf16> to vector<4x256xbf16>
    %cst_29 = arith.constant dense<0.000000e+00> : vector<128x256xf32>
    %29 = tpu.matmul %26, %28, %cst_29 {dimension_numbers = #tpu.dot_dimension_numbers<[1], [0], [0], [1], [0, 0, 1, 1], [], []>} : vector<128x4xbf16>, vector<4x256xbf16>, vector<128x256xf32> -> vector<128x256xf32>
    %30 = arith.addf %24, %29 : vector<128x256xf32>
    %31 = vector.extract_strided_slice %30 {offsets = [0, 0], sizes = [128, 16], strides = [1, 1]} : vector<128x256xf32> to vector<128x16xf32>
    %32 = vector.extract_strided_slice %30 {offsets = [0, 128], sizes = [128, 16], strides = [1, 1]} : vector<128x256xf32> to vector<128x16xf32>
    %33 = arith.mulf %31, %31 : vector<128x16xf32>
    %34 = arith.mulf %32, %32 : vector<128x16xf32>
    %35 = arith.addf %33, %34 : vector<128x16xf32>
    %36 = math.sqrt %35 : vector<128x16xf32>
    %37 = tpu.transpose %36, [1, 0] : vector<128x16xf32> -> vector<16x128xf32>
    %c0_30 = arith.constant 0 : index
    %c0_31 = arith.constant 0 : index
    %c0_32 = arith.constant 0 : index
    %38 = vector.load %arg5[%c0_30, %c0_31, %c0_32] : memref<1x16x128xf32, #tpu.memory_space<vmem>>, vector<1x16x128xf32>
    %39 = vector.shape_cast %38 : vector<1x16x128xf32> to vector<16x128xf32>
    %40 = vector.shape_cast %37 : vector<16x128xf32> to vector<1x16x128xf32>
    tpu.vector_store %arg5[%c0_30, %c0_31, %c0_32], %40 {strides = array<i32>} : memref<1x16x128xf32, #tpu.memory_space<vmem>>, vector<1x16x128xf32>,
    return
  }
  func.func @transform_0(%arg0: i32, %arg1: i32) -> (i32, i32, i32) {
    %c0_i32 = arith.constant 0 : i32
    %c0_i32_0 = arith.constant 0 : i32
    return %arg0, %arg1, %c0_i32 : i32, i32, i32
  }
  func.func @transform_1(%arg0: i32, %arg1: i32) -> (i32, i32, i32, i32) {
    %c0_i32 = arith.constant 0 : i32
    %c0_i32_0 = arith.constant 0 : i32
    %c0_i32_1 = arith.constant 0 : i32
    return %arg0, %arg1, %c0_i32, %c0_i32_0 : i32, i32, i32, i32
  }
  func.func @transform_2(%arg0: i32, %arg1: i32) -> (i32, i32, i32) {
    %c0_i32 = arith.constant 0 : i32
    %c0_i32_0 = arith.constant 0 : i32
    %c0_i32_1 = arith.constant 0 : i32
    %c0_i32_2 = arith.constant 0 : i32
    return %c0_i32, %c0_i32_0, %c0_i32_1 : i32, i32, i32
  }
  func.func @transform_3(%arg0: i32, %arg1: i32) -> (i32, i32, i32) {
    %c0_i32 = arith.constant 0 : i32
    %c0_i32_0 = arith.constant 0 : i32
    return %arg0, %c0_i32, %arg1 : i32, i32, i32
  }
}

</mosaic_0001>

<bundles_post_ra>
// kernel: tpu_custom_call.1
= control target key start
LH: loop header
LB: loop body
LE: loop exit
PB: predicated region body
PF: predicated region fallthrough
CT: control target
= control target key end

     0   :  { %8 = vsyncpa [#allocation5], 0  ;;  %s1696_s0 = inlined_call_operand.vmem [shape: f32[2,384,4], index: 0, kind: input, shape index: {}]   ;;  %s1697_s1 = inlined_call_operand.vmem [shape: f32[2,2,8,4], index: 1, kind: input, shape index: {}]   ;;  %s1698_s2 = inlined_call_operand.vmem [shape: bf16[16,256], index: 2, kind: input, shape index: {}]   ;;  %s1699_s3 = inlined_call_operand.hbm [shape: f32[2,16,256], index: 3, kind: output, shape index: {}]  }
   0x1   :  { %10 = vsyncpa [#allocation5 + $0x1], 0  ;;  %s1334_s12 = smov 0   ;;  %s1336_s13 = smov 0  }
   0x2   :  { %s1338_s14 = smov 0   ;;  %s1340_s15 = smov 0  }
   0x3   :  { %s1342_s16 = smov 0   ;;  %s1344_s17 = smov 0  }
   0x4   :  { %s1346_s18 = smov 0   ;;  %s1348_s19 = smov 0  }
   0x5 LB: > { %s1071_s20 = sadd.s32 4294967295, %s1305_s19   ;;  %s1072_s21 = sadd.s32 4294967294, %s1305_s19   ;;  %s1305_s19 = sphi %s1348_s19, %s16_s19   ;;  %s1301_s18 = sphi %s1346_s18, %s1708_s18   ;;  %s1297_s17 = sphi %s1344_s17, %s1707_s17   ;;  %s1293_s16 = sphi %s1342_s16, %s1706_s16   ;;  %s1289_s15 = sphi %s1340_s15, %s1705_s15   ;;  %s1285_s14 = sphi %s1338_s14, %s1704_s14   ;;  %s1281_s13 = sphi %s1336_s13, %s1703_s13   ;;  %s1277_s12 = sphi %s1334_s12, %s1702_s12  }
   0x6   : > { %s25_s22 = sadd.s32 1, %s1297_s17  ;;  %s28_s23 = sadd.s32 1, %s1301_s18 }
   0x7   : > { %p26_p0 = scmp.ge.s32.totalorder %s25_s22, 2  ;;  %p124_p1 = scmp.ne.s32.totalorder %s1285_s14, %s1281_s13 }
   0x8   : > { %p125_p2 = scmp.eq.s32.totalorder %s1071_s20, 3  ;;  %p130_p5 = scmp.ne.s32.totalorder %s1281_s13, %s1277_s12 }
   0x9   : > { %s1710_s22 = smov (%p26_p0, %s25_s22), 0  ;;  %s1712_s23 = smov (!%p26_p0, %s28_s23), %s1301_s18 }
   0xa   : > { %s110_s24 = ssub.s32 %s1297_s17, %s1710_s22  ;;  %p1385_p3 = por %p125_p2, %p124_p1 }
   0xb   : > { %p30_p4 = scmp.ge.s32.totalorder %s1712_s23, 2  ;;  %p131_p6 = scmp.eq.s32.totalorder %s1072_s21, 3 }
   0xc   : > { %p1075_p7 = scmp.ge.s32.totalorder %s1305_s19, 1  ;;  %p176_p9 = scmp.lt.s32.totalorder %s1305_s19, 5 }
   0xd   : > { %s1714_s23 = smov (%p30_p4, %s1712_s23), 0  ;;  %p1394_p8 = por %p131_p6, %p130_p5 }
   0xe   : > { %s109_s27 = ssub.s32 %s1301_s18, %s1714_s23  ;;  %s114_s28 = sadd.s32 1, %s1285_s14 }
   0xf   : > { %s111_s29 = sor.u32 %s110_s24, %s109_s27  ;;  %p177_p10 = pnand %p1075_p7, %p176_p9 }
  0x10   : > { %p112_p11 = scmp.eq.s32.totalorder %s111_s29, 0  ;;  %s1077_s4 = sshll.u32 (!%p177_p10), %s1289_s15, 4  ;;  %vm247_vm0 = vcmask (!%p177_p10), 31744   ;;  %v1309_v23 = vmov (!%p177_p10), 0   ;;  %v1176_v34 = vld [vmem:[%s1698_s2 + $0x4] ss:$8 sps:$4 sm:$0xff] (!%p177_p10)  }
  0x11   : > { %180 = sbr.rel (%p177_p10) target bundleno = 586 (0x24a), region = 32  ;;  %p213_p12 = scmp.lt.s32.totalorder (!%p177_p10), %s1293_s16, 1  ;;  %682 = vmatprep.mubr.bf16.mxu0 (!%p177_p10), %v1309_v23  ;;  %722 = vmatprep.mubr.bf16.mxu1 (!%p177_p10), %v1309_v23  ;;  %v1178_v35 = vld [vmem:[%s1698_s2] ss:$8 sps:$4 sm:$0xff] (!%p177_p10)   ;;  %vm378_vm1 = vcmask (!%p177_p10), 64544   ;;  %vm475_vm2 = vcmask (!%p177_p10), 97344  }
  0x12   : > { %s1403_s30 = scalar_select %p112_p11, %s1285_s14, %s114_s28  }
  0x13   : > { %p215_p13 = scmp.lt.s32.totalorder (!%p177_p10), %s1077_s4, 47  ;;  %p224_p0 = scmp.lt.s32.totalorder (!%p177_p10), %s1289_s15, 1  ;;  %650 = vmatprep.subr.bf16.mxu0 (!%p177_p10), %v1176_v34  ;;  %1096 = vmatprep.subr.bf16.mxu1 (!%p177_p10), %v1176_v34  ;;  %vm572_vm3 = vcmask (!%p177_p10), 130144   ;;  %vm625_vm4 = vcmask (!%p177_p10), 130048  }
  0x14   : > { %651 = vmatpush1.bf16.msra.mxu0 (!%p177_p10), %v1178_v35  ;;  %1097 = vmatpush1.bf16.msra.mxu1 (!%p177_p10), %v1178_v35  ;;  %s1311_s9 = smov (!%p177_p10), [#allocation4]  }
  0x15   : > { %s1215_s10 = sshll.u32 (!%p177_p10), %s1311_s9, 4  ;;  %s1216_s10 = int_to_ptr.vmem [resolvable:$false] %s1215_s10 }
  0x18   : > { %s214_s5 = scalar_select %p213_p12, %s1293_s16, 1 }
  0x19   : > { %s1716_s4 = smov (!%p215_p13, %s1077_s4), 47 }
  0x1a   : > { %s1098_s6 = smul.u32 48, %s214_s5  ;;  %s1079_s20 = sshll.u32 %s214_s5, 1 }
  0x1b   : > { %s225_s21 = scalar_select %p224_p0, %s1289_s15, 1 }
  0x1c   : > { %s218_s7 = sadd.s32 %s1098_s6, %s1716_s4  ;;  %s1307_s5 = smov 8  }
  0x1d   : > { %s1078_s8 = sshll.u32 %s218_s7, 3  ;;  %s227_s24 = sadd.s32 %s1079_s20, %s225_s21 }
  0x1e   : > { %s1412_s11 = scalar_lea.vmem %s1696_s0, %s1078_s8  ;;  %s1080_s27 = sshll.u32 %s227_s24, 3 }
  0x1f   : > { %v231_v0 = vld [vmem:[%s1412_s11] sm:$0xff]  ;;  %v232_v1 = vld [vmem:[%s1412_s11 + $0x8] sm:$0xff]  ;;  %v233_v2 = vld [vmem:[%s1412_s11 + $0x10] sm:$0xff]  ;;  %s229_s4 = scalar_lea.vmem %s1697_s1, %s1080_s27  ;;  %s1308_s6 = smov 4  }
  0x20   : > { %248 = vst.msk [vmem:[#allocation2] sm:$0xff] %vm247_vm0, %v231_v0  ;;  %249 = vst.msk [vmem:[#allocation2 + $0x8] sm:$0xff] %vm247_vm0, %v232_v1  ;;  %v234_v3 = vld [vmem:[%s1412_s11 + $0x18] sm:$0xff]  ;;  %v235_v4 = vld [vmem:[%s1412_s11 + $0x20] sm:$0xff]  ;;  %s1310_s7 = smov 12   ;;  %s209_s20 = sand.u32 1, %s1281_s13  }
  0x21   : > { %250 = vst.msk [vmem:[#allocation2 + $0x10] sm:$0xff] %vm247_vm0, %v233_v2  ;;  %v236_v5 = vld [vmem:[%s1412_s11 + $0x28] sm:$0xff]  ;;  %251 = vst.msk [vmem:[#allocation2 + $0x18] sm:$0xff] %vm247_vm0, %v234_v3  ;;  %v237_v6 = vld [vmem:[%s1412_s11 + $0x30] sm:$0xff]  ;;  %s1092_s21 = sshll.u32 %s1293_s16, 2  ;;  %s1076_s24 = sshll.u32 %s209_s20, 4 }
  0x22   : > { %252 = vst.msk [vmem:[#allocation2 + $0x20] sm:$0xff] %vm247_vm0, %v235_v4  ;;  %253 = vst.msk [vmem:[#allocation2 + $0x28] sm:$0xff] %vm247_vm0, %v236_v5  ;;  %v240_v7 = vld [vmem:[%s1412_s11 + $0x48] sm:$0xff]  ;;  %v241_v8 = vld [vmem:[%s1412_s11 + $0x50] sm:$0xff]  ;;  %s969_s27 = sadd.s32 %s1289_s15, %s1092_s21  ;;  %s211_s28 = scalar_lea.vmem [#allocation4], %s1076_s24 }
  0x23   : > { %254 = vst.msk [vmem:[#allocation2 + $0x30] sm:$0xff] %vm247_vm0, %v237_v6  ;;  %257 = vst.msk [vmem:[#allocation2 + $0x48] sm:$0xff] %vm247_vm0, %v240_v7  ;;  %v239_v9 = vld [vmem:[%s1412_s11 + $0x40] sm:$0xff]  ;;  %v238_v10 = vld [vmem:[%s1412_s11 + $0x38] sm:$0xff]  ;;  %s972_s29 = sshll.u32 %s211_s28, 4  ;;  %s1643_s16 = scalar_lea.sflag [#allocation5], %s209_s20  ;;  %s1636_s29 = int_to_ptr.vmem [resolvable:$true] %s972_s29 }
  0x24   : > { %258 = vst.msk [vmem:[#allocation2 + $0x50] sm:$0xff] %vm247_vm0, %v241_v8  ;;  %v242_v11 = vld [vmem:[%s1412_s11 + $0x58] sm:$0xff]  ;;  %256 = vst.msk [vmem:[#allocation2 + $0x40] sm:$0xff] %vm247_vm0, %v239_v9  ;;  %v243_v12 = vld [vmem:[%s1412_s11 + $0x60] sm:$0xff]  ;;  %s1211_s15 = scalar_lea.vmem %s1636_s29, 256  ;;  %p1218_p5 = scmp.lt.s32.totalorder %s1636_s29, %s1216_s10 }
  0x25   : > { %255 = vst.msk [vmem:[#allocation2 + $0x38] sm:$0xff] %vm247_vm0, %v238_v10  ;;  %259 = vst.msk [vmem:[#allocation2 + $0x58] sm:$0xff] %vm247_vm0, %v242_v11  ;;  %v244_v13 = vld [vmem:[%s1412_s11 + $0x68] sm:$0xff]  ;;  %v245_v14 = vld [vmem:[%s1412_s11 + $0x70] sm:$0xff]  ;;  %p1212_p1 = scmp.ne.s32.totalorder %s1636_s29, %s1211_s15 }
  0x26   : > { %260 = vst.msk [vmem:[#allocation2 + $0x60] sm:$0xff] %vm247_vm0, %v243_v12  ;;  %261 = vst.msk [vmem:[#allocation2 + $0x68] sm:$0xff] %vm247_vm0, %v244_v13  ;;  %v246_v15 = vld [vmem:[%s1412_s11 + $0x78] sm:$0xff]  ;;  %v264_v16 = vld [vmem:[%s229_s4] sm:$0xff]  ;;  %s1093_s4 = sshll.u32 %s969_s27, 7  ;;  %s1217_s11 = scalar_lea.vmem %s1216_s10, 512 }
  0x27   : > { %262 = vst.msk [vmem:[#allocation2 + $0x70] sm:$0xff] %vm247_vm0, %v245_v14  ;;  %263 = vst.msk [vmem:[#allocation2 + $0x78] sm:$0xff] %vm247_vm0, %v246_v15  ;;  %v395_v17 = vld [vmem:[#allocation2 + $0x2] sm:$0xff]  ;;  %s1641_s8 = scalar_lea.hbm %s1699_s3, %s1093_s4  ;;  %p1213_p2 = pnand %p1212_p1, %p1385_p3 }
  0x28   : > { %265 = vst.msk [vmem:[#allocation2 + $0x80] sm:$0xff] %vm247_vm0, %v264_v16  ;;  %v298_v18 = vld [vmem:[#allocation2 + $0x1] sm:$0xff]  ;;  %427 = vrot.lane.b32.xlu1 %v395_v17, %s1307_s5  ;;  %v396_v19 = vld [vmem:[#allocation2 + $0xa] sm:$0xff]  ;;  %v397_v27 = vld [vmem:[#allocation2 + $0x12] sm:$0xff]  ;;  %p1219_p6 = scmp.lt.s32.totalorder %s1217_s11, %s1211_s15 }
  0x29   : > { %330 = vrot.lane.b32.xlu0 %v298_v18, %s1308_s6  ;;  %v299_v20 = vld [vmem:[#allocation2 + $0x9] sm:$0xff]  ;;  %v301_v24 = vld [vmem:[#allocation2 + $0x19] sm:$0xff]  ;;  %v300_v25 = vld [vmem:[#allocation2 + $0x11] sm:$0xff]  ;;  %p1214_p4 = pneg %p1213_p2 }
  0x2a   : > { %v493_v21 = vld [vmem:[#allocation2 + $0xb] sm:$0xff]  ;;  %v492_v22 = vld [vmem:[#allocation2 + $0x3] sm:$0xff]  ;;  %v398_v26 = vld [vmem:[#allocation2 + $0x1a] sm:$0xff]  ;;  %p1220_p7 = por %p1219_p6, %p1218_p5 }
  0x2b   : > { %v495_v28 = vld [vmem:[#allocation2 + $0x1b] sm:$0xff]  ;;  %v494_v29 = vld [vmem:[#allocation2 + $0x13] sm:$0xff]  ;;  %v267_v31 = vld [vmem:[#allocation2 + $0x8] sm:$0xff] }
  0x2c   : > { %429 = vrot.lane.b32.xlu1 %v396_v19, %s1307_s5  ;;  %v266_v30 = vld [vmem:[#allocation2] sm:$0xff]  ;;  %v269_v32 = vld [vmem:[#allocation2 + $0x18] sm:$0xff]  ;;  %283 = vst.msk [vmem:[#allocation3 + $0x8] sm:$0xff] %vm247_vm0, %v267_v31  ;;  %v268_v33 = vld [vmem:[#allocation2 + $0x10] sm:$0xff]  ;;  %p1221_p9 = pnand %p1220_p7, %p1214_p4 }
  0x2d   : > { %332 = vrot.lane.b32.xlu0 %v299_v20, %s1308_s6  ;;  %282 = vst.msk [vmem:[#allocation3] sm:$0xff] %vm247_vm0, %v266_v30  ;;  %285 = vst.msk [vmem:[#allocation3 + $0x18] sm:$0xff] %vm247_vm0, %v269_v32  ;;  %v271_v36 = vld [vmem:[#allocation2 + $0x28] sm:$0xff]  ;;  %v270_v37 = vld [vmem:[#allocation2 + $0x20] sm:$0xff] }
  0x2e   : > { %284 = vst.msk [vmem:[#allocation3 + $0x10] sm:$0xff] %vm247_vm0, %v268_v33  ;;  %v275_v38 = vld [vmem:[#allocation2 + $0x48] sm:$0xff]  ;;  %287 = vst.msk [vmem:[#allocation3 + $0x28] sm:$0xff] %vm247_vm0, %v271_v36  ;;  %v274_v39 = vld [vmem:[#allocation2 + $0x40] sm:$0xff] }
  0x2f   : > { %286 = vst.msk [vmem:[#allocation3 + $0x20] sm:$0xff] %vm247_vm0, %v270_v37  ;;  %291 = vst.msk [vmem:[#allocation3 + $0x48] sm:$0xff] %vm247_vm0, %v275_v38  ;;  %v303_v40 = vld [vmem:[#allocation2 + $0x29] sm:$0xff]  ;;  %v302_v41 = vld [vmem:[#allocation2 + $0x21] sm:$0xff] }
  0x30   : > { %526 = vrot.lane.b32.xlu1 %v493_v21, %s1310_s7  ;;  %290 = vst.msk [vmem:[#allocation3 + $0x40] sm:$0xff] %vm247_vm0, %v274_v39  ;;  %v307_v42 = vld [vmem:[#allocation2 + $0x49] sm:$0xff]  ;;  %v306_v43 = vld [vmem:[#allocation2 + $0x41] sm:$0xff]  ;;  %v273_v46 = vld [vmem:[#allocation2 + $0x38] sm:$0xff] }
  0x31   : > { %524 = vrot.lane.b32.xlu0 %v492_v22, %s1310_s7  ;;  %v400_v44 = vld [vmem:[#allocation2 + $0x2a] sm:$0xff]  ;;  %v399_v45 = vld [vmem:[#allocation2 + $0x22] sm:$0xff]  ;;  %289 = vst.msk [vmem:[#allocation3 + $0x38] sm:$0xff] %vm247_vm0, %v273_v46  ;;  %v277_v52 = vld [vmem:[#allocation2 + $0x58] sm:$0xff] }
  0x32   : > { %v404_v47 = vld [vmem:[#allocation2 + $0x4a] sm:$0xff]  ;;  %v403_v48 = vld [vmem:[#allocation2 + $0x42] sm:$0xff]  ;;  %293 = vst.msk [vmem:[#allocation3 + $0x58] sm:$0xff] %vm247_vm0, %v277_v52  ;;  %v305_v56 = vld [vmem:[#allocation2 + $0x39] sm:$0xff] }
  0x33   : > { %v272_v49 = vld [vmem:[#allocation2 + $0x30] sm:$0xff]  ;;  %v496_v51 = vld [vmem:[#allocation2 + $0x23] sm:$0xff]  ;;  %v309_v58 = vld [vmem:[#allocation2 + $0x59] sm:$0xff] }
  0x34   : > { %336 = vrot.lane.b32.xlu1 %v301_v24, %s1308_s6  ;;  %288 = vst.msk [vmem:[#allocation3 + $0x30] sm:$0xff] %vm247_vm0, %v272_v49  ;;  %v497_v50 = vld [vmem:[#allocation2 + $0x2b] sm:$0xff]  ;;  %v500_v55 = vld [vmem:[#allocation2 + $0x43] sm:$0xff]  ;;  %v402_v60 = vld [vmem:[#allocation2 + $0x3a] sm:$0xff] }
  0x35   : > { %334 = vrot.lane.b32.xlu0 %v300_v25, %s1308_s6  ;;  %v276_v53 = vld [vmem:[#allocation2 + $0x50] sm:$0xff]  ;;  %v279_v62 = vld [vmem:[#allocation2 + $0x68] sm:$0xff]  ;;  %v406_v63 = vld [vmem:[#allocation2 + $0x5a] sm:$0xff] }
  0x36   : > { %292 = vst.msk [vmem:[#allocation3 + $0x50] sm:$0xff] %vm247_vm0, %v276_v53  ;;  %v501_v54 = vld [vmem:[#allocation2 + $0x4b] sm:$0xff]  ;;  %295 = vst.msk [vmem:[#allocation3 + $0x68] sm:$0xff] %vm247_vm0, %v279_v62  ;;  %v278_v1 = vld [vmem:[#allocation2 + $0x60] sm:$0xff] }
  0x37   : > { %v304_v57 = vld [vmem:[#allocation2 + $0x31] sm:$0xff]  ;;  %294 = vst.msk [vmem:[#allocation3 + $0x60] sm:$0xff] %vm247_vm0, %v278_v1  ;;  %v499_v2 = vld [vmem:[#allocation2 + $0x3b] sm:$0xff]  ;;  %v311_v7 = vld [vmem:[#allocation2 + $0x69] sm:$0xff] }
  0x38   : > { %433 = vrot.lane.b32.xlu1 %v398_v26, %s1307_s5  ;;  %v308_v59 = vld [vmem:[#allocation2 + $0x51] sm:$0xff]  ;;  %v503_v4 = vld [vmem:[#allocation2 + $0x5b] sm:$0xff]  ;;  %v504_v13 = vld [vmem:[#allocation2 + $0x63] sm:$0xff] }
  0x39   : > { %431 = vrot.lane.b32.xlu0 %v397_v27, %s1307_s5  ;;  %v401_v61 = vld [vmem:[#allocation2 + $0x32] sm:$0xff]  ;;  %v310_v8 = vld [vmem:[#allocation2 + $0x61] sm:$0xff]  ;;  %v408_v10 = vld [vmem:[#allocation2 + $0x6a] sm:$0xff] }
  0x3a   : > { %v405_v0 = vld [vmem:[#allocation2 + $0x52] sm:$0xff]  ;;  %v407_v11 = vld [vmem:[#allocation2 + $0x62] sm:$0xff]  ;;  %v410_v16 = vld [vmem:[#allocation2 + $0x7a] sm:$0xff] }
  0x3b   : > { %v498_v3 = vld [vmem:[#allocation2 + $0x33] sm:$0xff]  ;;  %v505_v12 = vld [vmem:[#allocation2 + $0x6b] sm:$0xff]  ;;  %v507_v18 = vld [vmem:[#allocation2 + $0x7b] sm:$0xff] }
  0x3c   : > { %530 = vrot.lane.b32.xlu1 %v495_v28, %s1310_s7  ;;  %v502_v5 = vld [vmem:[#allocation2 + $0x53] sm:$0xff] }
  0x3d   : > { %528 = vrot.lane.b32.xlu0 %v494_v29, %s1310_s7  ;;  %v281_v6 = vld [vmem:[#allocation2 + $0x78] sm:$0xff]  ;;  %v280_v9 = vld [vmem:[#allocation2 + $0x70] sm:$0xff] }
  0x3e   : > { %297 = vst.msk [vmem:[#allocation3 + $0x78] sm:$0xff] %vm247_vm0, %v281_v6  ;;  %296 = vst.msk [vmem:[#allocation3 + $0x70] sm:$0xff] %vm247_vm0, %v280_v9  ;;  %v313_v14 = vld [vmem:[#allocation2 + $0x79] sm:$0xff]  ;;  %v312_v15 = vld [vmem:[#allocation2 + $0x71] sm:$0xff] }
  0x3f   : > { %v409_v17 = vld [vmem:[#allocation2 + $0x72] sm:$0xff] }
  0x40   : > { %340 = vrot.lane.b32.xlu1 %v303_v40, %s1308_s6  ;;  %v506_v19 = vld [vmem:[#allocation2 + $0x73] sm:$0xff] }
  0x41   : > { %338 = vrot.lane.b32.xlu0 %v302_v41, %s1308_s6 }
  0x44   : > { %348 = vrot.lane.b32.xlu1 %v307_v42, %s1308_s6 }
  0x45   : > { %346 = vrot.lane.b32.xlu0 %v306_v43, %s1308_s6 }
  0x48   : > { %437 = vrot.lane.b32.xlu1 %v400_v44, %s1307_s5 }
  0x49   : > { %435 = vrot.lane.b32.xlu0 %v399_v45, %s1307_s5 }
  0x4c   : > { %445 = vrot.lane.b32.xlu1 %v404_v47, %s1307_s5 }
  0x4d   : > { %443 = vrot.lane.b32.xlu0 %v403_v48, %s1307_s5 }
  0x50   : > { %534 = vrot.lane.b32.xlu1 %v497_v50, %s1310_s7 }
  0x51   : > { %532 = vrot.lane.b32.xlu0 %v496_v51, %s1310_s7 }
  0x54   : > { %542 = vrot.lane.b32.xlu1 %v501_v54, %s1310_s7 }
  0x55   : > { %540 = vrot.lane.b32.xlu0 %v500_v55, %s1310_s7 }
  0x58   : > { %344 = vrot.lane.b32.xlu1 %v305_v56, %s1308_s6 }
  0x59   : > { %342 = vrot.lane.b32.xlu0 %v304_v57, %s1308_s6 }
  0x5c   : > { %352 = vrot.lane.b32.xlu1 %v309_v58, %s1308_s6 }
  0x5d   : > { %350 = vrot.lane.b32.xlu0 %v308_v59, %s1308_s6 }
  0x60   : > { %441 = vrot.lane.b32.xlu1 %v402_v60, %s1307_s5 }
  0x61   : > { %439 = vrot.lane.b32.xlu0 %v401_v61, %s1307_s5 }
  0x64   : > { %449 = vrot.lane.b32.xlu1 %v406_v63, %s1307_s5 }
  0x65   : > { %447 = vrot.lane.b32.xlu0 %v405_v0, %s1307_s5 }
  0x68   : > { %538 = vrot.lane.b32.xlu1 %v499_v2, %s1310_s7 }
  0x69   : > { %536 = vrot.lane.b32.xlu0 %v498_v3, %s1310_s7 }
  0x6c   : > { %546 = vrot.lane.b32.xlu1 %v503_v4, %s1310_s7 }
  0x6d   : > { %544 = vrot.lane.b32.xlu0 %v502_v5, %s1310_s7 }
  0x70   : > { %356 = vrot.lane.b32.xlu1 %v311_v7, %s1308_s6 }
  0x71   : > { %354 = vrot.lane.b32.xlu0 %v310_v8, %s1308_s6 }
  0x74   : > { %453 = vrot.lane.b32.xlu1 %v408_v10, %s1307_s5 }
  0x75   : > { %451 = vrot.lane.b32.xlu0 %v407_v11, %s1307_s5 }
  0x78   : > { %550 = vrot.lane.b32.xlu1 %v505_v12, %s1310_s7 }
  0x79   : > { %548 = vrot.lane.b32.xlu0 %v504_v13, %s1310_s7 }
  0x7c   : > { %360 = vrot.lane.b32.xlu1 %v313_v14, %s1308_s6 }
  0x7d   : > { %358 = vrot.lane.b32.xlu0 %v312_v15, %s1308_s6 }
  0x80   : > { %457 = vrot.lane.b32.xlu1 %v410_v16, %s1307_s5 }
  0x81   : > { %455 = vrot.lane.b32.xlu0 %v409_v17, %s1307_s5 }
  0x84   : > { %554 = vrot.lane.b32.xlu1 %v507_v18, %s1310_s7 }
  0x85   : > { %552 = vrot.lane.b32.xlu0 %v506_v19, %s1310_s7 }
  0x9a   : > { %v428_v20 = vpop.permute.xlu1 %427 }
  0x9b   : > { %v331_v21 = vpop.permute.xlu0 %330 }
  0x9c   : > { %379 = vst.msk [vmem:[#allocation3] sm:$0xff] %vm378_vm1, %v331_v21 }
  0x9d   : > { %476 = vst.msk [vmem:[#allocation3] sm:$0xff] %vm475_vm2, %v428_v20 }
  0x9e   : > { %v430_v22 = vpop.permute.xlu1 %429 }
  0x9f   : > { %v333_v24 = vpop.permute.xlu0 %332 }
  0xa0   : > { %380 = vst.msk [vmem:[#allocation3 + $0x8] sm:$0xff] %vm378_vm1, %v333_v24 }
  0xa1   : > { %477 = vst.msk [vmem:[#allocation3 + $0x8] sm:$0xff] %vm475_vm2, %v430_v22 }
  0xa2   : > { %v527_v25 = vpop.permute.xlu1 %526 }
  0xa3   : > { %v525_v26 = vpop.permute.xlu0 %524  ;;  %574 = vst.msk [vmem:[#allocation3 + $0x8] sm:$0xff] %vm572_vm3, %v527_v25 }
  0xa4   : > { %573 = vst.msk [vmem:[#allocation3] sm:$0xff] %vm572_vm3, %v525_v26 }
  0xa6   : > { %v337_v27 = vpop.permute.xlu1 %336 }
  0xa7   : > { %v335_v28 = vpop.permute.xlu0 %334  ;;  %382 = vst.msk [vmem:[#allocation3 + $0x18] sm:$0xff] %vm378_vm1, %v337_v27 }
  0xa8   : > { %381 = vst.msk [vmem:[#allocation3 + $0x10] sm:$0xff] %vm378_vm1, %v335_v28 }
  0xaa   : > { %v434_v29 = vpop.permute.xlu1 %433  ;;  %v590_v32 = vld [vmem:[#allocation3 + $0x8] sm:$0xff] }
  0xab   : > { %v432_v30 = vpop.permute.xlu0 %431  ;;  %v589_v31 = vld [vmem:[#allocation3] sm:$0xff]  ;;  %479 = vst.msk [vmem:[#allocation3 + $0x18] sm:$0xff] %vm475_vm2, %v434_v29 }
  0xac   : > { %478 = vst.msk [vmem:[#allocation3 + $0x10] sm:$0xff] %vm475_vm2, %v432_v30  ;;  %v605_v33 = vpack.c.bf16 %v590_v32, %v589_v31 }
  0xae   : > { %1083 = vmatmul.mubr.msk.bf16.vlgmr.msra.gmra.mrb[0].mxu0 %vm625_vm4, %v605_v33  ;;  %v531_v34 = vpop.permute.xlu1 %530 }
  0xaf   : > { %v529_v35 = vpop.permute.xlu0 %528  ;;  %692 = vmatprep.mubr.bf16.mxu0 %v1309_v23  ;;  %576 = vst.msk [vmem:[#allocation3 + $0x18] sm:$0xff] %vm572_vm3, %v531_v34 }
  0xb0   : > { %575 = vst.msk [vmem:[#allocation3 + $0x10] sm:$0xff] %vm572_vm3, %v529_v35 }
  0xb2   : > { %v341_v36 = vpop.permute.xlu1 %340 }
  0xb3   : > { %v339_v37 = vpop.permute.xlu0 %338  ;;  %384 = vst.msk [vmem:[#allocation3 + $0x28] sm:$0xff] %vm378_vm1, %v341_v36 }
  0xb4   : > { %383 = vst.msk [vmem:[#allocation3 + $0x20] sm:$0xff] %vm378_vm1, %v339_v37 }
  0xb6   : > { %v349_v38 = vpop.permute.xlu1 %348  ;;  %v592_v41 = vld [vmem:[#allocation3 + $0x18] sm:$0xff] }
  0xb7   : > { %v347_v39 = vpop.permute.xlu0 %346  ;;  %v591_v40 = vld [vmem:[#allocation3 + $0x10] sm:$0xff]  ;;  %388 = vst.msk [vmem:[#allocation3 + $0x48] sm:$0xff] %vm378_vm1, %v349_v38 }
  0xb8   : > { %387 = vst.msk [vmem:[#allocation3 + $0x40] sm:$0xff] %vm378_vm1, %v347_v39  ;;  %v606_v42 = vpack.c.bf16 %v592_v41, %v591_v40 }
  0xba   : > { %1084 = vmatmul.mubr.msk.bf16.gmra.mrb[4].mxu0 %vm625_vm4, %v606_v42  ;;  %v438_v43 = vpop.permute.xlu1 %437 }
  0xbb   : > { %v436_v44 = vpop.permute.xlu0 %435  ;;  %702 = vmatprep.mubr.bf16.mxu0 %v1309_v23  ;;  %481 = vst.msk [vmem:[#allocation3 + $0x28] sm:$0xff] %vm475_vm2, %v438_v43 }
  0xbc   : > { %480 = vst.msk [vmem:[#allocation3 + $0x20] sm:$0xff] %vm475_vm2, %v436_v44 }
  0xbe   : > { %v446_v45 = vpop.permute.xlu1 %445 }
  0xbf   : > { %v444_v46 = vpop.permute.xlu0 %443  ;;  %485 = vst.msk [vmem:[#allocation3 + $0x48] sm:$0xff] %vm475_vm2, %v446_v45 }
  0xc0   : > { %484 = vst.msk [vmem:[#allocation3 + $0x40] sm:$0xff] %vm475_vm2, %v444_v46 }
  0xc2   : > { %v535_v47 = vpop.permute.xlu1 %534 }
  0xc3   : > { %v533_v48 = vpop.permute.xlu0 %532  ;;  %578 = vst.msk [vmem:[#allocation3 + $0x28] sm:$0xff] %vm572_vm3, %v535_v47 }
  0xc4   : > { %577 = vst.msk [vmem:[#allocation3 + $0x20] sm:$0xff] %vm572_vm3, %v533_v48 }
  0xc6   : > { %v543_v49 = vpop.permute.xlu1 %542 }
  0xc7   : > { %v541_v50 = vpop.permute.xlu0 %540  ;;  %582 = vst.msk [vmem:[#allocation3 + $0x48] sm:$0xff] %vm572_vm3, %v543_v49 }
  0xc8   : > { %581 = vst.msk [vmem:[#allocation3 + $0x40] sm:$0xff] %vm572_vm3, %v541_v50 }
  0xca   : > { %v345_v51 = vpop.permute.xlu1 %344  ;;  %v594_v54 = vld [vmem:[#allocation3 + $0x28] sm:$0xff] }
  0xcb   : > { %v343_v52 = vpop.permute.xlu0 %342  ;;  %v593_v53 = vld [vmem:[#allocation3 + $0x20] sm:$0xff]  ;;  %386 = vst.msk [vmem:[#allocation3 + $0x38] sm:$0xff] %vm378_vm1, %v345_v51 }
  0xcc   : > { %385 = vst.msk [vmem:[#allocation3 + $0x30] sm:$0xff] %vm378_vm1, %v343_v52  ;;  %v607_v55 = vpack.c.bf16 %v594_v54, %v593_v53 }
  0xce   : > { %1085 = vmatmul.mubr.msk.bf16.gmra.mrb[8].mxu0 %vm625_vm4, %v607_v55  ;;  %v353_v56 = vpop.permute.xlu1 %352  ;;  %v598_v59 = vld [vmem:[#allocation3 + $0x48] sm:$0xff] }
  0xcf   : > { %v351_v57 = vpop.permute.xlu0 %350  ;;  %v597_v58 = vld [vmem:[#allocation3 + $0x40] sm:$0xff]  ;;  %712 = vmatprep.mubr.bf16.mxu0 %v1309_v23  ;;  %390 = vst.msk [vmem:[#allocation3 + $0x58] sm:$0xff] %vm378_vm1, %v353_v56 }
  0xd0   : > { %389 = vst.msk [vmem:[#allocation3 + $0x50] sm:$0xff] %vm378_vm1, %v351_v57  ;;  %v609_v60 = vpack.c.bf16 %v598_v59, %v597_v58 }
  0xd2   : > { %1087 = vmatmul.mubr.msk.bf16.vlgmr.msra.gmra.mrb[0].mxu1 %vm625_vm4, %v609_v60  ;;  %v442_v61 = vpop.permute.xlu1 %441 }
  0xd3   : > { %v440_v62 = vpop.permute.xlu0 %439  ;;  %732 = vmatprep.mubr.bf16.mxu1 %v1309_v23  ;;  %483 = vst.msk [vmem:[#allocation3 + $0x38] sm:$0xff] %vm475_vm2, %v442_v61 }
  0xd4   : > { %482 = vst.msk [vmem:[#allocation3 + $0x30] sm:$0xff] %vm475_vm2, %v440_v62 }
  0xd6   : > { %v450_v63 = vpop.permute.xlu1 %449 }
  0xd7   : > { %v448_v0 = vpop.permute.xlu0 %447  ;;  %487 = vst.msk [vmem:[#allocation3 + $0x58] sm:$0xff] %vm475_vm2, %v450_v63 }
  0xd8   : > { %486 = vst.msk [vmem:[#allocation3 + $0x50] sm:$0xff] %vm475_vm2, %v448_v0 }
  0xda   : > { %v539_v1 = vpop.permute.xlu1 %538 }
  0xdb   : > { %v537_v2 = vpop.permute.xlu0 %536  ;;  %580 = vst.msk [vmem:[#allocation3 + $0x38] sm:$0xff] %vm572_vm3, %v539_v1 }
  0xdc   : > { %579 = vst.msk [vmem:[#allocation3 + $0x30] sm:$0xff] %vm572_vm3, %v537_v2 }
  0xde   : > { %v547_v3 = vpop.permute.xlu1 %546 }
  0xdf   : > { %v545_v4 = vpop.permute.xlu0 %544  ;;  %584 = vst.msk [vmem:[#allocation3 + $0x58] sm:$0xff] %vm572_vm3, %v547_v3 }
  0xe0   : > { %583 = vst.msk [vmem:[#allocation3 + $0x50] sm:$0xff] %vm572_vm3, %v545_v4 }
  0xe2   : > { %v357_v5 = vpop.permute.xlu1 %356  ;;  %v596_v8 = vld [vmem:[#allocation3 + $0x38] sm:$0xff] }
  0xe3   : > { %v355_v6 = vpop.permute.xlu0 %354  ;;  %v595_v7 = vld [vmem:[#allocation3 + $0x30] sm:$0xff]  ;;  %392 = vst.msk [vmem:[#allocation3 + $0x68] sm:$0xff] %vm378_vm1, %v357_v5 }
  0xe4   : > { %391 = vst.msk [vmem:[#allocation3 + $0x60] sm:$0xff] %vm378_vm1, %v355_v6  ;;  %v608_v9 = vpack.c.bf16 %v596_v8, %v595_v7 }
  0xe6   : > { %1086 = vmatmul.mubr.msk.bf16.gmra.mrb[12].mxu0 %vm625_vm4, %v608_v9  ;;  %v454_v10 = vpop.permute.xlu1 %453  ;;  %v600_v13 = vld [vmem:[#allocation3 + $0x58] sm:$0xff] }
  0xe7   : > { %v452_v11 = vpop.permute.xlu0 %451  ;;  %v599_v12 = vld [vmem:[#allocation3 + $0x50] sm:$0xff]  ;;  %489 = vst.msk [vmem:[#allocation3 + $0x68] sm:$0xff] %vm475_vm2, %v454_v10 }
  0xe8   : > { %488 = vst.msk [vmem:[#allocation3 + $0x60] sm:$0xff] %vm475_vm2, %v452_v11  ;;  %v610_v14 = vpack.c.bf16 %v600_v13, %v599_v12 }
  0xea   : > { %1088 = vmatmul.mubr.msk.bf16.gmra.mrb[4].mxu1 %vm625_vm4, %v610_v14  ;;  %v551_v15 = vpop.permute.xlu1 %550 }
  0xeb   : > { %v549_v16 = vpop.permute.xlu0 %548  ;;  %742 = vmatprep.mubr.bf16.mxu1 %v1309_v23  ;;  %586 = vst.msk [vmem:[#allocation3 + $0x68] sm:$0xff] %vm572_vm3, %v551_v15 }
  0xec   : > { %585 = vst.msk [vmem:[#allocation3 + $0x60] sm:$0xff] %vm572_vm3, %v549_v16 }
  0xee   : > { %v361_v17 = vpop.permute.xlu1 %360 }
  0xef   : > { %v359_v18 = vpop.permute.xlu0 %358  ;;  %394 = vst.msk [vmem:[#allocation3 + $0x78] sm:$0xff] %vm378_vm1, %v361_v17 }
  0xf0   : > { %393 = vst.msk [vmem:[#allocation3 + $0x70] sm:$0xff] %vm378_vm1, %v359_v18 }
  0xf2   : > { %v458_v19 = vpop.permute.xlu1 %457  ;;  %v602_v22 = vld [vmem:[#allocation3 + $0x68] sm:$0xff] }
  0xf3   : > { %v456_v20 = vpop.permute.xlu0 %455  ;;  %v601_v21 = vld [vmem:[#allocation3 + $0x60] sm:$0xff]  ;;  %491 = vst.msk [vmem:[#allocation3 + $0x78] sm:$0xff] %vm475_vm2, %v458_v19 }
  0xf4   : > { %490 = vst.msk [vmem:[#allocation3 + $0x70] sm:$0xff] %vm475_vm2, %v456_v20  ;;  %v611_v24 = vpack.c.bf16 %v602_v22, %v601_v21 }
  0xf6   : > { %1089 = vmatmul.mubr.msk.bf16.gmra.mrb[8].mxu1 %vm625_vm4, %v611_v24  ;;  %v555_v25 = vpop.permute.xlu1 %554 }
  0xf7   : > { %v553_v26 = vpop.permute.xlu0 %552  ;;  %752 = vmatprep.mubr.bf16.mxu1 %v1309_v23  ;;  %588 = vst.msk [vmem:[#allocation3 + $0x78] sm:$0xff] %vm572_vm3, %v555_v25 }
  0xf8   : > { %587 = vst.msk [vmem:[#allocation3 + $0x70] sm:$0xff] %vm572_vm3, %v553_v26 }
  0xfe   : > { %v604_v28 = vld [vmem:[#allocation3 + $0x78] sm:$0xff] }
  0xff   : > { %v603_v27 = vld [vmem:[#allocation3 + $0x70] sm:$0xff] }
 0x100   : > { %v612_v29 = vpack.c.bf16 %v604_v28, %v603_v27 }
 0x102   : > { %1090 = vmatmul.mubr.msk.bf16.gmra.mrb[12].mxu1 %vm625_vm4, %v612_v29 }
 0x181   : > { %v684_v30 = vpop.f32.mrb[0].mxu0 }
 0x182   : > { %v763_v31 = vmul.f32 %v684_v30, %v684_v30  ;;  %v686_v32 = vpop.f32.mrb[1].mxu0 }
 0x183   : > { %v779_v33 = vmul.f32 %v686_v32, %v686_v32  ;;  %v688_v34 = vpop.f32.mrb[2].mxu0 }
 0x184   : > { %v764_v35 = vmul.f32 %v688_v34, %v688_v34  ;;  %v690_v36 = vpop.f32.mrb[3].mxu0 }
 0x185   : > { %v795_v37 = vadd.f32 %v779_v33, %v763_v31  ;;  %v780_v38 = vmul.f32 %v690_v36, %v690_v36 }
 0x187   : > { %v796_v39 = vadd.f32 %v780_v38, %v764_v35  ;;  %1179 = vrsqrt.f32 %v795_v37  ;;  %vm813_vm5 = vcmp.eq.f32.partialorder %v795_v37, inf  ;;  %v816_v52 = vand.u32 2147483648, %v795_v37 }
 0x188   : > { %vm815_vm6 = vcmp.eq.f32.partialorder %v795_v37, 0.0 }
 0x189   : > { %1181 = vrsqrt.f32 %v796_v39  ;;  %vm820_vm7 = vcmp.eq.f32.partialorder %v796_v39, inf  ;;  %v823_v57 = vand.u32 2147483648, %v796_v39  ;;  %vm822_vm8 = vcmp.eq.f32.partialorder %v796_v39, 0.0 }
 0x18d   : > { %v694_v23 = vpop.f32.mrb[4].mxu0 }
 0x18e   : > { %v765_v40 = vmul.f32 %v694_v23, %v694_v23  ;;  %v696_v41 = vpop.f32.mrb[5].mxu0 }
 0x18f   : > { %v781_v42 = vmul.f32 %v696_v41, %v696_v41  ;;  %v698_v43 = vpop.f32.mrb[6].mxu0 }
 0x190   : > { %v766_v44 = vmul.f32 %v698_v43, %v698_v43  ;;  %v700_v45 = vpop.f32.mrb[7].mxu0 }
 0x191   : > { %v1180_v46 = vpop.eup %1179  ;;  %v797_v47 = vadd.f32 %v781_v42, %v765_v40  ;;  %v782_v48 = vmul.f32 %v700_v45, %v700_v45 }
 0x192   : > { %v812_v49 = vmul.f32 %v1180_v46, %v795_v37 }
 0x193   : > { %v1182_v50 = vpop.eup %1181  ;;  %v798_v51 = vadd.f32 %v782_v48, %v766_v44  ;;  %1183 = vrsqrt.f32 %v797_v47  ;;  %vm827_vm9 = vcmp.eq.f32.partialorder %v797_v47, inf  ;;  %v830_v62 = vand.u32 2147483648, %v797_v47 }
 0x194   : > { %v814_v53 = vsel %vm813_vm5, %v795_v37, %v812_v49  ;;  %v819_v54 = vmul.f32 %v1182_v50, %v796_v39  ;;  %vm829_vm10 = vcmp.eq.f32.partialorder %v797_v47, 0.0 }
 0x195   : > { %v817_v55 = vsel %vm815_vm6, %v816_v52, %v814_v53  ;;  %1185 = vrsqrt.f32 %v798_v51  ;;  %vm834_vm11 = vcmp.eq.f32.partialorder %v798_v51, inf  ;;  %v837_v8 = vand.u32 2147483648, %v798_v51 }
 0x196   : > { %923 = vxpose.xlu0.b32.start [1/16] (narrow) %v817_v55, 16  ;;  %v821_v56 = vsel %vm820_vm7, %v796_v39, %v819_v54  ;;  %vm836_vm12 = vcmp.eq.f32.partialorder %v798_v51, 0.0 }
 0x197   : > { %v824_v58 = vsel %vm822_vm8, %v823_v57, %v821_v56 }
 0x19a   : > { %924 = vxpose.xlu0.b32.cont [2/16] (narrow) %v824_v58, 16 }
 0x19d   : > { %v1184_v59 = vpop.eup %1183 }
 0x19e   : > { %v826_v60 = vmul.f32 %v1184_v59, %v797_v47 }
 0x19f   : > { %v1186_v61 = vpop.eup %1185 }
 0x1a0   : > { %v828_v63 = vsel %vm827_vm9, %v797_v47, %v826_v60  ;;  %v833_v0 = vmul.f32 %v1186_v61, %v798_v51 }
 0x1a1   : > { %v704_v1 = vpop.f32.mrb[8].mxu0  ;;  %v831_v2 = vsel %vm829_vm10, %v830_v62, %v828_v63 }
 0x1a2   : > { %v767_v3 = vmul.f32 %v704_v1, %v704_v1  ;;  %925 = vxpose.xlu0.b32.cont [3/16] (narrow) %v831_v2, 16  ;;  %v706_v4 = vpop.f32.mrb[9].mxu0  ;;  %v835_v5 = vsel %vm834_vm11, %v798_v51, %v833_v0 }
 0x1a3   : > { %v783_v6 = vmul.f32 %v706_v4, %v706_v4  ;;  %v708_v7 = vpop.f32.mrb[10].mxu0  ;;  %v838_v14 = vsel %vm836_vm12, %v837_v8, %v835_v5 }
 0x1a4   : > { %v768_v9 = vmul.f32 %v708_v7, %v708_v7  ;;  %v710_v10 = vpop.f32.mrb[11].mxu0 }
 0x1a5   : > { %v799_v11 = vadd.f32 %v783_v6, %v767_v3  ;;  %v784_v12 = vmul.f32 %v710_v10, %v710_v10  ;;  %v724_v13 = vpop.f32.mrb[0].mxu1 }
 0x1a6   : > { %v771_v15 = vmul.f32 %v724_v13, %v724_v13  ;;  %v726_v16 = vpop.f32.mrb[1].mxu1  ;;  %926 = vxpose.xlu0.b32.cont [4/16] (narrow) %v838_v14, 16 }
 0x1a7   : > { %v800_v17 = vadd.f32 %v784_v12, %v768_v9  ;;  %v787_v18 = vmul.f32 %v726_v16, %v726_v16  ;;  %v728_v19 = vpop.f32.mrb[2].mxu1  ;;  %1187 = vrsqrt.f32 %v799_v11  ;;  %vm841_vm13 = vcmp.eq.f32.partialorder %v799_v11, inf }
 0x1a8   : > { %v772_v20 = vmul.f32 %v728_v19, %v728_v19  ;;  %v730_v21 = vpop.f32.mrb[3].mxu1  ;;  %v844_v29 = vand.u32 2147483648, %v799_v11  ;;  %vm843_vm14 = vcmp.eq.f32.partialorder %v799_v11, 0.0 }
 0x1a9   : > { %v1585_v22 = vadd.f32 %v787_v18, %v771_v15  ;;  %v788_v24 = vmul.f32 %v730_v21, %v730_v21  ;;  %1189 = vrsqrt.f32 %v800_v17  ;;  %vm848_vm15 = vcmp.eq.f32.partialorder %v800_v17, inf }
 0x1aa   : > { %v851_v34 = vand.u32 2147483648, %v800_v17  ;;  %vm850_vm0 = vcmp.eq.f32.partialorder %v800_v17, 0.0 }
 0x1ab   : > { %v1587_v25 = vadd.f32 %v788_v24, %v772_v20  ;;  %vm869_vm5 = vcmp.eq.f32.partialorder %v1585_v22, inf  ;;  %vm871_vm6 = vcmp.eq.f32.partialorder %v1585_v22, 0.0 }
 0x1ad   : > { %vm876_vm7 = vcmp.eq.f32.partialorder %v1587_v25, inf  ;;  %vm878_vm8 = vcmp.eq.f32.partialorder %v1587_v25, 0.0 }
 0x1b1   : > { %v1188_v26 = vpop.eup %1187 }
 0x1b2   : > { %v840_v27 = vmul.f32 %v1188_v26, %v799_v11 }
 0x1b3   : > { %v1190_v28 = vpop.eup %1189 }
 0x1b4   : > { %v842_v30 = vsel %vm841_vm13, %v799_v11, %v840_v27  ;;  %v847_v31 = vmul.f32 %v1190_v28, %v800_v17 }
 0x1b5   : > { %v845_v32 = vsel %vm843_vm14, %v844_v29, %v842_v30  ;;  %v879_v30 = vand.u32 2147483648, %v1587_v25 }
 0x1b6   : > { %927 = vxpose.xlu0.b32.cont [5/16] (narrow) %v845_v32, 16  ;;  %v849_v33 = vsel %vm848_vm15, %v800_v17, %v847_v31  ;;  %v872_v17 = vand.u32 2147483648, %v1585_v22 }
 0x1b7   : > { %v852_v36 = vsel %vm850_vm0, %v851_v34, %v849_v33 }
 0x1b9   : > { %v714_v35 = vpop.f32.mrb[12].mxu0 }
 0x1ba   : > { %v769_v37 = vmul.f32 %v714_v35, %v714_v35  ;;  %928 = vxpose.xlu0.b32.cont [6/16] (narrow) %v852_v36, 16  ;;  %v716_v38 = vpop.f32.mrb[13].mxu0 }
 0x1bb   : > { %v785_v39 = vmul.f32 %v716_v38, %v716_v38  ;;  %v718_v23 = vpop.f32.mrb[14].mxu0 }
 0x1bc   : > { %v770_v40 = vmul.f32 %v718_v23, %v718_v23  ;;  %v720_v41 = vpop.f32.mrb[15].mxu0 }
 0x1bd   : > { %v801_v42 = vadd.f32 %v785_v39, %v769_v37  ;;  %v786_v43 = vmul.f32 %v720_v41, %v720_v41  ;;  %v734_v44 = vpop.f32.mrb[4].mxu1 }
 0x1be   : > { %v773_v45 = vmul.f32 %v734_v44, %v734_v44  ;;  %v736_v46 = vpop.f32.mrb[5].mxu1 }
 0x1bf   : > { %v802_v47 = vadd.f32 %v786_v43, %v770_v40  ;;  %v789_v48 = vmul.f32 %v736_v46, %v736_v46  ;;  %v738_v49 = vpop.f32.mrb[6].mxu1  ;;  %1191 = vrsqrt.f32 %v801_v42  ;;  %vm855_vm1 = vcmp.eq.f32.partialorder %v801_v42, inf }
 0x1c0   : > { %v774_v50 = vmul.f32 %v738_v49, %v738_v49  ;;  %v740_v51 = vpop.f32.mrb[7].mxu1  ;;  %1193 = vrsqrt.f32 %v1585_v22  ;;  %vm857_vm2 = vcmp.eq.f32.partialorder %v801_v42, 0.0  ;;  %v858_v0 = vand.u32 2147483648, %v801_v42 }
 0x1c1   : > { %v1590_v52 = vadd.f32 %v789_v48, %v773_v45  ;;  %v790_v53 = vmul.f32 %v740_v51, %v740_v51  ;;  %1195 = vrsqrt.f32 %v802_v47  ;;  %vm862_vm3 = vcmp.eq.f32.partialorder %v802_v47, inf }
 0x1c2   : > { %1197 = vrsqrt.f32 %v1587_v25  ;;  %v865_v12 = vand.u32 2147483648, %v802_v47  ;;  %vm864_vm4 = vcmp.eq.f32.partialorder %v802_v47, 0.0 }
 0x1c3   : > { %v1592_v54 = vadd.f32 %v790_v53, %v774_v50  ;;  %1199 = vrsqrt.f32 %v1590_v52  ;;  %vm883_vm9 = vcmp.eq.f32.partialorder %v1590_v52, inf  ;;  %v886_v39 = vand.u32 2147483648, %v1590_v52 }
 0x1c4   : > { %vm885_vm10 = vcmp.eq.f32.partialorder %v1590_v52, 0.0 }
 0x1c5   : > { %1201 = vrsqrt.f32 %v1592_v54  ;;  %vm890_vm11 = vcmp.eq.f32.partialorder %v1592_v54, inf  ;;  %vm892_vm12 = vcmp.eq.f32.partialorder %v1592_v54, 0.0 }
 0x1c9   : > { %v1192_v55 = vpop.eup %1191  ;;  %v744_v56 = vpop.f32.mrb[8].mxu1 }
 0x1ca   : > { %v1194_v57 = vpop.eup %1193  ;;  %v775_v58 = vmul.f32 %v744_v56, %v744_v56  ;;  %v746_v59 = vpop.f32.mrb[9].mxu1  ;;  %v854_v60 = vmul.f32 %v1192_v55, %v801_v42 }
 0x1cb   : > { %v1196_v61 = vpop.eup %1195  ;;  %v791_v62 = vmul.f32 %v746_v59, %v746_v59  ;;  %v748_v63 = vpop.f32.mrb[10].mxu1  ;;  %v868_v9 = vmul.f32 %v1194_v57, %v1585_v22 }
 0x1cc   : > { %v776_v1 = vmul.f32 %v748_v63, %v748_v63  ;;  %v750_v2 = vpop.f32.mrb[11].mxu1  ;;  %v856_v3 = vsel %vm855_vm1, %v801_v42, %v854_v60  ;;  %v861_v4 = vmul.f32 %v1196_v61, %v802_v47  ;;  %v1198_v10 = vpop.eup %1197  ;;  %v893_v42 = vand.u32 2147483648, %v1592_v54 }
 0x1cd   : > { %v1596_v5 = vadd.f32 %v791_v62, %v775_v58  ;;  %v792_v6 = vmul.f32 %v750_v2, %v750_v2  ;;  %v859_v7 = vsel %vm857_vm2, %v858_v0, %v856_v3  ;;  %v870_v14 = vsel %vm869_vm5, %v1585_v22, %v868_v9  ;;  %v1200_v16 = vpop.eup %1199 }
 0x1ce   : > { %929 = vxpose.xlu0.b32.cont [7/16] (narrow) %v859_v7, 16  ;;  %v863_v8 = vsel %vm862_vm3, %v802_v47, %v861_v4  ;;  %v875_v15 = vmul.f32 %v1198_v10, %v1587_v25  ;;  %v873_v19 = vsel %vm871_vm6, %v872_v17, %v870_v14  ;;  %v882_v26 = vmul.f32 %v1200_v16, %v1590_v52 }
 0x1cf   : > { %v1600_v11 = vadd.f32 %v792_v6, %v776_v1  ;;  %v866_v13 = vsel %vm864_vm4, %v865_v12, %v863_v8  ;;  %1203 = vrsqrt.f32 %v1596_v5  ;;  %v1202_v27 = vpop.eup %1201  ;;  %vm897_vm13 = vcmp.eq.f32.partialorder %v1596_v5, inf }
 0x1d0   : > { %v877_v24 = vsel %vm876_vm7, %v1587_v25, %v875_v15  ;;  %v884_v35 = vsel %vm883_vm9, %v1590_v52, %v882_v26  ;;  %v889_v36 = vmul.f32 %v1202_v27, %v1592_v54  ;;  %v900_v46 = vand.u32 2147483648, %v1596_v5 }
 0x1d1   : > { %1205 = vrsqrt.f32 %v1600_v11  ;;  %v880_v34 = vsel %vm878_vm8, %v879_v30, %v877_v24  ;;  %v887_v23 = vsel %vm885_vm10, %v886_v39, %v884_v35  ;;  %vm899_vm14 = vcmp.eq.f32.partialorder %v1596_v5, 0.0 }
 0x1d2   : > { %930 = vxpose.xlu0.b32.cont [8/16] (narrow) %v866_v13, 16  ;;  %v891_v25 = vsel %vm890_vm11, %v1592_v54, %v889_v36  ;;  %vm904_vm15 = vcmp.eq.f32.partialorder %v1600_v11, inf  ;;  %v907_v52 = vand.u32 2147483648, %v1600_v11  ;;  %vm906_vm0 = vcmp.eq.f32.partialorder %v1600_v11, 0.0 }
 0x1d3   : > { %v894_v43 = vsel %vm892_vm12, %v893_v42, %v891_v25 }
 0x1d5   : > { %v754_v18 = vpop.f32.mrb[12].mxu1 }
 0x1d6   : > { %v777_v20 = vmul.f32 %v754_v18, %v754_v18  ;;  %v756_v21 = vpop.f32.mrb[13].mxu1  ;;  %931 = vxpose.xlu0.b32.cont [9/16] (narrow) %v873_v19, 16 }
 0x1d7   : > { %v793_v28 = vmul.f32 %v756_v21, %v756_v21  ;;  %v758_v29 = vpop.f32.mrb[14].mxu1 }
 0x1d8   : > { %v778_v31 = vmul.f32 %v758_v29, %v758_v29  ;;  %v760_v22 = vpop.f32.mrb[15].mxu1 }
 0x1d9   : > { %v809_v32 = vadd.f32 %v793_v28, %v777_v20  ;;  %v794_v33 = vmul.f32 %v760_v22, %v760_v22  ;;  %v1204_v37 = vpop.eup %1203 }
 0x1da   : > { %932 = vxpose.xlu0.b32.cont [10/16] (narrow) %v880_v34, 16  ;;  %v896_v40 = vmul.f32 %v1204_v37, %v1596_v5 }
 0x1db   : > { %v810_v38 = vadd.f32 %v794_v33, %v778_v31  ;;  %1207 = vrsqrt.f32 %v809_v32  ;;  %v1206_v41 = vpop.eup %1205  ;;  %vm911_vm1 = vcmp.eq.f32.partialorder %v809_v32, inf  ;;  %v914_v56 = vand.u32 2147483648, %v809_v32 }
 0x1dc   : > { %v898_v44 = vsel %vm897_vm13, %v1596_v5, %v896_v40  ;;  %v903_v45 = vmul.f32 %v1206_v41, %v1600_v11  ;;  %vm913_vm2 = vcmp.eq.f32.partialorder %v809_v32, 0.0 }
 0x1dd   : > { %1209 = vrsqrt.f32 %v810_v38  ;;  %v901_v48 = vsel %vm899_vm14, %v900_v46, %v898_v44  ;;  %vm918_vm3 = vcmp.eq.f32.partialorder %v810_v38, inf  ;;  %v921_v59 = vand.u32 2147483648, %v810_v38 }
 0x1de   : > { %933 = vxpose.xlu0.b32.cont [11/16] (narrow) %v887_v23, 16  ;;  %v905_v49 = vsel %vm904_vm15, %v1600_v11, %v903_v45  ;;  %vm920_vm4 = vcmp.eq.f32.partialorder %v810_v38, 0.0 }
 0x1df   : > { %v908_v53 = vsel %vm906_vm0, %v907_v52, %v905_v49 }
 0x1e2   : > { %934 = vxpose.xlu0.b32.cont [12/16] (narrow) %v894_v43, 16 }
 0x1e5   : > { %v1208_v47 = vpop.eup %1207 }
 0x1e6   : > { %935 = vxpose.xlu0.b32.cont [13/16] (narrow) %v901_v48, 16  ;;  %v910_v50 = vmul.f32 %v1208_v47, %v809_v32 }
 0x1e7   : > { %v1210_v51 = vpop.eup %1209 }
 0x1e8   : > { %v912_v54 = vsel %vm911_vm1, %v809_v32, %v910_v50  ;;  %v917_v55 = vmul.f32 %v1210_v51, %v810_v38 }
 0x1e9   : > { %v915_v57 = vsel %vm913_vm2, %v914_v56, %v912_v54 }
 0x1ea   : > { %936 = vxpose.xlu0.b32.cont [14/16] (narrow) %v908_v53, 16  ;;  %v919_v58 = vsel %vm918_vm3, %v810_v38, %v917_v55 }
 0x1eb   : > { %v922_v60 = vsel %vm920_vm4, %v921_v59, %v919_v58 }
 0x1ee   : > { %937 = vxpose.xlu0.b32.cont [15/16] (narrow) %v915_v57, 16 }
 0x1f2   : > { %938 = vxpose.xlu0.b32.end [16/16] (narrow) %v922_v60, 16 }
 0x236   : > { %v939_v61 = vpop.trf.xlu0 }
 0x237   : > { %955 = vst [vmem:[%s211_s28] sm:$0xff] %v939_v61 }
 0x23a   : > { %v940_v62 = vpop.trf.xlu0 }
 0x23b   : > { %956 = vst [vmem:[%s211_s28 + $0x8] sm:$0xff] %v940_v62 }
 0x23c   : > { %1224 = shalt.err (!%p1221_p9)
}
 0x23d   : > { %s1225_s20 = scalar_lea.hbm %s1641_s8, 256  ;;  %s1229_s27 = scalar_lea.hbm %s1699_s3, 1024 }
 0x23e   : > { %p1226_p10 = scmp.ne.s32.totalorder %s1641_s8, %s1225_s20  ;;  %p1230_p13 = scmp.lt.u32.totalorder %s1641_s8, %s1699_s3 }
 0x23f   : > { %p1231_p0 = scmp.lt.u32.totalorder %s1229_s27, %s1225_s20  ;;  %p1233_p2 = scmp.lt.u32.totalorder %s1225_s20, %s1641_s8 }
 0x240   : > { %p1227_p11 = pnand %p1226_p10, %p1385_p3 }
 0x241   : > { %p1232_p1 = por %p1231_p0, %p1230_p13 }
 0x242   : > { %p1228_p12 = pneg %p1227_p11 }
 0x243   : > { %p1234_p4 = por %p1233_p2, %p1232_p1 }
 0x245   : > { %p1235_p5 = pnand %p1234_p4, %p1228_p12 }
 0x247   : > { %1238 = shalt.err (!%p1235_p5)
}
 0x248   : > { %s1312_s6 = smov 128   ;;  %s1313_s7 = smov 256  }
 0x249   : > { %1099 = dma.vmem_to_hbm [thread:$0]  (%p1385_p3), %s1636_s29, 256, %s1641_s8, %s1643_s16, %s1312_s6, %s1313_s7, %s1307_s5  }
 0x24a PF: > { %p1105_p6 = scmp.ge.s32.totalorder %s1305_s19, 2  ;;  %s987_s15 = sand.u32 1, %s1277_s12  }
 0x24b   : > { %s988_s9 = scalar_lea.sflag [#allocation5], %s987_s15 }
 0x24c   : > { %p1102_p7 = pnand %p1105_p6, %p1394_p8 }
 0x24e   : > { %1272 = dma.done.wait (!%p1102_p7), %s988_s9, 256  }
 0x24f   : > { %1274 = vsyncadd (!%p1102_p7), %s988_s9, 4294967040  ;;  %s16_s19 = sadd.s32 1, %s1305_s19   ;;  %s1702_s12 = smov %s1281_s13 }
 0x250   : > { %p13_p9 = scmp.ge.s32.totalorder %s16_s19, 6   ;;  %s1703_s13 = smov %s1285_s14 }
 0x251   : > { %s1704_s14 = smov %s1403_s30  ;;  %s1705_s15 = smov %s1297_s17 }
 0x252   : > { %s1706_s16 = smov %s1301_s18  ;;  %s1707_s17 = smov %s1710_s22 }
 0x253   : > { %s1708_s18 = smov %s1714_s23  ;;  %15 = sbr.rel (!%p13_p9) target bundleno = 5 (0x5), region = 70 }
 0x25a   :  { %993 = vsyncpa [#allocation5], 1 }
 0x25b   :  { %995 = vsyncpa [#allocation5 + $0x1], 1 }

// kernel: tpu_custom_call.1
= control target key start
LH: loop header
LB: loop body
LE: loop exit
PB: predicated region body
PF: predicated region fallthrough
CT: control target
= control target key end

     0   :  { %8 = vsyncpa [#allocation5], 0  ;;  %s1696_s0 = inlined_call_operand.vmem [shape: f32[2,384,4], index: 0, kind: input, shape index: {}]   ;;  %s1697_s1 = inlined_call_operand.vmem [shape: f32[2,2,8,4], index: 1, kind: input, shape index: {}]   ;;  %s1698_s2 = inlined_call_operand.vmem [shape: bf16[16,256], index: 2, kind: input, shape index: {}]   ;;  %s1699_s3 = inlined_call_operand.hbm [shape: f32[2,16,256], index: 3, kind: output, shape index: {}]  }
   0x1   :  { %10 = vsyncpa [#allocation5 + $0x1], 0  ;;  %s1334_s12 = smov 0   ;;  %s1336_s13 = smov 0  }
   0x2   :  { %s1338_s14 = smov 0   ;;  %s1340_s15 = smov 0  }
   0x3   :  { %s1342_s16 = smov 0   ;;  %s1344_s17 = smov 0  }
   0x4   :  { %s1346_s18 = smov 0   ;;  %s1348_s19 = smov 0  }
   0x5 LB: > { %s1071_s20 = sadd.s32 4294967295, %s1305_s19   ;;  %s1072_s21 = sadd.s32 4294967294, %s1305_s19   ;;  %s1305_s19 = sphi %s1348_s19, %s16_s19   ;;  %s1301_s18 = sphi %s1346_s18, %s1708_s18   ;;  %s1297_s17 = sphi %s1344_s17, %s1707_s17   ;;  %s1293_s16 = sphi %s1342_s16, %s1706_s16   ;;  %s1289_s15 = sphi %s1340_s15, %s1705_s15   ;;  %s1285_s14 = sphi %s1338_s14, %s1704_s14   ;;  %s1281_s13 = sphi %s1336_s13, %s1703_s13   ;;  %s1277_s12 = sphi %s1334_s12, %s1702_s12  }
   0x6   : > { %s25_s22 = sadd.s32 1, %s1297_s17  ;;  %s28_s23 = sadd.s32 1, %s1301_s18 }
   0x7   : > { %p26_p0 = scmp.ge.s32.totalorder %s25_s22, 2  ;;  %p124_p1 = scmp.ne.s32.totalorder %s1285_s14, %s1281_s13 }
   0x8   : > { %p125_p2 = scmp.eq.s32.totalorder %s1071_s20, 3  ;;  %p130_p5 = scmp.ne.s32.totalorder %s1281_s13, %s1277_s12 }
   0x9   : > { %s1710_s22 = smov (%p26_p0, %s25_s22), 0  ;;  %s1712_s23 = smov (!%p26_p0, %s28_s23), %s1301_s18 }
   0xa   : > { %s110_s24 = ssub.s32 %s1297_s17, %s1710_s22  ;;  %p1385_p3 = por %p125_p2, %p124_p1 }
   0xb   : > { %p30_p4 = scmp.ge.s32.totalorder %s1712_s23, 2  ;;  %p131_p6 = scmp.eq.s32.totalorder %s1072_s21, 3 }
   0xc   : > { %p1075_p7 = scmp.ge.s32.totalorder %s1305_s19, 1  ;;  %p176_p9 = scmp.lt.s32.totalorder %s1305_s19, 5 }
   0xd   : > { %s1714_s23 = smov (%p30_p4, %s1712_s23), 0  ;;  %p1394_p8 = por %p131_p6, %p130_p5 }
   0xe   : > { %s109_s27 = ssub.s32 %s1301_s18, %s1714_s23  ;;  %s114_s28 = sadd.s32 1, %s1285_s14 }
   0xf   : > { %s111_s29 = sor.u32 %s110_s24, %s109_s27  ;;  %p177_p10 = pnand %p1075_p7, %p176_p9 }
  0x10   : > { %p112_p11 = scmp.eq.s32.totalorder %s111_s29, 0  ;;  %s1077_s4 = sshll.u32 (!%p177_p10), %s1289_s15, 4  ;;  %vm247_vm0 = vcmask (!%p177_p10), 31744   ;;  %v1309_v23 = vmov (!%p177_p10), 0   ;;  %v1176_v34 = vld [vmem:[%s1698_s2 + $0x4] ss:$8 sps:$4 sm:$0xff] (!%p177_p10)  }
  0x11   : > { %180 = sbr.rel (%p177_p10) target bundleno = 586 (0x24a), region = 32  ;;  %p213_p12 = scmp.lt.s32.totalorder (!%p177_p10), %s1293_s16, 1  ;;  %682 = vmatprep.mubr.bf16.mxu0 (!%p177_p10), %v1309_v23  ;;  %722 = vmatprep.mubr.bf16.mxu1 (!%p177_p10), %v1309_v23  ;;  %v1178_v35 = vld [vmem:[%s1698_s2] ss:$8 sps:$4 sm:$0xff] (!%p177_p10)   ;;  %vm378_vm1 = vcmask (!%p177_p10), 64544   ;;  %vm475_vm2 = vcmask (!%p177_p10), 97344  }
  0x12   : > { %s1403_s30 = scalar_select %p112_p11, %s1285_s14, %s114_s28  }
  0x13   : > { %p215_p13 = scmp.lt.s32.totalorder (!%p177_p10), %s1077_s4, 47  ;;  %p224_p0 = scmp.lt.s32.totalorder (!%p177_p10), %s1289_s15, 1  ;;  %650 = vmatprep.subr.bf16.mxu0 (!%p177_p10), %v1176_v34  ;;  %1096 = vmatprep.subr.bf16.mxu1 (!%p177_p10), %v1176_v34  ;;  %vm572_vm3 = vcmask (!%p177_p10), 130144   ;;  %vm625_vm4 = vcmask (!%p177_p10), 130048  }
  0x14   : > { %651 = vmatpush1.bf16.msra.mxu0 (!%p177_p10), %v1178_v35  ;;  %1097 = vmatpush1.bf16.msra.mxu1 (!%p177_p10), %v1178_v35  ;;  %s1311_s9 = smov (!%p177_p10), [#allocation4]  }
  0x15   : > { %s1215_s10 = sshll.u32 (!%p177_p10), %s1311_s9, 4  ;;  %s1216_s10 = int_to_ptr.vmem [resolvable:$false] %s1215_s10 }
  0x18   : > { %s214_s5 = scalar_select %p213_p12, %s1293_s16, 1 }
  0x19   : > { %s1716_s4 = smov (!%p215_p13, %s1077_s4), 47 }
  0x1a   : > { %s1098_s6 = smul.u32 48, %s214_s5  ;;  %s1079_s20 = sshll.u32 %s214_s5, 1 }
  0x1b   : > { %s225_s21 = scalar_select %p224_p0, %s1289_s15, 1 }
  0x1c   : > { %s218_s7 = sadd.s32 %s1098_s6, %s1716_s4  ;;  %s1307_s5 = smov 8  }
  0x1d   : > { %s1078_s8 = sshll.u32 %s218_s7, 3  ;;  %s227_s24 = sadd.s32 %s1079_s20, %s225_s21 }
  0x1e   : > { %s1412_s11 = scalar_lea.vmem %s1696_s0, %s1078_s8  ;;  %s1080_s27 = sshll.u32 %s227_s24, 3 }
  0x1f   : > { %v231_v0 = vld [vmem:[%s1412_s11] sm:$0xff]  ;;  %v232_v1 = vld [vmem:[%s1412_s11 + $0x8] sm:$0xff]  ;;  %v233_v2 = vld [vmem:[%s1412_s11 + $0x10] sm:$0xff]  ;;  %s229_s4 = scalar_lea.vmem %s1697_s1, %s1080_s27  ;;  %s1308_s6 = smov 4  }
  0x20   : > { %248 = vst.msk [vmem:[#allocation2] sm:$0xff] %vm247_vm0, %v231_v0  ;;  %249 = vst.msk [vmem:[#allocation2 + $0x8] sm:$0xff] %vm247_vm0, %v232_v1  ;;  %v234_v3 = vld [vmem:[%s1412_s11 + $0x18] sm:$0xff]  ;;  %v235_v4 = vld [vmem:[%s1412_s11 + $0x20] sm:$0xff]  ;;  %s1310_s7 = smov 12   ;;  %s209_s20 = sand.u32 1, %s1281_s13  }
  0x21   : > { %250 = vst.msk [vmem:[#allocation2 + $0x10] sm:$0xff] %vm247_vm0, %v233_v2  ;;  %v236_v5 = vld [vmem:[%s1412_s11 + $0x28] sm:$0xff]  ;;  %251 = vst.msk [vmem:[#allocation2 + $0x18] sm:$0xff] %vm247_vm0, %v234_v3  ;;  %v237_v6 = vld [vmem:[%s1412_s11 + $0x30] sm:$0xff]  ;;  %s1092_s21 = sshll.u32 %s1293_s16, 2  ;;  %s1076_s24 = sshll.u32 %s209_s20, 4 }
  0x22   : > { %252 = vst.msk [vmem:[#allocation2 + $0x20] sm:$0xff] %vm247_vm0, %v235_v4  ;;  %253 = vst.msk [vmem:[#allocation2 + $0x28] sm:$0xff] %vm247_vm0, %v236_v5  ;;  %v240_v7 = vld [vmem:[%s1412_s11 + $0x48] sm:$0xff]  ;;  %v241_v8 = vld [vmem:[%s1412_s11 + $0x50] sm:$0xff]  ;;  %s969_s27 = sadd.s32 %s1289_s15, %s1092_s21  ;;  %s211_s28 = scalar_lea.vmem [#allocation4], %s1076_s24 }
  0x23   : > { %254 = vst.msk [vmem:[#allocation2 + $0x30] sm:$0xff] %vm247_vm0, %v237_v6  ;;  %257 = vst.msk [vmem:[#allocation2 + $0x48] sm:$0xff] %vm247_vm0, %v240_v7  ;;  %v239_v9 = vld [vmem:[%s1412_s11 + $0x40] sm:$0xff]  ;;  %v238_v10 = vld [vmem:[%s1412_s11 + $0x38] sm:$0xff]  ;;  %s972_s29 = sshll.u32 %s211_s28, 4  ;;  %s1643_s16 = scalar_lea.sflag [#allocation5], %s209_s20  ;;  %s1636_s29 = int_to_ptr.vmem [resolvable:$true] %s972_s29 }
  0x24   : > { %258 = vst.msk [vmem:[#allocation2 + $0x50] sm:$0xff] %vm247_vm0, %v241_v8  ;;  %v242_v11 = vld [vmem:[%s1412_s11 + $0x58] sm:$0xff]  ;;  %256 = vst.msk [vmem:[#allocation2 + $0x40] sm:$0xff] %vm247_vm0, %v239_v9  ;;  %v243_v12 = vld [vmem:[%s1412_s11 + $0x60] sm:$0xff]  ;;  %s1211_s15 = scalar_lea.vmem %s1636_s29, 256  ;;  %p1218_p5 = scmp.lt.s32.totalorder %s1636_s29, %s1216_s10 }
  0x25   : > { %255 = vst.msk [vmem:[#allocation2 + $0x38] sm:$0xff] %vm247_vm0, %v238_v10  ;;  %259 = vst.msk [vmem:[#allocation2 + $0x58] sm:$0xff] %vm247_vm0, %v242_v11  ;;  %v244_v13 = vld [vmem:[%s1412_s11 + $0x68] sm:$0xff]  ;;  %v245_v14 = vld [vmem:[%s1412_s11 + $0x70] sm:$0xff]  ;;  %p1212_p1 = scmp.ne.s32.totalorder %s1636_s29, %s1211_s15 }
  0x26   : > { %260 = vst.msk [vmem:[#allocation2 + $0x60] sm:$0xff] %vm247_vm0, %v243_v12  ;;  %261 = vst.msk [vmem:[#allocation2 + $0x68] sm:$0xff] %vm247_vm0, %v244_v13  ;;  %v246_v15 = vld [vmem:[%s1412_s11 + $0x78] sm:$0xff]  ;;  %v264_v16 = vld [vmem:[%s229_s4] sm:$0xff]  ;;  %s1093_s4 = sshll.u32 %s969_s27, 7  ;;  %s1217_s11 = scalar_lea.vmem %s1216_s10, 512 }
  0x27   : > { %262 = vst.msk [vmem:[#allocation2 + $0x70] sm:$0xff] %vm247_vm0, %v245_v14  ;;  %263 = vst.msk [vmem:[#allocation2 + $0x78] sm:$0xff] %vm247_vm0, %v246_v15  ;;  %v395_v17 = vld [vmem:[#allocation2 + $0x2] sm:$0xff]  ;;  %s1641_s8 = scalar_lea.hbm %s1699_s3, %s1093_s4  ;;  %p1213_p2 = pnand %p1212_p1, %p1385_p3 }
  0x28   : > { %265 = vst.msk [vmem:[#allocation2 + $0x80] sm:$0xff] %vm247_vm0, %v264_v16  ;;  %v298_v18 = vld [vmem:[#allocation2 + $0x1] sm:$0xff]  ;;  %427 = vrot.lane.b32.xlu1 %v395_v17, %s1307_s5  ;;  %v396_v19 = vld [vmem:[#allocation2 + $0xa] sm:$0xff]  ;;  %v397_v27 = vld [vmem:[#allocation2 + $0x12] sm:$0xff]  ;;  %p1219_p6 = scmp.lt.s32.totalorder %s1217_s11, %s1211_s15 }
  0x29   : > { %330 = vrot.lane.b32.xlu0 %v298_v18, %s1308_s6  ;;  %v299_v20 = vld [vmem:[#allocation2 + $0x9] sm:$0xff]  ;;  %v301_v24 = vld [vmem:[#allocation2 + $0x19] sm:$0xff]  ;;  %v300_v25 = vld [vmem:[#allocation2 + $0x11] sm:$0xff]  ;;  %p1214_p4 = pneg %p1213_p2 }
  0x2a   : > { %v493_v21 = vld [vmem:[#allocation2 + $0xb] sm:$0xff]  ;;  %v492_v22 = vld [vmem:[#allocation2 + $0x3] sm:$0xff]  ;;  %v398_v26 = vld [vmem:[#allocation2 + $0x1a] sm:$0xff]  ;;  %p1220_p7 = por %p1219_p6, %p1218_p5 }
  0x2b   : > { %v495_v28 = vld [vmem:[#allocation2 + $0x1b] sm:$0xff]  ;;  %v494_v29 = vld [vmem:[#allocation2 + $0x13] sm:$0xff]  ;;  %v267_v31 = vld [vmem:[#allocation2 + $0x8] sm:$0xff] }
  0x2c   : > { %429 = vrot.lane.b32.xlu1 %v396_v19, %s1307_s5  ;;  %v266_v30 = vld [vmem:[#allocation2] sm:$0xff]  ;;  %v269_v32 = vld [vmem:[#allocation2 + $0x18] sm:$0xff]  ;;  %283 = vst.msk [vmem:[#allocation3 + $0x8] sm:$0xff] %vm247_vm0, %v267_v31  ;;  %v268_v33 = vld [vmem:[#allocation2 + $0x10] sm:$0xff]  ;;  %p1221_p9 = pnand %p1220_p7, %p1214_p4 }
  0x2d   : > { %332 = vrot.lane.b32.xlu0 %v299_v20, %s1308_s6  ;;  %282 = vst.msk [vmem:[#allocation3] sm:$0xff] %vm247_vm0, %v266_v30  ;;  %285 = vst.msk [vmem:[#allocation3 + $0x18] sm:$0xff] %vm247_vm0, %v269_v32  ;;  %v271_v36 = vld [vmem:[#allocation2 + $0x28] sm:$0xff]  ;;  %v270_v37 = vld [vmem:[#allocation2 + $0x20] sm:$0xff] }
  0x2e   : > { %284 = vst.msk [vmem:[#allocation3 + $0x10] sm:$0xff] %vm247_vm0, %v268_v33  ;;  %v275_v38 = vld [vmem:[#allocation2 + $0x48] sm:$0xff]  ;;  %287 = vst.msk [vmem:[#allocation3 + $0x28] sm:$0xff] %vm247_vm0, %v271_v36  ;;  %v274_v39 = vld [vmem:[#allocation2 + $0x40] sm:$0xff] }
  0x2f   : > { %286 = vst.msk [vmem:[#allocation3 + $0x20] sm:$0xff] %vm247_vm0, %v270_v37  ;;  %291 = vst.msk [vmem:[#allocation3 + $0x48] sm:$0xff] %vm247_vm0, %v275_v38  ;;  %v303_v40 = vld [vmem:[#allocation2 + $0x29] sm:$0xff]  ;;  %v302_v41 = vld [vmem:[#allocation2 + $0x21] sm:$0xff] }
  0x30   : > { %526 = vrot.lane.b32.xlu1 %v493_v21, %s1310_s7  ;;  %290 = vst.msk [vmem:[#allocation3 + $0x40] sm:$0xff] %vm247_vm0, %v274_v39  ;;  %v307_v42 = vld [vmem:[#allocation2 + $0x49] sm:$0xff]  ;;  %v306_v43 = vld [vmem:[#allocation2 + $0x41] sm:$0xff]  ;;  %v273_v46 = vld [vmem:[#allocation2 + $0x38] sm:$0xff] }
  0x31   : > { %524 = vrot.lane.b32.xlu0 %v492_v22, %s1310_s7  ;;  %v400_v44 = vld [vmem:[#allocation2 + $0x2a] sm:$0xff]  ;;  %v399_v45 = vld [vmem:[#allocation2 + $0x22] sm:$0xff]  ;;  %289 = vst.msk [vmem:[#allocation3 + $0x38] sm:$0xff] %vm247_vm0, %v273_v46  ;;  %v277_v52 = vld [vmem:[#allocation2 + $0x58] sm:$0xff] }
  0x32   : > { %v404_v47 = vld [vmem:[#allocation2 + $0x4a] sm:$0xff]  ;;  %v403_v48 = vld [vmem:[#allocation2 + $0x42] sm:$0xff]  ;;  %293 = vst.msk [vmem:[#allocation3 + $0x58] sm:$0xff] %vm247_vm0, %v277_v52  ;;  %v305_v56 = vld [vmem:[#allocation2 + $0x39] sm:$0xff] }
  0x33   : > { %v272_v49 = vld [vmem:[#allocation2 + $0x30] sm:$0xff]  ;;  %v496_v51 = vld [vmem:[#allocation2 + $0x23] sm:$0xff]  ;;  %v309_v58 = vld [vmem:[#allocation2 + $0x59] sm:$0xff] }
  0x34   : > { %336 = vrot.lane.b32.xlu1 %v301_v24, %s1308_s6  ;;  %288 = vst.msk [vmem:[#allocation3 + $0x30] sm:$0xff] %vm247_vm0, %v272_v49  ;;  %v497_v50 = vld [vmem:[#allocation2 + $0x2b] sm:$0xff]  ;;  %v500_v55 = vld [vmem:[#allocation2 + $0x43] sm:$0xff]  ;;  %v402_v60 = vld [vmem:[#allocation2 + $0x3a] sm:$0xff] }
  0x35   : > { %334 = vrot.lane.b32.xlu0 %v300_v25, %s1308_s6  ;;  %v276_v53 = vld [vmem:[#allocation2 + $0x50] sm:$0xff]  ;;  %v279_v62 = vld [vmem:[#allocation2 + $0x68] sm:$0xff]  ;;  %v406_v63 = vld [vmem:[#allocation2 + $0x5a] sm:$0xff] }
  0x36   : > { %292 = vst.msk [vmem:[#allocation3 + $0x50] sm:$0xff] %vm247_vm0, %v276_v53  ;;  %v501_v54 = vld [vmem:[#allocation2 + $0x4b] sm:$0xff]  ;;  %295 = vst.msk [vmem:[#allocation3 + $0x68] sm:$0xff] %vm247_vm0, %v279_v62  ;;  %v278_v1 = vld [vmem:[#allocation2 + $0x60] sm:$0xff] }
  0x37   : > { %v304_v57 = vld [vmem:[#allocation2 + $0x31] sm:$0xff]  ;;  %294 = vst.msk [vmem:[#allocation3 + $0x60] sm:$0xff] %vm247_vm0, %v278_v1  ;;  %v499_v2 = vld [vmem:[#allocation2 + $0x3b] sm:$0xff]  ;;  %v311_v7 = vld [vmem:[#allocation2 + $0x69] sm:$0xff] }
  0x38   : > { %433 = vrot.lane.b32.xlu1 %v398_v26, %s1307_s5  ;;  %v308_v59 = vld [vmem:[#allocation2 + $0x51] sm:$0xff]  ;;  %v503_v4 = vld [vmem:[#allocation2 + $0x5b] sm:$0xff]  ;;  %v504_v13 = vld [vmem:[#allocation2 + $0x63] sm:$0xff] }
  0x39   : > { %431 = vrot.lane.b32.xlu0 %v397_v27, %s1307_s5  ;;  %v401_v61 = vld [vmem:[#allocation2 + $0x32] sm:$0xff]  ;;  %v310_v8 = vld [vmem:[#allocation2 + $0x61] sm:$0xff]  ;;  %v408_v10 = vld [vmem:[#allocation2 + $0x6a] sm:$0xff] }
  0x3a   : > { %v405_v0 = vld [vmem:[#allocation2 + $0x52] sm:$0xff]  ;;  %v407_v11 = vld [vmem:[#allocation2 + $0x62] sm:$0xff]  ;;  %v410_v16 = vld [vmem:[#allocation2 + $0x7a] sm:$0xff] }
  0x3b   : > { %v498_v3 = vld [vmem:[#allocation2 + $0x33] sm:$0xff]  ;;  %v505_v12 = vld [vmem:[#allocation2 + $0x6b] sm:$0xff]  ;;  %v507_v18 = vld [vmem:[#allocation2 + $0x7b] sm:$0xff] }
  0x3c   : > { %530 = vrot.lane.b32.xlu1 %v495_v28, %s1310_s7  ;;  %v502_v5 = vld [vmem:[#allocation2 + $0x53] sm:$0xff] }
  0x3d   : > { %528 = vrot.lane.b32.xlu0 %v494_v29, %s1310_s7  ;;  %v281_v6 = vld [vmem:[#allocation2 + $0x78] sm:$0xff]  ;;  %v280_v9 = vld [vmem:[#allocation2 + $0x70] sm:$0xff] }
  0x3e   : > { %297 = vst.msk [vmem:[#allocation3 + $0x78] sm:$0xff] %vm247_vm0, %v281_v6  ;;  %296 = vst.msk [vmem:[#allocation3 + $0x70] sm:$0xff] %vm247_vm0, %v280_v9  ;;  %v313_v14 = vld [vmem:[#allocation2 + $0x79] sm:$0xff]  ;;  %v312_v15 = vld [vmem:[#allocation2 + $0x71] sm:$0xff] }
  0x3f   : > { %v409_v17 = vld [vmem:[#allocation2 + $0x72] sm:$0xff] }
  0x40   : > { %340 = vrot.lane.b32.xlu1 %v303_v40, %s1308_s6  ;;  %v506_v19 = vld [vmem:[#allocation2 + $0x73] sm:$0xff] }
  0x41   : > { %338 = vrot.lane.b32.xlu0 %v302_v41, %s1308_s6 }
  0x44   : > { %348 = vrot.lane.b32.xlu1 %v307_v42, %s1308_s6 }
  0x45   : > { %346 = vrot.lane.b32.xlu0 %v306_v43, %s1308_s6 }
  0x48   : > { %437 = vrot.lane.b32.xlu1 %v400_v44, %s1307_s5 }
  0x49   : > { %435 = vrot.lane.b32.xlu0 %v399_v45, %s1307_s5 }
  0x4c   : > { %445 = vrot.lane.b32.xlu1 %v404_v47, %s1307_s5 }
  0x4d   : > { %443 = vrot.lane.b32.xlu0 %v403_v48, %s1307_s5 }
  0x50   : > { %534 = vrot.lane.b32.xlu1 %v497_v50, %s1310_s7 }
  0x51   : > { %532 = vrot.lane.b32.xlu0 %v496_v51, %s1310_s7 }
  0x54   : > { %542 = vrot.lane.b32.xlu1 %v501_v54, %s1310_s7 }
  0x55   : > { %540 = vrot.lane.b32.xlu0 %v500_v55, %s1310_s7 }
  0x58   : > { %344 = vrot.lane.b32.xlu1 %v305_v56, %s1308_s6 }
  0x59   : > { %342 = vrot.lane.b32.xlu0 %v304_v57, %s1308_s6 }
  0x5c   : > { %352 = vrot.lane.b32.xlu1 %v309_v58, %s1308_s6 }
  0x5d   : > { %350 = vrot.lane.b32.xlu0 %v308_v59, %s1308_s6 }
  0x60   : > { %441 = vrot.lane.b32.xlu1 %v402_v60, %s1307_s5 }
  0x61   : > { %439 = vrot.lane.b32.xlu0 %v401_v61, %s1307_s5 }
  0x64   : > { %449 = vrot.lane.b32.xlu1 %v406_v63, %s1307_s5 }
  0x65   : > { %447 = vrot.lane.b32.xlu0 %v405_v0, %s1307_s5 }
  0x68   : > { %538 = vrot.lane.b32.xlu1 %v499_v2, %s1310_s7 }
  0x69   : > { %536 = vrot.lane.b32.xlu0 %v498_v3, %s1310_s7 }
  0x6c   : > { %546 = vrot.lane.b32.xlu1 %v503_v4, %s1310_s7 }
  0x6d   : > { %544 = vrot.lane.b32.xlu0 %v502_v5, %s1310_s7 }
  0x70   : > { %356 = vrot.lane.b32.xlu1 %v311_v7, %s1308_s6 }
  0x71   : > { %354 = vrot.lane.b32.xlu0 %v310_v8, %s1308_s6 }
  0x74   : > { %453 = vrot.lane.b32.xlu1 %v408_v10, %s1307_s5 }
  0x75   : > { %451 = vrot.lane.b32.xlu0 %v407_v11, %s1307_s5 }
  0x78   : > { %550 = vrot.lane.b32.xlu1 %v505_v12, %s1310_s7 }
  0x79   : > { %548 = vrot.lane.b32.xlu0 %v504_v13, %s1310_s7 }
  0x7c   : > { %360 = vrot.lane.b32.xlu1 %v313_v14, %s1308_s6 }
  0x7d   : > { %358 = vrot.lane.b32.xlu0 %v312_v15, %s1308_s6 }
  0x80   : > { %457 = vrot.lane.b32.xlu1 %v410_v16, %s1307_s5 }
  0x81   : > { %455 = vrot.lane.b32.xlu0 %v409_v17, %s1307_s5 }
  0x84   : > { %554 = vrot.lane.b32.xlu1 %v507_v18, %s1310_s7 }
  0x85   : > { %552 = vrot.lane.b32.xlu0 %v506_v19, %s1310_s7 }
  0x9a   : > { %v428_v20 = vpop.permute.xlu1 %427 }
  0x9b   : > { %v331_v21 = vpop.permute.xlu0 %330 }
  0x9c   : > { %379 = vst.msk [vmem:[#allocation3] sm:$0xff] %vm378_vm1, %v331_v21 }
  0x9d   : > { %476 = vst.msk [vmem:[#allocation3] sm:$0xff] %vm475_vm2, %v428_v20 }
  0x9e   : > { %v430_v22 = vpop.permute.xlu1 %429 }
  0x9f   : > { %v333_v24 = vpop.permute.xlu0 %332 }
  0xa0   : > { %380 = vst.msk [vmem:[#allocation3 + $0x8] sm:$0xff] %vm378_vm1, %v333_v24 }
  0xa1   : > { %477 = vst.msk [vmem:[#allocation3 + $0x8] sm:$0xff] %vm475_vm2, %v430_v22 }
  0xa2   : > { %v527_v25 = vpop.permute.xlu1 %526 }
  0xa3   : > { %v525_v26 = vpop.permute.xlu0 %524  ;;  %574 = vst.msk [vmem:[#allocation3 + $0x8] sm:$0xff] %vm572_vm3, %v527_v25 }
  0xa4   : > { %573 = vst.msk [vmem:[#allocation3] sm:$0xff] %vm572_vm3, %v525_v26 }
  0xa6   : > { %v337_v27 = vpop.permute.xlu1 %336 }
  0xa7   : > { %v335_v28 = vpop.permute.xlu0 %334  ;;  %382 = vst.msk [vmem:[#allocation3 + $0x18] sm:$0xff] %vm378_vm1, %v337_v27 }
  0xa8   : > { %381 = vst.msk [vmem:[#allocation3 + $0x10] sm:$0xff] %vm378_vm1, %v335_v28 }
  0xaa   : > { %v434_v29 = vpop.permute.xlu1 %433  ;;  %v590_v32 = vld [vmem:[#allocation3 + $0x8] sm:$0xff] }
  0xab   : > { %v432_v30 = vpop.permute.xlu0 %431  ;;  %v589_v31 = vld [vmem:[#allocation3] sm:$0xff]  ;;  %479 = vst.msk [vmem:[#allocation3 + $0x18] sm:$0xff] %vm475_vm2, %v434_v29 }
  0xac   : > { %478 = vst.msk [vmem:[#allocation3 + $0x10] sm:$0xff] %vm475_vm2, %v432_v30  ;;  %v605_v33 = vpack.c.bf16 %v590_v32, %v589_v31 }
  0xae   : > { %1083 = vmatmul.mubr.msk.bf16.vlgmr.msra.gmra.mrb[0].mxu0 %vm625_vm4, %v605_v33  ;;  %v531_v34 = vpop.permute.xlu1 %530 }
  0xaf   : > { %v529_v35 = vpop.permute.xlu0 %528  ;;  %692 = vmatprep.mubr.bf16.mxu0 %v1309_v23  ;;  %576 = vst.msk [vmem:[#allocation3 + $0x18] sm:$0xff] %vm572_vm3, %v531_v34 }
  0xb0   : > { %575 = vst.msk [vmem:[#allocation3 + $0x10] sm:$0xff] %vm572_vm3, %v529_v35 }
  0xb2   : > { %v341_v36 = vpop.permute.xlu1 %340 }
  0xb3   : > { %v339_v37 = vpop.permute.xlu0 %338  ;;  %384 = vst.msk [vmem:[#allocation3 + $0x28] sm:$0xff] %vm378_vm1, %v341_v36 }
  0xb4   : > { %383 = vst.msk [vmem:[#allocation3 + $0x20] sm:$0xff] %vm378_vm1, %v339_v37 }
  0xb6   : > { %v349_v38 = vpop.permute.xlu1 %348  ;;  %v592_v41 = vld [vmem:[#allocation3 + $0x18] sm:$0xff] }
  0xb7   : > { %v347_v39 = vpop.permute.xlu0 %346  ;;  %v591_v40 = vld [vmem:[#allocation3 + $0x10] sm:$0xff]  ;;  %388 = vst.msk [vmem:[#allocation3 + $0x48] sm:$0xff] %vm378_vm1, %v349_v38 }
  0xb8   : > { %387 = vst.msk [vmem:[#allocation3 + $0x40] sm:$0xff] %vm378_vm1, %v347_v39  ;;  %v606_v42 = vpack.c.bf16 %v592_v41, %v591_v40 }
  0xba   : > { %1084 = vmatmul.mubr.msk.bf16.gmra.mrb[4].mxu0 %vm625_vm4, %v606_v42  ;;  %v438_v43 = vpop.permute.xlu1 %437 }
  0xbb   : > { %v436_v44 = vpop.permute.xlu0 %435  ;;  %702 = vmatprep.mubr.bf16.mxu0 %v1309_v23  ;;  %481 = vst.msk [vmem:[#allocation3 + $0x28] sm:$0xff] %vm475_vm2, %v438_v43 }
  0xbc   : > { %480 = vst.msk [vmem:[#allocation3 + $0x20] sm:$0xff] %vm475_vm2, %v436_v44 }
  0xbe   : > { %v446_v45 = vpop.permute.xlu1 %445 }
  0xbf   : > { %v444_v46 = vpop.permute.xlu0 %443  ;;  %485 = vst.msk [vmem:[#allocation3 + $0x48] sm:$0xff] %vm475_vm2, %v446_v45 }
  0xc0   : > { %484 = vst.msk [vmem:[#allocation3 + $0x40] sm:$0xff] %vm475_vm2, %v444_v46 }
  0xc2   : > { %v535_v47 = vpop.permute.xlu1 %534 }
  0xc3   : > { %v533_v48 = vpop.permute.xlu0 %532  ;;  %578 = vst.msk [vmem:[#allocation3 + $0x28] sm:$0xff] %vm572_vm3, %v535_v47 }
  0xc4   : > { %577 = vst.msk [vmem:[#allocation3 + $0x20] sm:$0xff] %vm572_vm3, %v533_v48 }
  0xc6   : > { %v543_v49 = vpop.permute.xlu1 %542 }
  0xc7   : > { %v541_v50 = vpop.permute.xlu0 %540  ;;  %582 = vst.msk [vmem:[#allocation3 + $0x48] sm:$0xff] %vm572_vm3, %v543_v49 }
  0xc8   : > { %581 = vst.msk [vmem:[#allocation3 + $0x40] sm:$0xff] %vm572_vm3, %v541_v50 }
  0xca   : > { %v345_v51 = vpop.permute.xlu1 %344  ;;  %v594_v54 = vld [vmem:[#allocation3 + $0x28] sm:$0xff] }
  0xcb   : > { %v343_v52 = vpop.permute.xlu0 %342  ;;  %v593_v53 = vld [vmem:[#allocation3 + $0x20] sm:$0xff]  ;;  %386 = vst.msk [vmem:[#allocation3 + $0x38] sm:$0xff] %vm378_vm1, %v345_v51 }
  0xcc   : > { %385 = vst.msk [vmem:[#allocation3 + $0x30] sm:$0xff] %vm378_vm1, %v343_v52  ;;  %v607_v55 = vpack.c.bf16 %v594_v54, %v593_v53 }
  0xce   : > { %1085 = vmatmul.mubr.msk.bf16.gmra.mrb[8].mxu0 %vm625_vm4, %v607_v55  ;;  %v353_v56 = vpop.permute.xlu1 %352  ;;  %v598_v59 = vld [vmem:[#allocation3 + $0x48] sm:$0xff] }
  0xcf   : > { %v351_v57 = vpop.permute.xlu0 %350  ;;  %v597_v58 = vld [vmem:[#allocation3 + $0x40] sm:$0xff]  ;;  %712 = vmatprep.mubr.bf16.mxu0 %v1309_v23  ;;  %390 = vst.msk [vmem:[#allocation3 + $0x58] sm:$0xff] %vm378_vm1, %v353_v56 }
  0xd0   : > { %389 = vst.msk [vmem:[#allocation3 + $0x50] sm:$0xff] %vm378_vm1, %v351_v57  ;;  %v609_v60 = vpack.c.bf16 %v598_v59, %v597_v58 }
  0xd2   : > { %1087 = vmatmul.mubr.msk.bf16.vlgmr.msra.gmra.mrb[0].mxu1 %vm625_vm4, %v609_v60  ;;  %v442_v61 = vpop.permute.xlu1 %441 }
  0xd3   : > { %v440_v62 = vpop.permute.xlu0 %439  ;;  %732 = vmatprep.mubr.bf16.mxu1 %v1309_v23  ;;  %483 = vst.msk [vmem:[#allocation3 + $0x38] sm:$0xff] %vm475_vm2, %v442_v61 }
  0xd4   : > { %482 = vst.msk [vmem:[#allocation3 + $0x30] sm:$0xff] %vm475_vm2, %v440_v62 }
  0xd6   : > { %v450_v63 = vpop.permute.xlu1 %449 }
  0xd7   : > { %v448_v0 = vpop.permute.xlu0 %447  ;;  %487 = vst.msk [vmem:[#allocation3 + $0x58] sm:$0xff] %vm475_vm2, %v450_v63 }
  0xd8   : > { %486 = vst.msk [vmem:[#allocation3 + $0x50] sm:$0xff] %vm475_vm2, %v448_v0 }
  0xda   : > { %v539_v1 = vpop.permute.xlu1 %538 }
  0xdb   : > { %v537_v2 = vpop.permute.xlu0 %536  ;;  %580 = vst.msk [vmem:[#allocation3 + $0x38] sm:$0xff] %vm572_vm3, %v539_v1 }
  0xdc   : > { %579 = vst.msk [vmem:[#allocation3 + $0x30] sm:$0xff] %vm572_vm3, %v537_v2 }
  0xde   : > { %v547_v3 = vpop.permute.xlu1 %546 }
  0xdf   : > { %v545_v4 = vpop.permute.xlu0 %544  ;;  %584 = vst.msk [vmem:[#allocation3 + $0x58] sm:$0xff] %vm572_vm3, %v547_v3 }
  0xe0   : > { %583 = vst.msk [vmem:[#allocation3 + $0x50] sm:$0xff] %vm572_vm3, %v545_v4 }
  0xe2   : > { %v357_v5 = vpop.permute.xlu1 %356  ;;  %v596_v8 = vld [vmem:[#allocation3 + $0x38] sm:$0xff] }
  0xe3   : > { %v355_v6 = vpop.permute.xlu0 %354  ;;  %v595_v7 = vld [vmem:[#allocation3 + $0x30] sm:$0xff]  ;;  %392 = vst.msk [vmem:[#allocation3 + $0x68] sm:$0xff] %vm378_vm1, %v357_v5 }
  0xe4   : > { %391 = vst.msk [vmem:[#allocation3 + $0x60] sm:$0xff] %vm378_vm1, %v355_v6  ;;  %v608_v9 = vpack.c.bf16 %v596_v8, %v595_v7 }
  0xe6   : > { %1086 = vmatmul.mubr.msk.bf16.gmra.mrb[12].mxu0 %vm625_vm4, %v608_v9  ;;  %v454_v10 = vpop.permute.xlu1 %453  ;;  %v600_v13 = vld [vmem:[#allocation3 + $0x58] sm:$0xff] }
  0xe7   : > { %v452_v11 = vpop.permute.xlu0 %451  ;;  %v599_v12 = vld [vmem:[#allocation3 + $0x50] sm:$0xff]  ;;  %489 = vst.msk [vmem:[#allocation3 + $0x68] sm:$0xff] %vm475_vm2, %v454_v10 }
  0xe8   : > { %488 = vst.msk [vmem:[#allocation3 + $0x60] sm:$0xff] %vm475_vm2, %v452_v11  ;;  %v610_v14 = vpack.c.bf16 %v600_v13, %v599_v12 }
  0xea   : > { %1088 = vmatmul.mubr.msk.bf16.gmra.mrb[4].mxu1 %vm625_vm4, %v610_v14  ;;  %v551_v15 = vpop.permute.xlu1 %550 }
  0xeb   : > { %v549_v16 = vpop.permute.xlu0 %548  ;;  %742 = vmatprep.mubr.bf16.mxu1 %v1309_v23  ;;  %586 = vst.msk [vmem:[#allocation3 + $0x68] sm:$0xff] %vm572_vm3, %v551_v15 }
  0xec   : > { %585 = vst.msk [vmem:[#allocation3 + $0x60] sm:$0xff] %vm572_vm3, %v549_v16 }
  0xee   : > { %v361_v17 = vpop.permute.xlu1 %360 }
  0xef   : > { %v359_v18 = vpop.permute.xlu0 %358  ;;  %394 = vst.msk [vmem:[#allocation3 + $0x78] sm:$0xff] %vm378_vm1, %v361_v17 }
  0xf0   : > { %393 = vst.msk [vmem:[#allocation3 + $0x70] sm:$0xff] %vm378_vm1, %v359_v18 }
  0xf2   : > { %v458_v19 = vpop.permute.xlu1 %457  ;;  %v602_v22 = vld [vmem:[#allocation3 + $0x68] sm:$0xff] }
  0xf3   : > { %v456_v20 = vpop.permute.xlu0 %455  ;;  %v601_v21 = vld [vmem:[#allocation3 + $0x60] sm:$0xff]  ;;  %491 = vst.msk [vmem:[#allocation3 + $0x78] sm:$0xff] %vm475_vm2, %v458_v19 }
  0xf4   : > { %490 = vst.msk [vmem:[#allocation3 + $0x70] sm:$0xff] %vm475_vm2, %v456_v20  ;;  %v611_v24 = vpack.c.bf16 %v602_v22, %v601_v21 }
  0xf6   : > { %1089 = vmatmul.mubr.msk.bf16.gmra.mrb[8].mxu1 %vm625_vm4, %v611_v24  ;;  %v555_v25 = vpop.permute.xlu1 %554 }
  0xf7   : > { %v553_v26 = vpop.permute.xlu0 %552  ;;  %752 = vmatprep.mubr.bf16.mxu1 %v1309_v23  ;;  %588 = vst.msk [vmem:[#allocation3 + $0x78] sm:$0xff] %vm572_vm3, %v555_v25 }
  0xf8   : > { %587 = vst.msk [vmem:[#allocation3 + $0x70] sm:$0xff] %vm572_vm3, %v553_v26 }
  0xfe   : > { %v604_v28 = vld [vmem:[#allocation3 + $0x78] sm:$0xff] }
  0xff   : > { %v603_v27 = vld [vmem:[#allocation3 + $0x70] sm:$0xff] }
 0x100   : > { %v612_v29 = vpack.c.bf16 %v604_v28, %v603_v27 }
 0x102   : > { %1090 = vmatmul.mubr.msk.bf16.gmra.mrb[12].mxu1 %vm625_vm4, %v612_v29 }
 0x181   : > { %v684_v30 = vpop.f32.mrb[0].mxu0 }
 0x182   : > { %v763_v31 = vmul.f32 %v684_v30, %v684_v30  ;;  %v686_v32 = vpop.f32.mrb[1].mxu0 }
 0x183   : > { %v779_v33 = vmul.f32 %v686_v32, %v686_v32  ;;  %v688_v34 = vpop.f32.mrb[2].mxu0 }
 0x184   : > { %v764_v35 = vmul.f32 %v688_v34, %v688_v34  ;;  %v690_v36 = vpop.f32.mrb[3].mxu0 }
 0x185   : > { %v795_v37 = vadd.f32 %v779_v33, %v763_v31  ;;  %v780_v38 = vmul.f32 %v690_v36, %v690_v36 }
 0x187   : > { %v796_v39 = vadd.f32 %v780_v38, %v764_v35  ;;  %1179 = vrsqrt.f32 %v795_v37  ;;  %vm813_vm5 = vcmp.eq.f32.partialorder %v795_v37, inf  ;;  %v816_v52 = vand.u32 2147483648, %v795_v37 }
 0x188   : > { %vm815_vm6 = vcmp.eq.f32.partialorder %v795_v37, 0.0 }
 0x189   : > { %1181 = vrsqrt.f32 %v796_v39  ;;  %vm820_vm7 = vcmp.eq.f32.partialorder %v796_v39, inf  ;;  %v823_v57 = vand.u32 2147483648, %v796_v39  ;;  %vm822_vm8 = vcmp.eq.f32.partialorder %v796_v39, 0.0 }
 0x18d   : > { %v694_v23 = vpop.f32.mrb[4].mxu0 }
 0x18e   : > { %v765_v40 = vmul.f32 %v694_v23, %v694_v23  ;;  %v696_v41 = vpop.f32.mrb[5].mxu0 }
 0x18f   : > { %v781_v42 = vmul.f32 %v696_v41, %v696_v41  ;;  %v698_v43 = vpop.f32.mrb[6].mxu0 }
 0x190   : > { %v766_v44 = vmul.f32 %v698_v43, %v698_v43  ;;  %v700_v45 = vpop.f32.mrb[7].mxu0 }
 0x191   : > { %v1180_v46 = vpop.eup %1179  ;;  %v797_v47 = vadd.f32 %v781_v42, %v765_v40  ;;  %v782_v48 = vmul.f32 %v700_v45, %v700_v45 }
 0x192   : > { %v812_v49 = vmul.f32 %v1180_v46, %v795_v37 }
 0x193   : > { %v1182_v50 = vpop.eup %1181  ;;  %v798_v51 = vadd.f32 %v782_v48, %v766_v44  ;;  %1183 = vrsqrt.f32 %v797_v47  ;;  %vm827_vm9 = vcmp.eq.f32.partialorder %v797_v47, inf  ;;  %v830_v62 = vand.u32 2147483648, %v797_v47 }
 0x194   : > { %v814_v53 = vsel %vm813_vm5, %v795_v37, %v812_v49  ;;  %v819_v54 = vmul.f32 %v1182_v50, %v796_v39  ;;  %vm829_vm10 = vcmp.eq.f32.partialorder %v797_v47, 0.0 }
 0x195   : > { %v817_v55 = vsel %vm815_vm6, %v816_v52, %v814_v53  ;;  %1185 = vrsqrt.f32 %v798_v51  ;;  %vm834_vm11 = vcmp.eq.f32.partialorder %v798_v51, inf  ;;  %v837_v8 = vand.u32 2147483648, %v798_v51 }
 0x196   : > { %923 = vxpose.xlu0.b32.start [1/16] (narrow) %v817_v55, 16  ;;  %v821_v56 = vsel %vm820_vm7, %v796_v39, %v819_v54  ;;  %vm836_vm12 = vcmp.eq.f32.partialorder %v798_v51, 0.0 }
 0x197   : > { %v824_v58 = vsel %vm822_vm8, %v823_v57, %v821_v56 }
 0x19a   : > { %924 = vxpose.xlu0.b32.cont [2/16] (narrow) %v824_v58, 16 }
 0x19d   : > { %v1184_v59 = vpop.eup %1183 }
 0x19e   : > { %v826_v60 = vmul.f32 %v1184_v59, %v797_v47 }
 0x19f   : > { %v1186_v61 = vpop.eup %1185 }
 0x1a0   : > { %v828_v63 = vsel %vm827_vm9, %v797_v47, %v826_v60  ;;  %v833_v0 = vmul.f32 %v1186_v61, %v798_v51 }
 0x1a1   : > { %v704_v1 = vpop.f32.mrb[8].mxu0  ;;  %v831_v2 = vsel %vm829_vm10, %v830_v62, %v828_v63 }
 0x1a2   : > { %v767_v3 = vmul.f32 %v704_v1, %v704_v1  ;;  %925 = vxpose.xlu0.b32.cont [3/16] (narrow) %v831_v2, 16  ;;  %v706_v4 = vpop.f32.mrb[9].mxu0  ;;  %v835_v5 = vsel %vm834_vm11, %v798_v51, %v833_v0 }
 0x1a3   : > { %v783_v6 = vmul.f32 %v706_v4, %v706_v4  ;;  %v708_v7 = vpop.f32.mrb[10].mxu0  ;;  %v838_v14 = vsel %vm836_vm12, %v837_v8, %v835_v5 }
 0x1a4   : > { %v768_v9 = vmul.f32 %v708_v7, %v708_v7  ;;  %v710_v10 = vpop.f32.mrb[11].mxu0 }
 0x1a5   : > { %v799_v11 = vadd.f32 %v783_v6, %v767_v3  ;;  %v784_v12 = vmul.f32 %v710_v10, %v710_v10  ;;  %v724_v13 = vpop.f32.mrb[0].mxu1 }
 0x1a6   : > { %v771_v15 = vmul.f32 %v724_v13, %v724_v13  ;;  %v726_v16 = vpop.f32.mrb[1].mxu1  ;;  %926 = vxpose.xlu0.b32.cont [4/16] (narrow) %v838_v14, 16 }
 0x1a7   : > { %v800_v17 = vadd.f32 %v784_v12, %v768_v9  ;;  %v787_v18 = vmul.f32 %v726_v16, %v726_v16  ;;  %v728_v19 = vpop.f32.mrb[2].mxu1  ;;  %1187 = vrsqrt.f32 %v799_v11  ;;  %vm841_vm13 = vcmp.eq.f32.partialorder %v799_v11, inf }
 0x1a8   : > { %v772_v20 = vmul.f32 %v728_v19, %v728_v19  ;;  %v730_v21 = vpop.f32.mrb[3].mxu1  ;;  %v844_v29 = vand.u32 2147483648, %v799_v11  ;;  %vm843_vm14 = vcmp.eq.f32.partialorder %v799_v11, 0.0 }
 0x1a9   : > { %v1585_v22 = vadd.f32 %v787_v18, %v771_v15  ;;  %v788_v24 = vmul.f32 %v730_v21, %v730_v21  ;;  %1189 = vrsqrt.f32 %v800_v17  ;;  %vm848_vm15 = vcmp.eq.f32.partialorder %v800_v17, inf }
 0x1aa   : > { %v851_v34 = vand.u32 2147483648, %v800_v17  ;;  %vm850_vm0 = vcmp.eq.f32.partialorder %v800_v17, 0.0 }
 0x1ab   : > { %v1587_v25 = vadd.f32 %v788_v24, %v772_v20  ;;  %vm869_vm5 = vcmp.eq.f32.partialorder %v1585_v22, inf  ;;  %vm871_vm6 = vcmp.eq.f32.partialorder %v1585_v22, 0.0 }
 0x1ad   : > { %vm876_vm7 = vcmp.eq.f32.partialorder %v1587_v25, inf  ;;  %vm878_vm8 = vcmp.eq.f32.partialorder %v1587_v25, 0.0 }
 0x1b1   : > { %v1188_v26 = vpop.eup %1187 }
 0x1b2   : > { %v840_v27 = vmul.f32 %v1188_v26, %v799_v11 }
 0x1b3   : > { %v1190_v28 = vpop.eup %1189 }
 0x1b4   : > { %v842_v30 = vsel %vm841_vm13, %v799_v11, %v840_v27  ;;  %v847_v31 = vmul.f32 %v1190_v28, %v800_v17 }
 0x1b5   : > { %v845_v32 = vsel %vm843_vm14, %v844_v29, %v842_v30  ;;  %v879_v30 = vand.u32 2147483648, %v1587_v25 }
 0x1b6   : > { %927 = vxpose.xlu0.b32.cont [5/16] (narrow) %v845_v32, 16  ;;  %v849_v33 = vsel %vm848_vm15, %v800_v17, %v847_v31  ;;  %v872_v17 = vand.u32 2147483648, %v1585_v22 }
 0x1b7   : > { %v852_v36 = vsel %vm850_vm0, %v851_v34, %v849_v33 }
 0x1b9   : > { %v714_v35 = vpop.f32.mrb[12].mxu0 }
 0x1ba   : > { %v769_v37 = vmul.f32 %v714_v35, %v714_v35  ;;  %928 = vxpose.xlu0.b32.cont [6/16] (narrow) %v852_v36, 16  ;;  %v716_v38 = vpop.f32.mrb[13].mxu0 }
 0x1bb   : > { %v785_v39 = vmul.f32 %v716_v38, %v716_v38  ;;  %v718_v23 = vpop.f32.mrb[14].mxu0 }
 0x1bc   : > { %v770_v40 = vmul.f32 %v718_v23, %v718_v23  ;;  %v720_v41 = vpop.f32.mrb[15].mxu0 }
 0x1bd   : > { %v801_v42 = vadd.f32 %v785_v39, %v769_v37  ;;  %v786_v43 = vmul.f32 %v720_v41, %v720_v41  ;;  %v734_v44 = vpop.f32.mrb[4].mxu1 }
 0x1be   : > { %v773_v45 = vmul.f32 %v734_v44, %v734_v44  ;;  %v736_v46 = vpop.f32.mrb[5].mxu1 }
 0x1bf   : > { %v802_v47 = vadd.f32 %v786_v43, %v770_v40  ;;  %v789_v48 = vmul.f32 %v736_v46, %v736_v46  ;;  %v738_v49 = vpop.f32.mrb[6].mxu1  ;;  %1191 = vrsqrt.f32 %v801_v42  ;;  %vm855_vm1 = vcmp.eq.f32.partialorder %v801_v42, inf }
 0x1c0   : > { %v774_v50 = vmul.f32 %v738_v49, %v738_v49  ;;  %v740_v51 = vpop.f32.mrb[7].mxu1  ;;  %1193 = vrsqrt.f32 %v1585_v22  ;;  %vm857_vm2 = vcmp.eq.f32.partialorder %v801_v42, 0.0  ;;  %v858_v0 = vand.u32 2147483648, %v801_v42 }
 0x1c1   : > { %v1590_v52 = vadd.f32 %v789_v48, %v773_v45  ;;  %v790_v53 = vmul.f32 %v740_v51, %v740_v51  ;;  %1195 = vrsqrt.f32 %v802_v47  ;;  %vm862_vm3 = vcmp.eq.f32.partialorder %v802_v47, inf }
 0x1c2   : > { %1197 = vrsqrt.f32 %v1587_v25  ;;  %v865_v12 = vand.u32 2147483648, %v802_v47  ;;  %vm864_vm4 = vcmp.eq.f32.partialorder %v802_v47, 0.0 }
 0x1c3   : > { %v1592_v54 = vadd.f32 %v790_v53, %v774_v50  ;;  %1199 = vrsqrt.f32 %v1590_v52  ;;  %vm883_vm9 = vcmp.eq.f32.partialorder %v1590_v52, inf  ;;  %v886_v39 = vand.u32 2147483648, %v1590_v52 }
 0x1c4   : > { %vm885_vm10 = vcmp.eq.f32.partialorder %v1590_v52, 0.0 }
 0x1c5   : > { %1201 = vrsqrt.f32 %v1592_v54  ;;  %vm890_vm11 = vcmp.eq.f32.partialorder %v1592_v54, inf  ;;  %vm892_vm12 = vcmp.eq.f32.partialorder %v1592_v54, 0.0 }
 0x1c9   : > { %v1192_v55 = vpop.eup %1191  ;;  %v744_v56 = vpop.f32.mrb[8].mxu1 }
 0x1ca   : > { %v1194_v57 = vpop.eup %1193  ;;  %v775_v58 = vmul.f32 %v744_v56, %v744_v56  ;;  %v746_v59 = vpop.f32.mrb[9].mxu1  ;;  %v854_v60 = vmul.f32 %v1192_v55, %v801_v42 }
 0x1cb   : > { %v1196_v61 = vpop.eup %1195  ;;  %v791_v62 = vmul.f32 %v746_v59, %v746_v59  ;;  %v748_v63 = vpop.f32.mrb[10].mxu1  ;;  %v868_v9 = vmul.f32 %v1194_v57, %v1585_v22 }
 0x1cc   : > { %v776_v1 = vmul.f32 %v748_v63, %v748_v63  ;;  %v750_v2 = vpop.f32.mrb[11].mxu1  ;;  %v856_v3 = vsel %vm855_vm1, %v801_v42, %v854_v60  ;;  %v861_v4 = vmul.f32 %v1196_v61, %v802_v47  ;;  %v1198_v10 = vpop.eup %1197  ;;  %v893_v42 = vand.u32 2147483648, %v1592_v54 }
 0x1cd   : > { %v1596_v5 = vadd.f32 %v791_v62, %v775_v58  ;;  %v792_v6 = vmul.f32 %v750_v2, %v750_v2  ;;  %v859_v7 = vsel %vm857_vm2, %v858_v0, %v856_v3  ;;  %v870_v14 = vsel %vm869_vm5, %v1585_v22, %v868_v9  ;;  %v1200_v16 = vpop.eup %1199 }
 0x1ce   : > { %929 = vxpose.xlu0.b32.cont [7/16] (narrow) %v859_v7, 16  ;;  %v863_v8 = vsel %vm862_vm3, %v802_v47, %v861_v4  ;;  %v875_v15 = vmul.f32 %v1198_v10, %v1587_v25  ;;  %v873_v19 = vsel %vm871_vm6, %v872_v17, %v870_v14  ;;  %v882_v26 = vmul.f32 %v1200_v16, %v1590_v52 }
 0x1cf   : > { %v1600_v11 = vadd.f32 %v792_v6, %v776_v1  ;;  %v866_v13 = vsel %vm864_vm4, %v865_v12, %v863_v8  ;;  %1203 = vrsqrt.f32 %v1596_v5  ;;  %v1202_v27 = vpop.eup %1201  ;;  %vm897_vm13 = vcmp.eq.f32.partialorder %v1596_v5, inf }
 0x1d0   : > { %v877_v24 = vsel %vm876_vm7, %v1587_v25, %v875_v15  ;;  %v884_v35 = vsel %vm883_vm9, %v1590_v52, %v882_v26  ;;  %v889_v36 = vmul.f32 %v1202_v27, %v1592_v54  ;;  %v900_v46 = vand.u32 2147483648, %v1596_v5 }
 0x1d1   : > { %1205 = vrsqrt.f32 %v1600_v11  ;;  %v880_v34 = vsel %vm878_vm8, %v879_v30, %v877_v24  ;;  %v887_v23 = vsel %vm885_vm10, %v886_v39, %v884_v35  ;;  %vm899_vm14 = vcmp.eq.f32.partialorder %v1596_v5, 0.0 }
 0x1d2   : > { %930 = vxpose.xlu0.b32.cont [8/16] (narrow) %v866_v13, 16  ;;  %v891_v25 = vsel %vm890_vm11, %v1592_v54, %v889_v36  ;;  %vm904_vm15 = vcmp.eq.f32.partialorder %v1600_v11, inf  ;;  %v907_v52 = vand.u32 2147483648, %v1600_v11  ;;  %vm906_vm0 = vcmp.eq.f32.partialorder %v1600_v11, 0.0 }
 0x1d3   : > { %v894_v43 = vsel %vm892_vm12, %v893_v42, %v891_v25 }
 0x1d5   : > { %v754_v18 = vpop.f32.mrb[12].mxu1 }
 0x1d6   : > { %v777_v20 = vmul.f32 %v754_v18, %v754_v18  ;;  %v756_v21 = vpop.f32.mrb[13].mxu1  ;;  %931 = vxpose.xlu0.b32.cont [9/16] (narrow) %v873_v19, 16 }
 0x1d7   : > { %v793_v28 = vmul.f32 %v756_v21, %v756_v21  ;;  %v758_v29 = vpop.f32.mrb[14].mxu1 }
 0x1d8   : > { %v778_v31 = vmul.f32 %v758_v29, %v758_v29  ;;  %v760_v22 = vpop.f32.mrb[15].mxu1 }
 0x1d9   : > { %v809_v32 = vadd.f32 %v793_v28, %v777_v20  ;;  %v794_v33 = vmul.f32 %v760_v22, %v760_v22  ;;  %v1204_v37 = vpop.eup %1203 }
 0x1da   : > { %932 = vxpose.xlu0.b32.cont [10/16] (narrow) %v880_v34, 16  ;;  %v896_v40 = vmul.f32 %v1204_v37, %v1596_v5 }
 0x1db   : > { %v810_v38 = vadd.f32 %v794_v33, %v778_v31  ;;  %1207 = vrsqrt.f32 %v809_v32  ;;  %v1206_v41 = vpop.eup %1205  ;;  %vm911_vm1 = vcmp.eq.f32.partialorder %v809_v32, inf  ;;  %v914_v56 = vand.u32 2147483648, %v809_v32 }
 0x1dc   : > { %v898_v44 = vsel %vm897_vm13, %v1596_v5, %v896_v40  ;;  %v903_v45 = vmul.f32 %v1206_v41, %v1600_v11  ;;  %vm913_vm2 = vcmp.eq.f32.partialorder %v809_v32, 0.0 }
 0x1dd   : > { %1209 = vrsqrt.f32 %v810_v38  ;;  %v901_v48 = vsel %vm899_vm14, %v900_v46, %v898_v44  ;;  %vm918_vm3 = vcmp.eq.f32.partialorder %v810_v38, inf  ;;  %v921_v59 = vand.u32 2147483648, %v810_v38 }
 0x1de   : > { %933 = vxpose.xlu0.b32.cont [11/16] (narrow) %v887_v23, 16  ;;  %v905_v49 = vsel %vm904_vm15, %v1600_v11, %v903_v45  ;;  %vm920_vm4 = vcmp.eq.f32.partialorder %v810_v38, 0.0 }
 0x1df   : > { %v908_v53 = vsel %vm906_vm0, %v907_v52, %v905_v49 }
 0x1e2   : > { %934 = vxpose.xlu0.b32.cont [12/16] (narrow) %v894_v43, 16 }
 0x1e5   : > { %v1208_v47 = vpop.eup %1207 }
 0x1e6   : > { %935 = vxpose.xlu0.b32.cont [13/16] (narrow) %v901_v48, 16  ;;  %v910_v50 = vmul.f32 %v1208_v47, %v809_v32 }
 0x1e7   : > { %v1210_v51 = vpop.eup %1209 }
 0x1e8   : > { %v912_v54 = vsel %vm911_vm1, %v809_v32, %v910_v50  ;;  %v917_v55 = vmul.f32 %v1210_v51, %v810_v38 }
 0x1e9   : > { %v915_v57 = vsel %vm913_vm2, %v914_v56, %v912_v54 }
 0x1ea   : > { %936 = vxpose.xlu0.b32.cont [14/16] (narrow) %v908_v53, 16  ;;  %v919_v58 = vsel %vm918_vm3, %v810_v38, %v917_v55 }
 0x1eb   : > { %v922_v60 = vsel %vm920_vm4, %v921_v59, %v919_v58 }
 0x1ee   : > { %937 = vxpose.xlu0.b32.cont [15/16] (narrow) %v915_v57, 16 }
 0x1f2   : > { %938 = vxpose.xlu0.b32.end [16/16] (narrow) %v922_v60, 16 }
 0x236   : > { %v939_v61 = vpop.trf.xlu0 }
 0x237   : > { %955 = vst [vmem:[%s211_s28] sm:$0xff] %v939_v61 }
 0x23a   : > { %v940_v62 = vpop.trf.xlu0 }
 0x23b   : > { %956 = vst [vmem:[%s211_s28 + $0x8] sm:$0xff] %v940_v62 }
 0x23c   : > { %1224 = shalt.err (!%p1221_p9)
}
 0x23d   : > { %s1225_s20 = scalar_lea.hbm %s1641_s8, 256  ;;  %s1229_s27 = scalar_lea.hbm %s1699_s3, 1024 }
 0x23e   : > { %p1226_p10 = scmp.ne.s32.totalorder %s1641_s8, %s1225_s20  ;;  %p1230_p13 = scmp.lt.u32.totalorder %s1641_s8, %s1699_s3 }
 0x23f   : > { %p1231_p0 = scmp.lt.u32.totalorder %s1229_s27, %s1225_s20  ;;  %p1233_p2 = scmp.lt.u32.totalorder %s1225_s20, %s1641_s8 }
 0x240   : > { %p1227_p11 = pnand %p1226_p10, %p1385_p3 }
 0x241   : > { %p1232_p1 = por %p1231_p0, %p1230_p13 }
 0x242   : > { %p1228_p12 = pneg %p1227_p11 }
 0x243   : > { %p1234_p4 = por %p1233_p2, %p1232_p1 }
 0x245   : > { %p1235_p5 = pnand %p1234_p4, %p1228_p12 }
 0x247   : > { %1238 = shalt.err (!%p1235_p5)
}
 0x248   : > { %s1312_s6 = smov 128   ;;  %s1313_s7 = smov 256  }
 0x249   : > { %1099 = dma.vmem_to_hbm [thread:$0]  (%p1385_p3), %s1636_s29, 256, %s1641_s8, %s1643_s16, %s1312_s6, %s1313_s7, %s1307_s5  }
 0x24a PF: > { %p1105_p6 = scmp.ge.s32.totalorder %s1305_s19, 2  ;;  %s987_s15 = sand.u32 1, %s1277_s12  }
 0x24b   : > { %s988_s9 = scalar_lea.sflag [#allocation5], %s987_s15 }
 0x24c   : > { %p1102_p7 = pnand %p1105_p6, %p1394_p8 }
 0x24e   : > { %1272 = dma.done.wait (!%p1102_p7), %s988_s9, 256  }
 0x24f   : > { %1274 = vsyncadd (!%p1102_p7), %s988_s9, 4294967040  ;;  %s16_s19 = sadd.s32 1, %s1305_s19   ;;  %s1702_s12 = smov %s1281_s13 }
 0x250   : > { %p13_p9 = scmp.ge.s32.totalorder %s16_s19, 6   ;;  %s1703_s13 = smov %s1285_s14 }
 0x251   : > { %s1704_s14 = smov %s1403_s30  ;;  %s1705_s15 = smov %s1297_s17 }
 0x252   : > { %s1706_s16 = smov %s1301_s18  ;;  %s1707_s17 = smov %s1710_s22 }
 0x253   : > { %s1708_s18 = smov %s1714_s23  ;;  %15 = sbr.rel (!%p13_p9) target bundleno = 5 (0x5), region = 70 }
 0x25a   :  { %993 = vsyncpa [#allocation5], 1 }
 0x25b   :  { %995 = vsyncpa [#allocation5 + $0x1], 1 }

// kernel: tpu_custom_call.1
= control target key start
LH: loop header
LB: loop body
LE: loop exit
PB: predicated region body
PF: predicated region fallthrough
CT: control target
= control target key end

     0   :  { %8 = vsyncpa [#allocation4], 0  ;;  %s2093_s0 = inlined_call_operand.vmem [shape: f32[2,384,4], index: 0, kind: input, shape index: {}]   ;;  %s2094_s1 = inlined_call_operand.vmem [shape: f32[2,2,8,4], index: 1, kind: input, shape index: {}]   ;;  %s2095_s2 = inlined_call_operand.vmem [shape: bf16[4,4,256], index: 2, kind: input, shape index: {}]   ;;  %s2096_s3 = inlined_call_operand.hbm [shape: f32[2,16,256], index: 3, kind: output, shape index: {}]  }
   0x1   :  { %10 = vsyncpa [#allocation4 + $0x1], 0  ;;  %s1733_s12 = smov 0   ;;  %s1735_s13 = smov 0  }
   0x2   :  { %s1737_s14 = smov 0   ;;  %s1739_s15 = smov 0  }
   0x3   :  { %s1741_s16 = smov 0   ;;  %s1743_s17 = smov 0  }
   0x4   :  { %s1745_s18 = smov 0   ;;  %s1747_s19 = smov 0  }
   0x5 LB: > { %s1350_s20 = sadd.s32 4294967295, %s1706_s19   ;;  %s1351_s21 = sadd.s32 4294967294, %s1706_s19   ;;  %s1706_s19 = sphi %s1747_s19, %s16_s19   ;;  %s1702_s18 = sphi %s1745_s18, %s2105_s18   ;;  %s1698_s17 = sphi %s1743_s17, %s2104_s17   ;;  %s1694_s16 = sphi %s1741_s16, %s2103_s16   ;;  %s1690_s15 = sphi %s1739_s15, %s2102_s15   ;;  %s1686_s14 = sphi %s1737_s14, %s2101_s14   ;;  %s1682_s13 = sphi %s1735_s13, %s2100_s13   ;;  %s1678_s12 = sphi %s1733_s12, %s2099_s12  }
   0x6   : > { %s25_s22 = sadd.s32 1, %s1698_s17  ;;  %s28_s23 = sadd.s32 1, %s1702_s18 }
   0x7   : > { %p26_p0 = scmp.ge.s32.totalorder %s25_s22, 2  ;;  %p124_p1 = scmp.ne.s32.totalorder %s1686_s14, %s1682_s13 }
   0x8   : > { %p125_p2 = scmp.eq.s32.totalorder %s1350_s20, 3  ;;  %p130_p5 = scmp.ne.s32.totalorder %s1682_s13, %s1678_s12 }
   0x9   : > { %s2107_s22 = smov (%p26_p0, %s25_s22), 0  ;;  %s2109_s23 = smov (!%p26_p0, %s28_s23), %s1702_s18 }
   0xa   : > { %s110_s24 = ssub.s32 %s1698_s17, %s2107_s22  ;;  %p1784_p3 = por %p125_p2, %p124_p1 }
   0xb   : > { %p30_p4 = scmp.ge.s32.totalorder %s2109_s23, 2  ;;  %p131_p6 = scmp.eq.s32.totalorder %s1351_s21, 3 }
   0xc   : > { %p1354_p7 = scmp.ge.s32.totalorder %s1706_s19, 1  ;;  %p176_p9 = scmp.lt.s32.totalorder %s1706_s19, 5 }
   0xd   : > { %s2111_s23 = smov (%p30_p4, %s2109_s23), 0  ;;  %p1793_p8 = por %p131_p6, %p130_p5 }
   0xe   : > { %s109_s27 = ssub.s32 %s1702_s18, %s2111_s23  ;;  %s114_s28 = sadd.s32 1, %s1686_s14 }
   0xf   : > { %s111_s29 = sor.u32 %s110_s24, %s109_s27  ;;  %p177_p10 = pnand %p1354_p7, %p176_p9 }
  0x10   : > { %p112_p11 = scmp.eq.s32.totalorder %s111_s29, 0  ;;  %v1361_v0 = vld.sshfl [vmem:[%s2095_s2 + $0x4] sm:$0x33 pattern:$0x76325410] (!%p177_p10)  ;;  %vm350_vm0 = vcmask (!%p177_p10), 1041408  }
  0x11   : > { %180 = sbr.rel (%p177_p10) target bundleno = 491 (0x1eb), region = 32  ;;  %v325_v1 = vcombine.high (!%p177_p10), %v1361_v0, %v1361_v0  ;;  %v1382_v2 = vld.sshfl [vmem:[%s2095_s2 + $0x8] sm:$0x33 pattern:$0x76325410] (!%p177_p10)  ;;  %v352_v3 = vsel (!%p177_p10), %vm350_vm0, %v1361_v0, 0 }
  0x12   : > { %s1802_s30 = scalar_select %p112_p11, %s1686_s14, %s114_s28  }
  0x13   : > { %v1708_v4 = vmov (!%p177_p10), 0   ;;  %s1356_s8 = sshll.u32 (!%p177_p10), %s1690_s15, 4  ;;  %v656_v5 = vcombine.high (!%p177_p10), %v1382_v2, %v1382_v2  ;;  %v682_v6 = vsel (!%p177_p10), %vm350_vm0, %v1382_v2, 0  ;;  %p213_p12 = scmp.lt.s32.totalorder (!%p177_p10), %s1694_s16, 1  ;;  %1362 = vmatprep.subr.msk.bf16.mxu1 (!%p177_p10), %vm350_vm0, %v325_v1  ;;  %vm247_vm1 = vcmask (!%p177_p10), 31744  }
  0x14   : > { %389 = vmatprep.mubr.bf16.mxu1 (!%p177_p10), %v1708_v4  ;;  %719 = vmatprep.mubr.bf16.mxu0 (!%p177_p10), %v1708_v4  ;;  %v1818_v7 = vld.sshfl [vmem:[%s2095_s2] sm:$0x33 pattern:$0x76325410] (!%p177_p10)  ;;  %p215_p13 = scmp.lt.s32.totalorder (!%p177_p10), %s1356_s8, 47  ;;  %p224_p0 = scmp.lt.s32.totalorder (!%p177_p10), %s1690_s15, 1 }
  0x15   : > { %v478_v8 = vcombine.high (!%p177_p10), %v1818_v7, %v1818_v7  ;;  %v1393_v9 = vld.sshfl [vmem:[%s2095_s2 + $0xc] sm:$0x33 pattern:$0x76325410] (!%p177_p10)  ;;  %1383 = vmatprep.subr.msk.bf16.mxu0 (!%p177_p10), %vm350_vm0, %v656_v5  ;;  %358 = vmatpush1.bf16.msra.mxu1 (!%p177_p10), %v352_v3  ;;  %v504_v32 = vsel (!%p177_p10), %vm350_vm0, %v1818_v7, 0 }
  0x16   : > { %v866_v10 = vcombine.high (!%p177_p10), %v1393_v9, %v1393_v9  ;;  %688 = vmatpush1.bf16.msra.mxu0 (!%p177_p10), %v682_v6  ;;  %v892_v35 = vsel (!%p177_p10), %vm350_vm0, %v1393_v9, 0 }
  0x17   : > { %1372 = vmatprep.subr.msk.bf16.mxu1 (!%p177_p10), %vm350_vm0, %v478_v8 }
  0x18   : > { %s1829_s21 = scalar_select %p213_p12, %s1694_s16, 1  ;;  %1394 = vmatprep.subr.msk.bf16.mxu0 %vm350_vm0, %v866_v10 }
  0x19   : > { %s2113_s8 = smov (!%p215_p13, %s1356_s8), 47 }
  0x1a   : > { %s1504_s24 = smul.u32 48, %s1829_s21  ;;  %s1358_s6 = sshll.u32 %s1829_s21, 1 }
  0x1b   : > { %s225_s7 = scalar_select %p224_p0, %s1690_s15, 1 }
  0x1c   : > { %s218_s27 = sadd.s32 %s1504_s24, %s2113_s8  ;;  %s209_s21 = sand.u32 1, %s1682_s13  }
  0x1d   : > { %s1357_s28 = sshll.u32 %s218_s27, 3  ;;  %s227_s8 = sadd.s32 %s1358_s6, %s225_s7 }
  0x1e   : > { %s1838_s5 = scalar_lea.vmem %s2093_s0, %s1357_s28  ;;  %s1359_s9 = sshll.u32 %s227_s8, 3 }
  0x1f   : > { %v231_v11 = vld [vmem:[%s1838_s5] sm:$0xff]  ;;  %v232_v12 = vld [vmem:[%s1838_s5 + $0x8] sm:$0xff]  ;;  %v233_v13 = vld [vmem:[%s1838_s5 + $0x10] sm:$0xff]  ;;  %s229_s20 = scalar_lea.vmem %s2094_s1, %s1359_s9  ;;  %s1404_s24 = sshll.u32 %s1694_s16, 2 }
  0x20   : > { %248 = vst.msk [vmem:[#allocation2] sm:$0xff] %vm247_vm1, %v231_v11  ;;  %249 = vst.msk [vmem:[#allocation2 + $0x8] sm:$0xff] %vm247_vm1, %v232_v12  ;;  %v234_v14 = vld [vmem:[%s1838_s5 + $0x18] sm:$0xff]  ;;  %v235_v15 = vld [vmem:[%s1838_s5 + $0x20] sm:$0xff]  ;;  %s1355_s27 = sshll.u32 %s209_s21, 4  ;;  %s1248_s28 = sadd.s32 %s1690_s15, %s1404_s24 }
  0x21   : > { %250 = vst.msk [vmem:[#allocation2 + $0x10] sm:$0xff] %vm247_vm1, %v233_v13  ;;  %v236_v16 = vld [vmem:[%s1838_s5 + $0x28] sm:$0xff]  ;;  %251 = vst.msk [vmem:[#allocation2 + $0x18] sm:$0xff] %vm247_vm1, %v234_v14  ;;  %v237_v17 = vld [vmem:[%s1838_s5 + $0x30] sm:$0xff]  ;;  %s211_s29 = scalar_lea.vmem [#allocation3], %s1355_s27  ;;  %s2041_s16 = scalar_lea.sflag [#allocation4], %s209_s21 }
  0x22   : > { %252 = vst.msk [vmem:[#allocation2 + $0x20] sm:$0xff] %vm247_vm1, %v235_v15  ;;  %253 = vst.msk [vmem:[#allocation2 + $0x28] sm:$0xff] %vm247_vm1, %v236_v16  ;;  %v238_v18 = vld [vmem:[%s1838_s5 + $0x38] sm:$0xff]  ;;  %v239_v19 = vld [vmem:[%s1838_s5 + $0x40] sm:$0xff]  ;;  %s1251_s4 = sshll.u32 %s211_s29, 4  ;;  %s1709_s9 = smov [#allocation3]   ;;  %s2034_s4 = int_to_ptr.vmem [resolvable:$true] %s1251_s4 }
  0x23   : > { %254 = vst.msk [vmem:[#allocation2 + $0x30] sm:$0xff] %vm247_vm1, %v237_v17  ;;  %255 = vst.msk [vmem:[#allocation2 + $0x38] sm:$0xff] %vm247_vm1, %v238_v18  ;;  %v240_v20 = vld [vmem:[%s1838_s5 + $0x48] sm:$0xff]  ;;  %v241_v21 = vld [vmem:[%s1838_s5 + $0x50] sm:$0xff]  ;;  %s1612_s15 = scalar_lea.vmem %s2034_s4, 256  ;;  %s1616_s10 = sshll.u32 %s1709_s9, 4  ;;  %s1617_s10 = int_to_ptr.vmem [resolvable:$false] %s1616_s10 }
  0x24   : > { %256 = vst.msk [vmem:[#allocation2 + $0x40] sm:$0xff] %vm247_vm1, %v239_v19  ;;  %v242_v22 = vld [vmem:[%s1838_s5 + $0x58] sm:$0xff]  ;;  %257 = vst.msk [vmem:[#allocation2 + $0x48] sm:$0xff] %vm247_vm1, %v240_v20  ;;  %v243_v23 = vld [vmem:[%s1838_s5 + $0x60] sm:$0xff]  ;;  %p1613_p1 = scmp.ne.s32.totalorder %s2034_s4, %s1612_s15  ;;  %s1618_s11 = scalar_lea.vmem %s1617_s10, 512 }
  0x25   : > { %258 = vst.msk [vmem:[#allocation2 + $0x50] sm:$0xff] %vm247_vm1, %v241_v21  ;;  %259 = vst.msk [vmem:[#allocation2 + $0x58] sm:$0xff] %vm247_vm1, %v242_v22  ;;  %v244_v24 = vld [vmem:[%s1838_s5 + $0x68] sm:$0xff]  ;;  %v245_v25 = vld [vmem:[%s1838_s5 + $0x70] sm:$0xff]  ;;  %p1619_p5 = scmp.lt.s32.totalorder %s2034_s4, %s1617_s10  ;;  %p1620_p6 = scmp.lt.s32.totalorder %s1618_s11, %s1612_s15 }
  0x26   : > { %260 = vst.msk [vmem:[#allocation2 + $0x60] sm:$0xff] %vm247_vm1, %v243_v23  ;;  %261 = vst.msk [vmem:[#allocation2 + $0x68] sm:$0xff] %vm247_vm1, %v244_v24  ;;  %v246_v26 = vld [vmem:[%s1838_s5 + $0x78] sm:$0xff]  ;;  %v264_v27 = vld [vmem:[%s229_s20] sm:$0xff]  ;;  %s1405_s5 = sshll.u32 %s1248_s28, 7  ;;  %p1614_p2 = pnand %p1613_p1, %p1784_p3 }
  0x27   : > { %262 = vst.msk [vmem:[#allocation2 + $0x70] sm:$0xff] %vm247_vm1, %v245_v25  ;;  %263 = vst.msk [vmem:[#allocation2 + $0x78] sm:$0xff] %vm247_vm1, %v246_v26  ;;  %v291_v28 = vld [vmem:[#allocation2 + $0x1] sm:$0xff]  ;;  %s2039_s8 = scalar_lea.hbm %s2096_s3, %s1405_s5  ;;  %p1621_p7 = por %p1620_p6, %p1619_p5 }
  0x28   : > { %265 = vst.msk [vmem:[#allocation2 + $0x80] sm:$0xff] %vm247_vm1, %v264_v27  ;;  %v292_v29 = vld [vmem:[#allocation2 + $0x9] sm:$0xff]  ;;  %v293_v36 = vld [vmem:[#allocation2 + $0x11] sm:$0xff]  ;;  %v266_v15 = vld [vmem:[#allocation2] sm:$0xff]  ;;  %p1615_p4 = pneg %p1614_p2 }
  0x29   : > { %v622_v30 = vld [vmem:[#allocation2 + $0x2] sm:$0xff]  ;;  %v307_v31 = vpack.c.bf16 %v292_v29, %v291_v28  ;;  %v623_v33 = vld [vmem:[#allocation2 + $0xa] sm:$0xff]  ;;  %v294_v37 = vld [vmem:[#allocation2 + $0x19] sm:$0xff] }
  0x2a   : > { %v638_v34 = vpack.c.bf16 %v623_v33, %v622_v30  ;;  %v624_v38 = vld [vmem:[#allocation2 + $0x12] sm:$0xff]  ;;  %v625_v39 = vld [vmem:[#allocation2 + $0x1a] sm:$0xff]  ;;  %v308_v40 = vpack.c.bf16 %v294_v37, %v293_v36  ;;  %v296_v43 = vld [vmem:[#allocation2 + $0x29] sm:$0xff]  ;;  %p1622_p9 = pnand %p1621_p7, %p1615_p4 }
  0x2b   : > { %1363 = vmatmul.mubr.msk.bf16.vlgmr.msra.gmra.mrb[0].mxu1 %vm247_vm1, %v307_v31  ;;  %v639_v41 = vpack.c.bf16 %v625_v39, %v624_v38  ;;  %v295_v42 = vld [vmem:[#allocation2 + $0x21] sm:$0xff]  ;;  %v627_v45 = vld [vmem:[#allocation2 + $0x2a] sm:$0xff]  ;;  %v298_v49 = vld [vmem:[#allocation2 + $0x39] sm:$0xff] }
  0x2c   : > { %510 = vmatpush1.bf16.msra.mxu1 %v504_v32  ;;  %1384 = vmatmul.mubr.msk.bf16.vlgmr.msra.gmra.mrb[0].mxu0 %vm247_vm1, %v638_v34  ;;  %v626_v44 = vld [vmem:[#allocation2 + $0x22] sm:$0xff]  ;;  %v309_v46 = vpack.c.bf16 %v296_v43, %v295_v42  ;;  %v297_v48 = vld [vmem:[#allocation2 + $0x31] sm:$0xff]  ;;  %v629_v51 = vld [vmem:[#allocation2 + $0x3a] sm:$0xff] }
  0x2d   : > { %898 = vmatpush1.bf16.msra.mxu0 %v892_v35  ;;  %399 = vmatprep.mubr.bf16.mxu1 %v1708_v4  ;;  %v640_v47 = vpack.c.bf16 %v627_v45, %v626_v44  ;;  %v628_v50 = vld [vmem:[#allocation2 + $0x32] sm:$0xff]  ;;  %v310_v52 = vpack.c.bf16 %v298_v49, %v297_v48  ;;  %v299_v54 = vld [vmem:[#allocation2 + $0x41] sm:$0xff]  ;;  %v300_v55 = vld [vmem:[#allocation2 + $0x49] sm:$0xff] }
  0x2e   : > { %729 = vmatprep.mubr.bf16.mxu0 %v1708_v4  ;;  %v641_v53 = vpack.c.bf16 %v629_v51, %v628_v50  ;;  %v630_v56 = vld [vmem:[#allocation2 + $0x42] sm:$0xff]  ;;  %v631_v57 = vld [vmem:[#allocation2 + $0x4a] sm:$0xff]  ;;  %v311_v58 = vpack.c.bf16 %v300_v55, %v299_v54  ;;  %v302_v61 = vld [vmem:[#allocation2 + $0x59] sm:$0xff] }
  0x2f   : > { %v642_v59 = vpack.c.bf16 %v631_v57, %v630_v56  ;;  %v301_v60 = vld [vmem:[#allocation2 + $0x51] sm:$0xff]  ;;  %v633_v63 = vld [vmem:[#allocation2 + $0x5a] sm:$0xff]  ;;  %v304_v3 = vld [vmem:[#allocation2 + $0x69] sm:$0xff] }
  0x30   : > { %v632_v62 = vld [vmem:[#allocation2 + $0x52] sm:$0xff]  ;;  %v312_v0 = vpack.c.bf16 %v302_v61, %v301_v60  ;;  %v303_v2 = vld [vmem:[#allocation2 + $0x61] sm:$0xff]  ;;  %v635_v6 = vld [vmem:[#allocation2 + $0x6a] sm:$0xff] }
  0x31   : > { %v643_v1 = vpack.c.bf16 %v633_v63, %v632_v62  ;;  %v634_v5 = vld [vmem:[#allocation2 + $0x62] sm:$0xff]  ;;  %v313_v7 = vpack.c.bf16 %v304_v3, %v303_v2  ;;  %v305_v9 = vld [vmem:[#allocation2 + $0x71] sm:$0xff]  ;;  %v306_v10 = vld [vmem:[#allocation2 + $0x79] sm:$0xff] }
  0x32   : > { %v644_v8 = vpack.c.bf16 %v635_v6, %v634_v5  ;;  %v636_v11 = vld [vmem:[#allocation2 + $0x72] sm:$0xff]  ;;  %v637_v12 = vld [vmem:[#allocation2 + $0x7a] sm:$0xff]  ;;  %v314_v13 = vpack.c.bf16 %v306_v10, %v305_v9  ;;  %v267_v16 = vld [vmem:[#allocation2 + $0x8] sm:$0xff] }
  0x33   : > { %1364 = vmatmul.mubr.msk.bf16.gmra.mrb[4].mxu1 %vm247_vm1, %v308_v40  ;;  %v645_v14 = vpack.c.bf16 %v637_v12, %v636_v11  ;;  %v832_v17 = vld [vmem:[#allocation2 + $0x3] sm:$0xff]  ;;  %v833_v18 = vld [vmem:[#allocation2 + $0xb] sm:$0xff]  ;;  %v282_v19 = vpack.c.bf16 %v267_v16, %v266_v15  ;;  %v269_v22 = vld [vmem:[#allocation2 + $0x18] sm:$0xff] }
  0x34   : > { %1385 = vmatmul.mubr.msk.bf16.gmra.mrb[4].mxu0 %vm247_vm1, %v639_v41  ;;  %409 = vmatprep.mubr.bf16.mxu1 %v1708_v4  ;;  %v848_v20 = vpack.c.bf16 %v833_v18, %v832_v17  ;;  %v268_v21 = vld [vmem:[#allocation2 + $0x10] sm:$0xff]  ;;  %v835_v24 = vld [vmem:[#allocation2 + $0x1b] sm:$0xff]  ;;  %v271_v28 = vld [vmem:[#allocation2 + $0x28] sm:$0xff] }
  0x35   : > { %739 = vmatprep.mubr.bf16.mxu0 %v1708_v4  ;;  %v834_v23 = vld [vmem:[#allocation2 + $0x13] sm:$0xff]  ;;  %v283_v25 = vpack.c.bf16 %v269_v22, %v268_v21  ;;  %v270_v27 = vld [vmem:[#allocation2 + $0x20] sm:$0xff]  ;;  %v837_v30 = vld [vmem:[#allocation2 + $0x2b] sm:$0xff] }
  0x36   : > { %v849_v26 = vpack.c.bf16 %v835_v24, %v834_v23  ;;  %v836_v29 = vld [vmem:[#allocation2 + $0x23] sm:$0xff]  ;;  %v284_v31 = vpack.c.bf16 %v271_v28, %v270_v27  ;;  %v272_v33 = vld [vmem:[#allocation2 + $0x30] sm:$0xff]  ;;  %v273_v34 = vld [vmem:[#allocation2 + $0x38] sm:$0xff] }
  0x37   : > { %v850_v32 = vpack.c.bf16 %v837_v30, %v836_v29  ;;  %v838_v35 = vld [vmem:[#allocation2 + $0x33] sm:$0xff]  ;;  %v839_v36 = vld [vmem:[#allocation2 + $0x3b] sm:$0xff]  ;;  %v285_v37 = vpack.c.bf16 %v273_v34, %v272_v33  ;;  %v275_v40 = vld [vmem:[#allocation2 + $0x48] sm:$0xff] }
  0x38   : > { %v851_v38 = vpack.c.bf16 %v839_v36, %v838_v35  ;;  %v274_v39 = vld [vmem:[#allocation2 + $0x40] sm:$0xff]  ;;  %v841_v42 = vld [vmem:[#allocation2 + $0x4b] sm:$0xff] }
  0x39   : > { %v840_v41 = vld [vmem:[#allocation2 + $0x43] sm:$0xff]  ;;  %v286_v43 = vpack.c.bf16 %v275_v40, %v274_v39  ;;  %v276_v45 = vld [vmem:[#allocation2 + $0x50] sm:$0xff]  ;;  %v843_v48 = vld [vmem:[#allocation2 + $0x5b] sm:$0xff] }
  0x3a   : > { %v852_v44 = vpack.c.bf16 %v841_v42, %v840_v41  ;;  %v278_v51 = vld [vmem:[#allocation2 + $0x60] sm:$0xff]  ;;  %v845_v54 = vld [vmem:[#allocation2 + $0x6b] sm:$0xff] }
  0x3b   : > { %1365 = vmatmul.mubr.msk.bf16.gmra.mrb[8].mxu1 %vm247_vm1, %v309_v46  ;;  %v277_v46 = vld [vmem:[#allocation2 + $0x58] sm:$0xff]  ;;  %v280_v57 = vld [vmem:[#allocation2 + $0x70] sm:$0xff] }
  0x3c   : > { %1386 = vmatmul.mubr.msk.bf16.gmra.mrb[8].mxu0 %vm247_vm1, %v640_v47  ;;  %419 = vmatprep.mubr.bf16.mxu1 %v1708_v4  ;;  %v842_v47 = vld [vmem:[#allocation2 + $0x53] sm:$0xff]  ;;  %v287_v49 = vpack.c.bf16 %v277_v46, %v276_v45  ;;  %v847_v60 = vld [vmem:[#allocation2 + $0x7b] sm:$0xff] }
  0x3d   : > { %749 = vmatprep.mubr.bf16.mxu0 %v1708_v4  ;;  %v853_v50 = vpack.c.bf16 %v843_v48, %v842_v47 }
  0x43   : > { %1366 = vmatmul.mubr.msk.bf16.gmra.mrb[12].mxu1 %vm247_vm1, %v310_v52  ;;  %v279_v52 = vld [vmem:[#allocation2 + $0x68] sm:$0xff] }
  0x44   : > { %1387 = vmatmul.mubr.msk.bf16.gmra.mrb[12].mxu0 %vm247_vm1, %v641_v53  ;;  %429 = vmatprep.mubr.bf16.mxu1 %v1708_v4  ;;  %v844_v53 = vld [vmem:[#allocation2 + $0x63] sm:$0xff]  ;;  %v288_v55 = vpack.c.bf16 %v279_v52, %v278_v51 }
  0x45   : > { %759 = vmatprep.mubr.bf16.mxu0 %v1708_v4  ;;  %v854_v56 = vpack.c.bf16 %v845_v54, %v844_v53 }
  0x4b   : > { %1367 = vmatmul.mubr.msk.bf16.gmra.mrb[16].mxu1 %vm247_vm1, %v311_v58  ;;  %v281_v58 = vld [vmem:[#allocation2 + $0x78] sm:$0xff] }
  0x4c   : > { %1388 = vmatmul.mubr.msk.bf16.gmra.mrb[16].mxu0 %vm247_vm1, %v642_v59  ;;  %439 = vmatprep.mubr.bf16.mxu1 %v1708_v4  ;;  %v846_v59 = vld [vmem:[#allocation2 + $0x73] sm:$0xff]  ;;  %v289_v61 = vpack.c.bf16 %v281_v58, %v280_v57 }
  0x4d   : > { %769 = vmatprep.mubr.bf16.mxu0 %v1708_v4  ;;  %v855_v62 = vpack.c.bf16 %v847_v60, %v846_v59 }
  0x53   : > { %1368 = vmatmul.mubr.msk.bf16.gmra.mrb[20].mxu1 %vm247_vm1, %v312_v0 }
  0x54   : > { %1389 = vmatmul.mubr.msk.bf16.gmra.mrb[20].mxu0 %vm247_vm1, %v643_v1  ;;  %449 = vmatprep.mubr.bf16.mxu1 %v1708_v4 }
  0x55   : > { %779 = vmatprep.mubr.bf16.mxu0 %v1708_v4 }
  0x5b   : > { %1369 = vmatmul.mubr.msk.bf16.gmra.mrb[24].mxu1 %vm247_vm1, %v313_v7 }
  0x5c   : > { %1390 = vmatmul.mubr.msk.bf16.gmra.mrb[24].mxu0 %vm247_vm1, %v644_v8  ;;  %459 = vmatprep.mubr.bf16.mxu1 %v1708_v4 }
  0x5d   : > { %789 = vmatprep.mubr.bf16.mxu0 %v1708_v4 }
  0x63   : > { %1370 = vmatmul.mubr.msk.bf16.gmra.mrb[28].mxu1 %vm247_vm1, %v314_v13 }
  0x64   : > { %1391 = vmatmul.mubr.msk.bf16.gmra.mrb[28].mxu0 %vm247_vm1, %v645_v14  ;;  %541 = vmatprep.mubr.bf16.mxu1 %v1708_v4 }
  0x65   : > { %929 = vmatprep.mubr.bf16.mxu0 %v1708_v4 }
  0x6b   : > { %1373 = vmatmul.mubr.msk.bf16.vlgmr.msra.gmra.mrb[0].mxu1 %vm247_vm1, %v282_v19 }
  0x6c   : > { %1395 = vmatmul.mubr.msk.bf16.vlgmr.msra.gmra.mrb[0].mxu0 %vm247_vm1, %v848_v20  ;;  %551 = vmatprep.mubr.bf16.mxu1 %v1708_v4 }
  0x6d   : > { %939 = vmatprep.mubr.bf16.mxu0 %v1708_v4 }
  0x73   : > { %1374 = vmatmul.mubr.msk.bf16.gmra.mrb[4].mxu1 %vm247_vm1, %v283_v25 }
  0x74   : > { %1396 = vmatmul.mubr.msk.bf16.gmra.mrb[4].mxu0 %vm247_vm1, %v849_v26  ;;  %561 = vmatprep.mubr.bf16.mxu1 %v1708_v4 }
  0x75   : > { %949 = vmatprep.mubr.bf16.mxu0 %v1708_v4 }
  0x7b   : > { %1375 = vmatmul.mubr.msk.bf16.gmra.mrb[8].mxu1 %vm247_vm1, %v284_v31 }
  0x7c   : > { %1397 = vmatmul.mubr.msk.bf16.gmra.mrb[8].mxu0 %vm247_vm1, %v850_v32  ;;  %571 = vmatprep.mubr.bf16.mxu1 %v1708_v4 }
  0x7d   : > { %959 = vmatprep.mubr.bf16.mxu0 %v1708_v4 }
  0x83   : > { %1376 = vmatmul.mubr.msk.bf16.gmra.mrb[12].mxu1 %vm247_vm1, %v285_v37 }
  0x84   : > { %1398 = vmatmul.mubr.msk.bf16.gmra.mrb[12].mxu0 %vm247_vm1, %v851_v38  ;;  %581 = vmatprep.mubr.bf16.mxu1 %v1708_v4 }
  0x85   : > { %969 = vmatprep.mubr.bf16.mxu0 %v1708_v4 }
  0x8b   : > { %1377 = vmatmul.mubr.msk.bf16.gmra.mrb[16].mxu1 %vm247_vm1, %v286_v43 }
  0x8c   : > { %1399 = vmatmul.mubr.msk.bf16.gmra.mrb[16].mxu0 %vm247_vm1, %v852_v44  ;;  %591 = vmatprep.mubr.bf16.mxu1 %v1708_v4 }
  0x8d   : > { %979 = vmatprep.mubr.bf16.mxu0 %v1708_v4 }
  0x93   : > { %1378 = vmatmul.mubr.msk.bf16.gmra.mrb[20].mxu1 %vm247_vm1, %v287_v49 }
  0x94   : > { %1400 = vmatmul.mubr.msk.bf16.gmra.mrb[20].mxu0 %vm247_vm1, %v853_v50  ;;  %601 = vmatprep.mubr.bf16.mxu1 %v1708_v4 }
  0x95   : > { %989 = vmatprep.mubr.bf16.mxu0 %v1708_v4 }
  0x9b   : > { %1379 = vmatmul.mubr.msk.bf16.gmra.mrb[24].mxu1 %vm247_vm1, %v288_v55 }
  0x9c   : > { %1401 = vmatmul.mubr.msk.bf16.gmra.mrb[24].mxu0 %vm247_vm1, %v854_v56  ;;  %611 = vmatprep.mubr.bf16.mxu1 %v1708_v4 }
  0x9d   : > { %999 = vmatprep.mubr.bf16.mxu0 %v1708_v4 }
  0xa3   : > { %1380 = vmatmul.mubr.msk.bf16.gmra.mrb[28].mxu1 %vm247_vm1, %v289_v61 }
  0xa4   : > { %1402 = vmatmul.mubr.msk.bf16.gmra.mrb[28].mxu0 %vm247_vm1, %v855_v62 }
 0x13e   : > { %v543_v63 = vpop.f32.mrb[0].mxu1 }
 0x13f   : > { %v931_v0 = vpop.f32.mrb[0].mxu0  ;;  %v545_v1 = vpop.f32.mrb[1].mxu1 }
 0x140   : > { %v1408_v2 = vadd.f32 %v931_v0, %v543_v63  ;;  %v933_v3 = vpop.f32.mrb[1].mxu0  ;;  %v547_v5 = vpop.f32.mrb[2].mxu1 }
 0x141   : > { %v1409_v6 = vadd.f32 %v933_v3, %v545_v1  ;;  %v935_v7 = vpop.f32.mrb[2].mxu0  ;;  %v549_v8 = vpop.f32.mrb[3].mxu1 }
 0x142   : > { %v1042_v9 = vmul.f32 %v1408_v2, %v1408_v2  ;;  %v1410_v10 = vadd.f32 %v935_v7, %v547_v5  ;;  %v937_v4 = vpop.f32.mrb[3].mxu0 }
 0x143   : > { %v1058_v11 = vmul.f32 %v1409_v6, %v1409_v6  ;;  %v1411_v12 = vadd.f32 %v937_v4, %v549_v8 }
 0x144   : > { %v1043_v13 = vmul.f32 %v1410_v10, %v1410_v10 }
 0x145   : > { %v1074_v14 = vadd.f32 %v1058_v11, %v1042_v9  ;;  %v1059_v15 = vmul.f32 %v1411_v12, %v1411_v12 }
 0x146   : > { %v553_v16 = vpop.f32.mrb[4].mxu1 }
 0x147   : > { %v1943_v17 = vadd.f32 %v1059_v15, %v1043_v13  ;;  %v941_v18 = vpop.f32.mrb[4].mxu0  ;;  %v555_v19 = vpop.f32.mrb[5].mxu1  ;;  %1580 = vrsqrt.f32 %v1074_v14  ;;  %vm1092_vm2 = vcmp.eq.f32.partialorder %v1074_v14, inf  ;;  %v1095_v52 = vand.u32 2147483648, %v1074_v14 }
 0x148   : > { %v1412_v20 = vadd.f32 %v941_v18, %v553_v16  ;;  %v943_v21 = vpop.f32.mrb[5].mxu0  ;;  %v557_v22 = vpop.f32.mrb[6].mxu1  ;;  %vm1094_vm3 = vcmp.eq.f32.partialorder %v1074_v14, 0.0 }
 0x149   : > { %v1413_v23 = vadd.f32 %v943_v21, %v555_v19  ;;  %v945_v24 = vpop.f32.mrb[6].mxu0  ;;  %v559_v25 = vpop.f32.mrb[7].mxu1  ;;  %1582 = vrsqrt.f32 %v1943_v17  ;;  %vm1099_vm4 = vcmp.eq.f32.partialorder %v1943_v17, inf  ;;  %v1102_v0 = vand.u32 2147483648, %v1943_v17 }
 0x14a   : > { %v1044_v26 = vmul.f32 %v1412_v20, %v1412_v20  ;;  %v1414_v27 = vadd.f32 %v945_v24, %v557_v22  ;;  %v947_v28 = vpop.f32.mrb[7].mxu0  ;;  %vm1101_vm5 = vcmp.eq.f32.partialorder %v1943_v17, 0.0 }
 0x14b   : > { %v1060_v29 = vmul.f32 %v1413_v23, %v1413_v23  ;;  %v1415_v30 = vadd.f32 %v947_v28, %v559_v25 }
 0x14c   : > { %v1045_v31 = vmul.f32 %v1414_v27, %v1414_v27 }
 0x14d   : > { %v1946_v32 = vadd.f32 %v1060_v29, %v1044_v26  ;;  %v1061_v33 = vmul.f32 %v1415_v30, %v1415_v30 }
 0x14e   : > { %v563_v34 = vpop.f32.mrb[8].mxu1 }
 0x14f   : > { %v1948_v35 = vadd.f32 %v1061_v33, %v1045_v31  ;;  %v951_v36 = vpop.f32.mrb[8].mxu0  ;;  %v565_v37 = vpop.f32.mrb[9].mxu1  ;;  %1584 = vrsqrt.f32 %v1946_v32  ;;  %vm1106_vm6 = vcmp.eq.f32.partialorder %v1946_v32, inf  ;;  %v1109_v16 = vand.u32 2147483648, %v1946_v32 }
 0x150   : > { %v1416_v38 = vadd.f32 %v951_v36, %v563_v34  ;;  %v953_v39 = vpop.f32.mrb[9].mxu0  ;;  %v567_v40 = vpop.f32.mrb[10].mxu1  ;;  %vm1108_vm7 = vcmp.eq.f32.partialorder %v1946_v32, 0.0 }
 0x151   : > { %v1581_v41 = vpop.eup %1580  ;;  %v1417_v42 = vadd.f32 %v953_v39, %v565_v37  ;;  %v955_v43 = vpop.f32.mrb[10].mxu0  ;;  %1586 = vrsqrt.f32 %v1948_v35  ;;  %vm1113_vm8 = vcmp.eq.f32.partialorder %v1948_v35, inf  ;;  %v1116_v28 = vand.u32 2147483648, %v1948_v35 }
 0x152   : > { %v569_v44 = vpop.f32.mrb[11].mxu1  ;;  %v1046_v45 = vmul.f32 %v1416_v38, %v1416_v38  ;;  %v1418_v46 = vadd.f32 %v955_v43, %v567_v40  ;;  %v957_v47 = vpop.f32.mrb[11].mxu0  ;;  %v1091_v48 = vmul.f32 %v1581_v41, %v1074_v14  ;;  %vm1115_vm9 = vcmp.eq.f32.partialorder %v1948_v35, 0.0 }
 0x153   : > { %v1583_v49 = vpop.eup %1582  ;;  %v1062_v50 = vmul.f32 %v1417_v42, %v1417_v42  ;;  %v1419_v51 = vadd.f32 %v957_v47, %v569_v44 }
 0x154   : > { %v1047_v53 = vmul.f32 %v1418_v46, %v1418_v46  ;;  %v1093_v54 = vsel %vm1092_vm2, %v1074_v14, %v1091_v48  ;;  %v1098_v55 = vmul.f32 %v1583_v49, %v1943_v17 }
 0x155   : > { %v1953_v56 = vadd.f32 %v1062_v50, %v1046_v45  ;;  %v1063_v57 = vmul.f32 %v1419_v51, %v1419_v51  ;;  %v1096_v58 = vsel %vm1094_vm3, %v1095_v52, %v1093_v54 }
 0x156   : > { %1202 = vxpose.xlu0.b32.start [1/16] (narrow) %v1096_v58, 16  ;;  %v573_v59 = vpop.f32.mrb[12].mxu1  ;;  %v1100_v60 = vsel %vm1099_vm4, %v1943_v17, %v1098_v55 }
 0x157   : > { %v1957_v61 = vadd.f32 %v1063_v57, %v1047_v53  ;;  %v961_v62 = vpop.f32.mrb[12].mxu0  ;;  %v575_v63 = vpop.f32.mrb[13].mxu1  ;;  %1588 = vrsqrt.f32 %v1953_v56  ;;  %v1103_v9 = vsel %vm1101_vm5, %v1102_v0, %v1100_v60  ;;  %vm1120_vm10 = vcmp.eq.f32.partialorder %v1953_v56, inf }
 0x158   : > { %v1420_v1 = vadd.f32 %v961_v62, %v573_v59  ;;  %v963_v2 = vpop.f32.mrb[13].mxu0  ;;  %v577_v3 = vpop.f32.mrb[14].mxu1  ;;  %vm1122_vm11 = vcmp.eq.f32.partialorder %v1953_v56, 0.0 }
 0x159   : > { %v1585_v5 = vpop.eup %1584  ;;  %v1421_v6 = vadd.f32 %v963_v2, %v575_v63  ;;  %v965_v7 = vpop.f32.mrb[14].mxu0  ;;  %1590 = vrsqrt.f32 %v1957_v61  ;;  %vm1127_vm12 = vcmp.eq.f32.partialorder %v1957_v61, inf  ;;  %v1130_v57 = vand.u32 2147483648, %v1957_v61 }
 0x15a   : > { %v579_v8 = vpop.f32.mrb[15].mxu1  ;;  %v1048_v10 = vmul.f32 %v1420_v1, %v1420_v1  ;;  %v1422_v4 = vadd.f32 %v965_v7, %v577_v3  ;;  %v967_v11 = vpop.f32.mrb[15].mxu0  ;;  %1203 = vxpose.xlu0.b32.cont [2/16] (narrow) %v1103_v9, 16  ;;  %v1105_v12 = vmul.f32 %v1585_v5, %v1946_v32  ;;  %vm1129_vm13 = vcmp.eq.f32.partialorder %v1957_v61, 0.0 }
 0x15b   : > { %v1587_v13 = vpop.eup %1586  ;;  %v1064_v14 = vmul.f32 %v1421_v6, %v1421_v6  ;;  %v1423_v15 = vadd.f32 %v967_v11, %v579_v8 }
 0x15c   : > { %v1049_v17 = vmul.f32 %v1422_v4, %v1422_v4  ;;  %v1107_v18 = vsel %vm1106_vm6, %v1946_v32, %v1105_v12  ;;  %v1112_v19 = vmul.f32 %v1587_v13, %v1948_v35 }
 0x15d   : > { %v1969_v20 = vadd.f32 %v1064_v14, %v1048_v10  ;;  %v1065_v21 = vmul.f32 %v1423_v15, %v1423_v15  ;;  %v1110_v22 = vsel %vm1108_vm7, %v1109_v16, %v1107_v18 }
 0x15e   : > { %1204 = vxpose.xlu0.b32.cont [3/16] (narrow) %v1110_v22, 16  ;;  %v583_v23 = vpop.f32.mrb[16].mxu1  ;;  %v1114_v24 = vsel %vm1113_vm8, %v1948_v35, %v1112_v19  ;;  %v1123_v35 = vand.u32 2147483648, %v1953_v56 }
 0x15f   : > { %v1973_v25 = vadd.f32 %v1065_v21, %v1049_v17  ;;  %v971_v26 = vpop.f32.mrb[16].mxu0  ;;  %v585_v27 = vpop.f32.mrb[17].mxu1  ;;  %1592 = vrsqrt.f32 %v1969_v20  ;;  %v1117_v37 = vsel %vm1115_vm9, %v1116_v28, %v1114_v24  ;;  %vm1134_vm14 = vcmp.eq.f32.partialorder %v1969_v20, inf }
 0x160   : > { %v1424_v29 = vadd.f32 %v971_v26, %v583_v23  ;;  %v973_v30 = vpop.f32.mrb[17].mxu0  ;;  %v587_v31 = vpop.f32.mrb[18].mxu1  ;;  %vm1136_vm15 = vcmp.eq.f32.partialorder %v1969_v20, 0.0 }
 0x161   : > { %v1589_v32 = vpop.eup %1588  ;;  %v1425_v33 = vadd.f32 %v973_v30, %v585_v27  ;;  %v975_v34 = vpop.f32.mrb[18].mxu0  ;;  %1594 = vrsqrt.f32 %v1973_v25  ;;  %vm1141_vm0 = vcmp.eq.f32.partialorder %v1973_v25, inf  ;;  %v1144_v21 = vand.u32 2147483648, %v1973_v25 }
 0x162   : > { %v589_v36 = vpop.f32.mrb[19].mxu1  ;;  %v1050_v38 = vmul.f32 %v1424_v29, %v1424_v29  ;;  %v1426_v39 = vadd.f32 %v975_v34, %v587_v31  ;;  %v977_v40 = vpop.f32.mrb[19].mxu0  ;;  %1205 = vxpose.xlu0.b32.cont [4/16] (narrow) %v1117_v37, 16  ;;  %v1119_v41 = vmul.f32 %v1589_v32, %v1953_v56  ;;  %vm1143_vm1 = vcmp.eq.f32.partialorder %v1973_v25, 0.0 }
 0x163   : > { %v1591_v42 = vpop.eup %1590  ;;  %v1066_v43 = vmul.f32 %v1425_v33, %v1425_v33  ;;  %v1427_v44 = vadd.f32 %v977_v40, %v589_v36 }
 0x164   : > { %v1051_v45 = vmul.f32 %v1426_v39, %v1426_v39  ;;  %v1121_v46 = vsel %vm1120_vm10, %v1953_v56, %v1119_v41  ;;  %v1126_v47 = vmul.f32 %v1591_v42, %v1957_v61 }
 0x165   : > { %v1985_v48 = vadd.f32 %v1066_v43, %v1050_v38  ;;  %v1067_v49 = vmul.f32 %v1427_v44, %v1427_v44  ;;  %v1124_v50 = vsel %vm1122_vm11, %v1123_v35, %v1121_v46 }
 0x166   : > { %1206 = vxpose.xlu0.b32.cont [5/16] (narrow) %v1124_v50, 16  ;;  %v593_v51 = vpop.f32.mrb[20].mxu1  ;;  %v1128_v52 = vsel %vm1127_vm12, %v1957_v61, %v1126_v47  ;;  %v1137_v61 = vand.u32 2147483648, %v1969_v20 }
 0x167   : > { %v1989_v53 = vadd.f32 %v1067_v49, %v1051_v45  ;;  %v981_v54 = vpop.f32.mrb[20].mxu0  ;;  %v595_v55 = vpop.f32.mrb[21].mxu1  ;;  %1596 = vrsqrt.f32 %v1985_v48  ;;  %v1131_v1 = vsel %vm1129_vm13, %v1130_v57, %v1128_v52  ;;  %vm1148_vm2 = vcmp.eq.f32.partialorder %v1985_v48, inf }
 0x168   : > { %v1428_v56 = vadd.f32 %v981_v54, %v593_v51  ;;  %v983_v58 = vpop.f32.mrb[21].mxu0  ;;  %v597_v59 = vpop.f32.mrb[22].mxu1  ;;  %vm1150_vm3 = vcmp.eq.f32.partialorder %v1985_v48, 0.0 }
 0x169   : > { %v1593_v60 = vpop.eup %1592  ;;  %v1429_v62 = vadd.f32 %v983_v58, %v595_v55  ;;  %v985_v63 = vpop.f32.mrb[22].mxu0  ;;  %1598 = vrsqrt.f32 %v1989_v53  ;;  %vm1155_vm4 = vcmp.eq.f32.partialorder %v1989_v53, inf  ;;  %v1158_v49 = vand.u32 2147483648, %v1989_v53 }
 0x16a   : > { %v599_v0 = vpop.f32.mrb[23].mxu1  ;;  %v1052_v2 = vmul.f32 %v1428_v56, %v1428_v56  ;;  %v1430_v3 = vadd.f32 %v985_v63, %v597_v59  ;;  %v987_v5 = vpop.f32.mrb[23].mxu0  ;;  %1207 = vxpose.xlu0.b32.cont [6/16] (narrow) %v1131_v1, 16  ;;  %v1133_v6 = vmul.f32 %v1593_v60, %v1969_v20  ;;  %vm1157_vm5 = vcmp.eq.f32.partialorder %v1989_v53, 0.0 }
 0x16b   : > { %v1595_v7 = vpop.eup %1594  ;;  %v1068_v8 = vmul.f32 %v1429_v62, %v1429_v62  ;;  %v1431_v9 = vadd.f32 %v987_v5, %v599_v0 }
 0x16c   : > { %v1053_v10 = vmul.f32 %v1430_v3, %v1430_v3  ;;  %v1135_v4 = vsel %vm1134_vm14, %v1969_v20, %v1133_v6  ;;  %v1140_v11 = vmul.f32 %v1595_v7, %v1973_v25 }
 0x16d   : > { %v2001_v12 = vadd.f32 %v1068_v8, %v1052_v2  ;;  %v1069_v13 = vmul.f32 %v1431_v9, %v1431_v9  ;;  %v1138_v14 = vsel %vm1136_vm15, %v1137_v61, %v1135_v4 }
 0x16e   : > { %1208 = vxpose.xlu0.b32.cont [7/16] (narrow) %v1138_v14, 16  ;;  %v603_v15 = vpop.f32.mrb[24].mxu1  ;;  %v1142_v16 = vsel %vm1141_vm0, %v1973_v25, %v1140_v11  ;;  %v1151_v25 = vand.u32 2147483648, %v1985_v48 }
 0x16f   : > { %v2005_v17 = vadd.f32 %v1069_v13, %v1053_v10  ;;  %v991_v18 = vpop.f32.mrb[24].mxu0  ;;  %v605_v19 = vpop.f32.mrb[25].mxu1  ;;  %1600 = vrsqrt.f32 %v2001_v12  ;;  %v1145_v29 = vsel %vm1143_vm1, %v1144_v21, %v1142_v16  ;;  %vm1162_vm6 = vcmp.eq.f32.partialorder %v2001_v12, inf }
 0x170   : > { %v1432_v20 = vadd.f32 %v991_v18, %v603_v15  ;;  %v993_v22 = vpop.f32.mrb[25].mxu0  ;;  %v607_v23 = vpop.f32.mrb[26].mxu1  ;;  %v1165_v2 = vand.u32 2147483648, %v2001_v12  ;;  %vm1164_vm7 = vcmp.eq.f32.partialorder %v2001_v12, 0.0 }
 0x171   : > { %v1597_v24 = vpop.eup %1596  ;;  %v1433_v26 = vadd.f32 %v993_v22, %v605_v19  ;;  %v995_v27 = vpop.f32.mrb[26].mxu0  ;;  %1602 = vrsqrt.f32 %v2005_v17  ;;  %vm1169_vm8 = vcmp.eq.f32.partialorder %v2005_v17, inf  ;;  %v1172_v10 = vand.u32 2147483648, %v2005_v17 }
 0x172   : > { %v609_v28 = vpop.f32.mrb[27].mxu1  ;;  %v1054_v30 = vmul.f32 %v1432_v20, %v1432_v20  ;;  %v1434_v31 = vadd.f32 %v995_v27, %v607_v23  ;;  %v997_v32 = vpop.f32.mrb[27].mxu0  ;;  %1209 = vxpose.xlu0.b32.cont [8/16] (narrow) %v1145_v29, 16  ;;  %v1147_v33 = vmul.f32 %v1597_v24, %v1985_v48  ;;  %vm1171_vm9 = vcmp.eq.f32.partialorder %v2005_v17, 0.0 }
 0x173   : > { %v1599_v34 = vpop.eup %1598  ;;  %v1070_v36 = vmul.f32 %v1433_v26, %v1433_v26  ;;  %v1435_v37 = vadd.f32 %v997_v32, %v609_v28 }
 0x174   : > { %v1055_v38 = vmul.f32 %v1434_v31, %v1434_v31  ;;  %v1149_v39 = vsel %vm1148_vm2, %v1985_v48, %v1147_v33  ;;  %v1154_v40 = vmul.f32 %v1599_v34, %v1989_v53 }
 0x175   : > { %v1086_v41 = vadd.f32 %v1070_v36, %v1054_v30  ;;  %v1071_v42 = vmul.f32 %v1435_v37, %v1435_v37  ;;  %v1152_v43 = vsel %vm1150_vm3, %v1151_v25, %v1149_v39 }
 0x176   : > { %1210 = vxpose.xlu0.b32.cont [9/16] (narrow) %v1152_v43, 16  ;;  %v613_v44 = vpop.f32.mrb[28].mxu1  ;;  %v1156_v35 = vsel %vm1155_vm4, %v1989_v53, %v1154_v40 }
 0x177   : > { %v1087_v45 = vadd.f32 %v1071_v42, %v1055_v38  ;;  %v1001_v46 = vpop.f32.mrb[28].mxu0  ;;  %v615_v47 = vpop.f32.mrb[29].mxu1  ;;  %1604 = vrsqrt.f32 %v1086_v41  ;;  %v1159_v56 = vsel %vm1157_vm5, %v1158_v49, %v1156_v35  ;;  %vm1176_vm10 = vcmp.eq.f32.partialorder %v1086_v41, inf }
 0x178   : > { %v1436_v50 = vadd.f32 %v1001_v46, %v613_v44  ;;  %v1003_v51 = vpop.f32.mrb[29].mxu0  ;;  %v617_v48 = vpop.f32.mrb[30].mxu1  ;;  %v1179_v14 = vand.u32 2147483648, %v1086_v41  ;;  %vm1178_vm11 = vcmp.eq.f32.partialorder %v1086_v41, 0.0 }
 0x179   : > { %v1601_v52 = vpop.eup %1600  ;;  %v1437_v54 = vadd.f32 %v1003_v51, %v615_v47  ;;  %v1005_v55 = vpop.f32.mrb[30].mxu0  ;;  %1606 = vrsqrt.f32 %v1087_v45  ;;  %vm1183_vm12 = vcmp.eq.f32.partialorder %v1087_v45, inf  ;;  %v1186_v21 = vand.u32 2147483648, %v1087_v45 }
 0x17a   : > { %v619_v57 = vpop.f32.mrb[31].mxu1  ;;  %v1056_v58 = vmul.f32 %v1436_v50, %v1436_v50  ;;  %v1438_v59 = vadd.f32 %v1005_v55, %v617_v48  ;;  %v1007_v60 = vpop.f32.mrb[31].mxu0  ;;  %1211 = vxpose.xlu0.b32.cont [10/16] (narrow) %v1159_v56, 16  ;;  %v1161_v62 = vmul.f32 %v1601_v52, %v2001_v12  ;;  %vm1185_vm13 = vcmp.eq.f32.partialorder %v1087_v45, 0.0 }
 0x17b   : > { %v1603_v63 = vpop.eup %1602  ;;  %v1072_v0 = vmul.f32 %v1437_v54, %v1437_v54  ;;  %v1439_v1 = vadd.f32 %v1007_v60, %v619_v57 }
 0x17c   : > { %v1057_v53 = vmul.f32 %v1438_v59, %v1438_v59  ;;  %v1163_v3 = vsel %vm1162_vm6, %v2001_v12, %v1161_v62  ;;  %v1168_v5 = vmul.f32 %v1603_v63, %v2005_v17 }
 0x17d   : > { %v1088_v6 = vadd.f32 %v1072_v0, %v1056_v58  ;;  %v1073_v7 = vmul.f32 %v1439_v1, %v1439_v1  ;;  %v1166_v8 = vsel %vm1164_vm7, %v1165_v2, %v1163_v3 }
 0x17e   : > { %1212 = vxpose.xlu0.b32.cont [11/16] (narrow) %v1166_v8, 16  ;;  %v1170_v9 = vsel %vm1169_vm8, %v2005_v17, %v1168_v5 }
 0x17f   : > { %v1089_v61 = vadd.f32 %v1073_v7, %v1057_v53  ;;  %1608 = vrsqrt.f32 %v1088_v6  ;;  %v1173_v11 = vsel %vm1171_vm9, %v1172_v10, %v1170_v9  ;;  %vm1190_vm14 = vcmp.eq.f32.partialorder %v1088_v6, inf }
 0x180   : > { %v1193_v24 = vand.u32 2147483648, %v1088_v6  ;;  %vm1192_vm15 = vcmp.eq.f32.partialorder %v1088_v6, 0.0 }
 0x181   : > { %v1605_v4 = vpop.eup %1604  ;;  %1610 = vrsqrt.f32 %v1089_v61  ;;  %vm1197_vm0 = vcmp.eq.f32.partialorder %v1089_v61, inf  ;;  %v1200_v30 = vand.u32 2147483648, %v1089_v61  ;;  %vm1199_vm1 = vcmp.eq.f32.partialorder %v1089_v61, 0.0 }
 0x182   : > { %1213 = vxpose.xlu0.b32.cont [12/16] (narrow) %v1173_v11, 16  ;;  %v1175_v12 = vmul.f32 %v1605_v4, %v1086_v41 }
 0x183   : > { %v1607_v13 = vpop.eup %1606 }
 0x184   : > { %v1177_v15 = vsel %vm1176_vm10, %v1086_v41, %v1175_v12  ;;  %v1182_v16 = vmul.f32 %v1607_v13, %v1087_v45 }
 0x185   : > { %v1180_v18 = vsel %vm1178_vm11, %v1179_v14, %v1177_v15 }
 0x186   : > { %1214 = vxpose.xlu0.b32.cont [13/16] (narrow) %v1180_v18, 16  ;;  %v1184_v19 = vsel %vm1183_vm12, %v1087_v45, %v1182_v16 }
 0x187   : > { %v1187_v22 = vsel %vm1185_vm13, %v1186_v21, %v1184_v19 }
 0x189   : > { %v1609_v20 = vpop.eup %1608 }
 0x18a   : > { %1215 = vxpose.xlu0.b32.cont [14/16] (narrow) %v1187_v22, 16  ;;  %v1189_v17 = vmul.f32 %v1609_v20, %v1088_v6 }
 0x18b   : > { %v1611_v23 = vpop.eup %1610 }
 0x18c   : > { %v1191_v26 = vsel %vm1190_vm14, %v1088_v6, %v1189_v17  ;;  %v1196_v27 = vmul.f32 %v1611_v23, %v1089_v61 }
 0x18d   : > { %v1194_v28 = vsel %vm1192_vm15, %v1193_v24, %v1191_v26 }
 0x18e   : > { %1216 = vxpose.xlu0.b32.cont [15/16] (narrow) %v1194_v28, 16  ;;  %v1198_v29 = vsel %vm1197_vm0, %v1089_v61, %v1196_v27 }
 0x18f   : > { %v1201_v31 = vsel %vm1199_vm1, %v1200_v30, %v1198_v29 }
 0x192   : > { %1217 = vxpose.xlu0.b32.end [16/16] (narrow) %v1201_v31, 16 }
 0x1d6   : > { %v1218_v32 = vpop.trf.xlu0 }
 0x1d7   : > { %1234 = vst [vmem:[%s211_s29] sm:$0xff] %v1218_v32 }
 0x1da   : > { %v1219_v33 = vpop.trf.xlu0 }
 0x1db   : > { %1235 = vst [vmem:[%s211_s29 + $0x8] sm:$0xff] %v1219_v33 }
 0x1dc   : > { %1625 = shalt.err (!%p1622_p9)
}
 0x1dd   : > { %s1626_s20 = scalar_lea.hbm %s2039_s8, 256  ;;  %s1630_s27 = scalar_lea.hbm %s2096_s3, 1024 }
 0x1de   : > { %p1627_p10 = scmp.ne.s32.totalorder %s2039_s8, %s1626_s20  ;;  %p1631_p13 = scmp.lt.u32.totalorder %s2039_s8, %s2096_s3 }
 0x1df   : > { %p1632_p0 = scmp.lt.u32.totalorder %s1630_s27, %s1626_s20  ;;  %p1634_p2 = scmp.lt.u32.totalorder %s1626_s20, %s2039_s8 }
 0x1e0   : > { %p1628_p11 = pnand %p1627_p10, %p1784_p3 }
 0x1e1   : > { %p1633_p1 = por %p1632_p0, %p1631_p13 }
 0x1e2   : > { %p1629_p12 = pneg %p1628_p11 }
 0x1e3   : > { %p1635_p4 = por %p1634_p2, %p1633_p1 }
 0x1e5   : > { %p1636_p5 = pnand %p1635_p4, %p1629_p12 }
 0x1e7   : > { %1639 = shalt.err (!%p1636_p5)
}
 0x1e8   : > { %s1710_s5 = smov 128   ;;  %s1711_s6 = smov 256  }
 0x1e9   : > { %s1712_s7 = smov 8  }
 0x1ea   : > { %1505 = dma.vmem_to_hbm [thread:$0]  (%p1784_p3), %s2034_s4, 256, %s2039_s8, %s2041_s16, %s1710_s5, %s1711_s6, %s1712_s7  }
 0x1eb PF: > { %p1511_p6 = scmp.ge.s32.totalorder %s1706_s19, 2  ;;  %s1266_s15 = sand.u32 1, %s1678_s12  }
 0x1ec   : > { %s1267_s9 = scalar_lea.sflag [#allocation4], %s1266_s15 }
 0x1ed   : > { %p1508_p7 = pnand %p1511_p6, %p1793_p8 }
 0x1ef   : > { %1673 = dma.done.wait (!%p1508_p7), %s1267_s9, 256  }
 0x1f0   : > { %1675 = vsyncadd (!%p1508_p7), %s1267_s9, 4294967040  ;;  %s16_s19 = sadd.s32 1, %s1706_s19   ;;  %s2099_s12 = smov %s1682_s13 }
 0x1f1   : > { %p13_p9 = scmp.ge.s32.totalorder %s16_s19, 6   ;;  %s2100_s13 = smov %s1686_s14 }
 0x1f2   : > { %s2101_s14 = smov %s1802_s30  ;;  %s2102_s15 = smov %s1698_s17 }
 0x1f3   : > { %s2103_s16 = smov %s1702_s18  ;;  %s2104_s17 = smov %s2107_s22 }
 0x1f4   : > { %s2105_s18 = smov %s2111_s23  ;;  %15 = sbr.rel (!%p13_p9) target bundleno = 5 (0x5), region = 73 }
 0x1fb   :  { %1272 = vsyncpa [#allocation4], 1 }
 0x1fc   :  { %1274 = vsyncpa [#allocation4 + $0x1], 1 }

// kernel: tpu_custom_call.1
= control target key start
LH: loop header
LB: loop body
LE: loop exit
PB: predicated region body
PF: predicated region fallthrough
CT: control target
= control target key end

     0   :  { %8 = vsyncpa [#allocation4], 0  ;;  %s2093_s0 = inlined_call_operand.vmem [shape: f32[2,384,4], index: 0, kind: input, shape index: {}]   ;;  %s2094_s1 = inlined_call_operand.vmem [shape: f32[2,2,8,4], index: 1, kind: input, shape index: {}]   ;;  %s2095_s2 = inlined_call_operand.vmem [shape: bf16[4,4,256], index: 2, kind: input, shape index: {}]   ;;  %s2096_s3 = inlined_call_operand.hbm [shape: f32[2,16,256], index: 3, kind: output, shape index: {}]  }
   0x1   :  { %10 = vsyncpa [#allocation4 + $0x1], 0  ;;  %s1733_s12 = smov 0   ;;  %s1735_s13 = smov 0  }
   0x2   :  { %s1737_s14 = smov 0   ;;  %s1739_s15 = smov 0  }
   0x3   :  { %s1741_s16 = smov 0   ;;  %s1743_s17 = smov 0  }
   0x4   :  { %s1745_s18 = smov 0   ;;  %s1747_s19 = smov 0  }
   0x5 LB: > { %s1350_s20 = sadd.s32 4294967295, %s1706_s19   ;;  %s1351_s21 = sadd.s32 4294967294, %s1706_s19   ;;  %s1706_s19 = sphi %s1747_s19, %s16_s19   ;;  %s1702_s18 = sphi %s1745_s18, %s2105_s18   ;;  %s1698_s17 = sphi %s1743_s17, %s2104_s17   ;;  %s1694_s16 = sphi %s1741_s16, %s2103_s16   ;;  %s1690_s15 = sphi %s1739_s15, %s2102_s15   ;;  %s1686_s14 = sphi %s1737_s14, %s2101_s14   ;;  %s1682_s13 = sphi %s1735_s13, %s2100_s13   ;;  %s1678_s12 = sphi %s1733_s12, %s2099_s12  }
   0x6   : > { %s25_s22 = sadd.s32 1, %s1698_s17  ;;  %s28_s23 = sadd.s32 1, %s1702_s18 }
   0x7   : > { %p26_p0 = scmp.ge.s32.totalorder %s25_s22, 2  ;;  %p124_p1 = scmp.ne.s32.totalorder %s1686_s14, %s1682_s13 }
   0x8   : > { %p125_p2 = scmp.eq.s32.totalorder %s1350_s20, 3  ;;  %p130_p5 = scmp.ne.s32.totalorder %s1682_s13, %s1678_s12 }
   0x9   : > { %s2107_s22 = smov (%p26_p0, %s25_s22), 0  ;;  %s2109_s23 = smov (!%p26_p0, %s28_s23), %s1702_s18 }
   0xa   : > { %s110_s24 = ssub.s32 %s1698_s17, %s2107_s22  ;;  %p1784_p3 = por %p125_p2, %p124_p1 }
   0xb   : > { %p30_p4 = scmp.ge.s32.totalorder %s2109_s23, 2  ;;  %p131_p6 = scmp.eq.s32.totalorder %s1351_s21, 3 }
   0xc   : > { %p1354_p7 = scmp.ge.s32.totalorder %s1706_s19, 1  ;;  %p176_p9 = scmp.lt.s32.totalorder %s1706_s19, 5 }
   0xd   : > { %s2111_s23 = smov (%p30_p4, %s2109_s23), 0  ;;  %p1793_p8 = por %p131_p6, %p130_p5 }
   0xe   : > { %s109_s27 = ssub.s32 %s1702_s18, %s2111_s23  ;;  %s114_s28 = sadd.s32 1, %s1686_s14 }
   0xf   : > { %s111_s29 = sor.u32 %s110_s24, %s109_s27  ;;  %p177_p10 = pnand %p1354_p7, %p176_p9 }
  0x10   : > { %p112_p11 = scmp.eq.s32.totalorder %s111_s29, 0  ;;  %v1361_v0 = vld.sshfl [vmem:[%s2095_s2 + $0x4] sm:$0x33 pattern:$0x76325410] (!%p177_p10)  ;;  %vm350_vm0 = vcmask (!%p177_p10), 1041408  }
  0x11   : > { %180 = sbr.rel (%p177_p10) target bundleno = 491 (0x1eb), region = 32  ;;  %v325_v1 = vcombine.high (!%p177_p10), %v1361_v0, %v1361_v0  ;;  %v1382_v2 = vld.sshfl [vmem:[%s2095_s2 + $0x8] sm:$0x33 pattern:$0x76325410] (!%p177_p10)  ;;  %v352_v3 = vsel (!%p177_p10), %vm350_vm0, %v1361_v0, 0 }
  0x12   : > { %s1802_s30 = scalar_select %p112_p11, %s1686_s14, %s114_s28  }
  0x13   : > { %v1708_v4 = vmov (!%p177_p10), 0   ;;  %s1356_s8 = sshll.u32 (!%p177_p10), %s1690_s15, 4  ;;  %v656_v5 = vcombine.high (!%p177_p10), %v1382_v2, %v1382_v2  ;;  %v682_v6 = vsel (!%p177_p10), %vm350_vm0, %v1382_v2, 0  ;;  %p213_p12 = scmp.lt.s32.totalorder (!%p177_p10), %s1694_s16, 1  ;;  %1362 = vmatprep.subr.msk.bf16.mxu1 (!%p177_p10), %vm350_vm0, %v325_v1  ;;  %vm247_vm1 = vcmask (!%p177_p10), 31744  }
  0x14   : > { %389 = vmatprep.mubr.bf16.mxu1 (!%p177_p10), %v1708_v4  ;;  %719 = vmatprep.mubr.bf16.mxu0 (!%p177_p10), %v1708_v4  ;;  %v1818_v7 = vld.sshfl [vmem:[%s2095_s2] sm:$0x33 pattern:$0x76325410] (!%p177_p10)  ;;  %p215_p13 = scmp.lt.s32.totalorder (!%p177_p10), %s1356_s8, 47  ;;  %p224_p0 = scmp.lt.s32.totalorder (!%p177_p10), %s1690_s15, 1 }
  0x15   : > { %v478_v8 = vcombine.high (!%p177_p10), %v1818_v7, %v1818_v7  ;;  %v1393_v9 = vld.sshfl [vmem:[%s2095_s2 + $0xc] sm:$0x33 pattern:$0x76325410] (!%p177_p10)  ;;  %1383 = vmatprep.subr.msk.bf16.mxu0 (!%p177_p10), %vm350_vm0, %v656_v5  ;;  %358 = vmatpush1.bf16.msra.mxu1 (!%p177_p10), %v352_v3  ;;  %v504_v32 = vsel (!%p177_p10), %vm350_vm0, %v1818_v7, 0 }
  0x16   : > { %v866_v10 = vcombine.high (!%p177_p10), %v1393_v9, %v1393_v9  ;;  %688 = vmatpush1.bf16.msra.mxu0 (!%p177_p10), %v682_v6  ;;  %v892_v35 = vsel (!%p177_p10), %vm350_vm0, %v1393_v9, 0 }
  0x17   : > { %1372 = vmatprep.subr.msk.bf16.mxu1 (!%p177_p10), %vm350_vm0, %v478_v8 }
  0x18   : > { %s1829_s21 = scalar_select %p213_p12, %s1694_s16, 1  ;;  %1394 = vmatprep.subr.msk.bf16.mxu0 %vm350_vm0, %v866_v10 }
  0x19   : > { %s2113_s8 = smov (!%p215_p13, %s1356_s8), 47 }
  0x1a   : > { %s1504_s24 = smul.u32 48, %s1829_s21  ;;  %s1358_s6 = sshll.u32 %s1829_s21, 1 }
  0x1b   : > { %s225_s7 = scalar_select %p224_p0, %s1690_s15, 1 }
  0x1c   : > { %s218_s27 = sadd.s32 %s1504_s24, %s2113_s8  ;;  %s209_s21 = sand.u32 1, %s1682_s13  }
  0x1d   : > { %s1357_s28 = sshll.u32 %s218_s27, 3  ;;  %s227_s8 = sadd.s32 %s1358_s6, %s225_s7 }
  0x1e   : > { %s1838_s5 = scalar_lea.vmem %s2093_s0, %s1357_s28  ;;  %s1359_s9 = sshll.u32 %s227_s8, 3 }
  0x1f   : > { %v231_v11 = vld [vmem:[%s1838_s5] sm:$0xff]  ;;  %v232_v12 = vld [vmem:[%s1838_s5 + $0x8] sm:$0xff]  ;;  %v233_v13 = vld [vmem:[%s1838_s5 + $0x10] sm:$0xff]  ;;  %s229_s20 = scalar_lea.vmem %s2094_s1, %s1359_s9  ;;  %s1404_s24 = sshll.u32 %s1694_s16, 2 }
  0x20   : > { %248 = vst.msk [vmem:[#allocation2] sm:$0xff] %vm247_vm1, %v231_v11  ;;  %249 = vst.msk [vmem:[#allocation2 + $0x8] sm:$0xff] %vm247_vm1, %v232_v12  ;;  %v234_v14 = vld [vmem:[%s1838_s5 + $0x18] sm:$0xff]  ;;  %v235_v15 = vld [vmem:[%s1838_s5 + $0x20] sm:$0xff]  ;;  %s1355_s27 = sshll.u32 %s209_s21, 4  ;;  %s1248_s28 = sadd.s32 %s1690_s15, %s1404_s24 }
  0x21   : > { %250 = vst.msk [vmem:[#allocation2 + $0x10] sm:$0xff] %vm247_vm1, %v233_v13  ;;  %v236_v16 = vld [vmem:[%s1838_s5 + $0x28] sm:$0xff]  ;;  %251 = vst.msk [vmem:[#allocation2 + $0x18] sm:$0xff] %vm247_vm1, %v234_v14  ;;  %v237_v17 = vld [vmem:[%s1838_s5 + $0x30] sm:$0xff]  ;;  %s211_s29 = scalar_lea.vmem [#allocation3], %s1355_s27  ;;  %s2041_s16 = scalar_lea.sflag [#allocation4], %s209_s21 }
  0x22   : > { %252 = vst.msk [vmem:[#allocation2 + $0x20] sm:$0xff] %vm247_vm1, %v235_v15  ;;  %253 = vst.msk [vmem:[#allocation2 + $0x28] sm:$0xff] %vm247_vm1, %v236_v16  ;;  %v238_v18 = vld [vmem:[%s1838_s5 + $0x38] sm:$0xff]  ;;  %v239_v19 = vld [vmem:[%s1838_s5 + $0x40] sm:$0xff]  ;;  %s1251_s4 = sshll.u32 %s211_s29, 4  ;;  %s1709_s9 = smov [#allocation3]   ;;  %s2034_s4 = int_to_ptr.vmem [resolvable:$true] %s1251_s4 }
  0x23   : > { %254 = vst.msk [vmem:[#allocation2 + $0x30] sm:$0xff] %vm247_vm1, %v237_v17  ;;  %255 = vst.msk [vmem:[#allocation2 + $0x38] sm:$0xff] %vm247_vm1, %v238_v18  ;;  %v240_v20 = vld [vmem:[%s1838_s5 + $0x48] sm:$0xff]  ;;  %v241_v21 = vld [vmem:[%s1838_s5 + $0x50] sm:$0xff]  ;;  %s1612_s15 = scalar_lea.vmem %s2034_s4, 256  ;;  %s1616_s10 = sshll.u32 %s1709_s9, 4  ;;  %s1617_s10 = int_to_ptr.vmem [resolvable:$false] %s1616_s10 }
  0x24   : > { %256 = vst.msk [vmem:[#allocation2 + $0x40] sm:$0xff] %vm247_vm1, %v239_v19  ;;  %v242_v22 = vld [vmem:[%s1838_s5 + $0x58] sm:$0xff]  ;;  %257 = vst.msk [vmem:[#allocation2 + $0x48] sm:$0xff] %vm247_vm1, %v240_v20  ;;  %v243_v23 = vld [vmem:[%s1838_s5 + $0x60] sm:$0xff]  ;;  %p1613_p1 = scmp.ne.s32.totalorder %s2034_s4, %s1612_s15  ;;  %s1618_s11 = scalar_lea.vmem %s1617_s10, 512 }
  0x25   : > { %258 = vst.msk [vmem:[#allocation2 + $0x50] sm:$0xff] %vm247_vm1, %v241_v21  ;;  %259 = vst.msk [vmem:[#allocation2 + $0x58] sm:$0xff] %vm247_vm1, %v242_v22  ;;  %v244_v24 = vld [vmem:[%s1838_s5 + $0x68] sm:$0xff]  ;;  %v245_v25 = vld [vmem:[%s1838_s5 + $0x70] sm:$0xff]  ;;  %p1619_p5 = scmp.lt.s32.totalorder %s2034_s4, %s1617_s10  ;;  %p1620_p6 = scmp.lt.s32.totalorder %s1618_s11, %s1612_s15 }
  0x26   : > { %260 = vst.msk [vmem:[#allocation2 + $0x60] sm:$0xff] %vm247_vm1, %v243_v23  ;;  %261 = vst.msk [vmem:[#allocation2 + $0x68] sm:$0xff] %vm247_vm1, %v244_v24  ;;  %v246_v26 = vld [vmem:[%s1838_s5 + $0x78] sm:$0xff]  ;;  %v264_v27 = vld [vmem:[%s229_s20] sm:$0xff]  ;;  %s1405_s5 = sshll.u32 %s1248_s28, 7  ;;  %p1614_p2 = pnand %p1613_p1, %p1784_p3 }
  0x27   : > { %262 = vst.msk [vmem:[#allocation2 + $0x70] sm:$0xff] %vm247_vm1, %v245_v25  ;;  %263 = vst.msk [vmem:[#allocation2 + $0x78] sm:$0xff] %vm247_vm1, %v246_v26  ;;  %v291_v28 = vld [vmem:[#allocation2 + $0x1] sm:$0xff]  ;;  %s2039_s8 = scalar_lea.hbm %s2096_s3, %s1405_s5  ;;  %p1621_p7 = por %p1620_p6, %p1619_p5 }
  0x28   : > { %265 = vst.msk [vmem:[#allocation2 + $0x80] sm:$0xff] %vm247_vm1, %v264_v27  ;;  %v292_v29 = vld [vmem:[#allocation2 + $0x9] sm:$0xff]  ;;  %v293_v36 = vld [vmem:[#allocation2 + $0x11] sm:$0xff]  ;;  %v266_v15 = vld [vmem:[#allocation2] sm:$0xff]  ;;  %p1615_p4 = pneg %p1614_p2 }
  0x29   : > { %v622_v30 = vld [vmem:[#allocation2 + $0x2] sm:$0xff]  ;;  %v307_v31 = vpack.c.bf16 %v292_v29, %v291_v28  ;;  %v623_v33 = vld [vmem:[#allocation2 + $0xa] sm:$0xff]  ;;  %v294_v37 = vld [vmem:[#allocation2 + $0x19] sm:$0xff] }
  0x2a   : > { %v638_v34 = vpack.c.bf16 %v623_v33, %v622_v30  ;;  %v624_v38 = vld [vmem:[#allocation2 + $0x12] sm:$0xff]  ;;  %v625_v39 = vld [vmem:[#allocation2 + $0x1a] sm:$0xff]  ;;  %v308_v40 = vpack.c.bf16 %v294_v37, %v293_v36  ;;  %v296_v43 = vld [vmem:[#allocation2 + $0x29] sm:$0xff]  ;;  %p1622_p9 = pnand %p1621_p7, %p1615_p4 }
  0x2b   : > { %1363 = vmatmul.mubr.msk.bf16.vlgmr.msra.gmra.mrb[0].mxu1 %vm247_vm1, %v307_v31  ;;  %v639_v41 = vpack.c.bf16 %v625_v39, %v624_v38  ;;  %v295_v42 = vld [vmem:[#allocation2 + $0x21] sm:$0xff]  ;;  %v627_v45 = vld [vmem:[#allocation2 + $0x2a] sm:$0xff]  ;;  %v298_v49 = vld [vmem:[#allocation2 + $0x39] sm:$0xff] }
  0x2c   : > { %510 = vmatpush1.bf16.msra.mxu1 %v504_v32  ;;  %1384 = vmatmul.mubr.msk.bf16.vlgmr.msra.gmra.mrb[0].mxu0 %vm247_vm1, %v638_v34  ;;  %v626_v44 = vld [vmem:[#allocation2 + $0x22] sm:$0xff]  ;;  %v309_v46 = vpack.c.bf16 %v296_v43, %v295_v42  ;;  %v297_v48 = vld [vmem:[#allocation2 + $0x31] sm:$0xff]  ;;  %v629_v51 = vld [vmem:[#allocation2 + $0x3a] sm:$0xff] }
  0x2d   : > { %898 = vmatpush1.bf16.msra.mxu0 %v892_v35  ;;  %399 = vmatprep.mubr.bf16.mxu1 %v1708_v4  ;;  %v640_v47 = vpack.c.bf16 %v627_v45, %v626_v44  ;;  %v628_v50 = vld [vmem:[#allocation2 + $0x32] sm:$0xff]  ;;  %v310_v52 = vpack.c.bf16 %v298_v49, %v297_v48  ;;  %v299_v54 = vld [vmem:[#allocation2 + $0x41] sm:$0xff]  ;;  %v300_v55 = vld [vmem:[#allocation2 + $0x49] sm:$0xff] }
  0x2e   : > { %729 = vmatprep.mubr.bf16.mxu0 %v1708_v4  ;;  %v641_v53 = vpack.c.bf16 %v629_v51, %v628_v50  ;;  %v630_v56 = vld [vmem:[#allocation2 + $0x42] sm:$0xff]  ;;  %v631_v57 = vld [vmem:[#allocation2 + $0x4a] sm:$0xff]  ;;  %v311_v58 = vpack.c.bf16 %v300_v55, %v299_v54  ;;  %v302_v61 = vld [vmem:[#allocation2 + $0x59] sm:$0xff] }
  0x2f   : > { %v642_v59 = vpack.c.bf16 %v631_v57, %v630_v56  ;;  %v301_v60 = vld [vmem:[#allocation2 + $0x51] sm:$0xff]  ;;  %v633_v63 = vld [vmem:[#allocation2 + $0x5a] sm:$0xff]  ;;  %v304_v3 = vld [vmem:[#allocation2 + $0x69] sm:$0xff] }
  0x30   : > { %v632_v62 = vld [vmem:[#allocation2 + $0x52] sm:$0xff]  ;;  %v312_v0 = vpack.c.bf16 %v302_v61, %v301_v60  ;;  %v303_v2 = vld [vmem:[#allocation2 + $0x61] sm:$0xff]  ;;  %v635_v6 = vld [vmem:[#allocation2 + $0x6a] sm:$0xff] }
  0x31   : > { %v643_v1 = vpack.c.bf16 %v633_v63, %v632_v62  ;;  %v634_v5 = vld [vmem:[#allocation2 + $0x62] sm:$0xff]  ;;  %v313_v7 = vpack.c.bf16 %v304_v3, %v303_v2  ;;  %v305_v9 = vld [vmem:[#allocation2 + $0x71] sm:$0xff]  ;;  %v306_v10 = vld [vmem:[#allocation2 + $0x79] sm:$0xff] }
  0x32   : > { %v644_v8 = vpack.c.bf16 %v635_v6, %v634_v5  ;;  %v636_v11 = vld [vmem:[#allocation2 + $0x72] sm:$0xff]  ;;  %v637_v12 = vld [vmem:[#allocation2 + $0x7a] sm:$0xff]  ;;  %v314_v13 = vpack.c.bf16 %v306_v10, %v305_v9  ;;  %v267_v16 = vld [vmem:[#allocation2 + $0x8] sm:$0xff] }
  0x33   : > { %1364 = vmatmul.mubr.msk.bf16.gmra.mrb[4].mxu1 %vm247_vm1, %v308_v40  ;;  %v645_v14 = vpack.c.bf16 %v637_v12, %v636_v11  ;;  %v832_v17 = vld [vmem:[#allocation2 + $0x3] sm:$0xff]  ;;  %v833_v18 = vld [vmem:[#allocation2 + $0xb] sm:$0xff]  ;;  %v282_v19 = vpack.c.bf16 %v267_v16, %v266_v15  ;;  %v269_v22 = vld [vmem:[#allocation2 + $0x18] sm:$0xff] }
  0x34   : > { %1385 = vmatmul.mubr.msk.bf16.gmra.mrb[4].mxu0 %vm247_vm1, %v639_v41  ;;  %409 = vmatprep.mubr.bf16.mxu1 %v1708_v4  ;;  %v848_v20 = vpack.c.bf16 %v833_v18, %v832_v17  ;;  %v268_v21 = vld [vmem:[#allocation2 + $0x10] sm:$0xff]  ;;  %v835_v24 = vld [vmem:[#allocation2 + $0x1b] sm:$0xff]  ;;  %v271_v28 = vld [vmem:[#allocation2 + $0x28] sm:$0xff] }
  0x35   : > { %739 = vmatprep.mubr.bf16.mxu0 %v1708_v4  ;;  %v834_v23 = vld [vmem:[#allocation2 + $0x13] sm:$0xff]  ;;  %v283_v25 = vpack.c.bf16 %v269_v22, %v268_v21  ;;  %v270_v27 = vld [vmem:[#allocation2 + $0x20] sm:$0xff]  ;;  %v837_v30 = vld [vmem:[#allocation2 + $0x2b] sm:$0xff] }
  0x36   : > { %v849_v26 = vpack.c.bf16 %v835_v24, %v834_v23  ;;  %v836_v29 = vld [vmem:[#allocation2 + $0x23] sm:$0xff]  ;;  %v284_v31 = vpack.c.bf16 %v271_v28, %v270_v27  ;;  %v272_v33 = vld [vmem:[#allocation2 + $0x30] sm:$0xff]  ;;  %v273_v34 = vld [vmem:[#allocation2 + $0x38] sm:$0xff] }
  0x37   : > { %v850_v32 = vpack.c.bf16 %v837_v30, %v836_v29  ;;  %v838_v35 = vld [vmem:[#allocation2 + $0x33] sm:$0xff]  ;;  %v839_v36 = vld [vmem:[#allocation2 + $0x3b] sm:$0xff]  ;;  %v285_v37 = vpack.c.bf16 %v273_v34, %v272_v33  ;;  %v275_v40 = vld [vmem:[#allocation2 + $0x48] sm:$0xff] }
  0x38   : > { %v851_v38 = vpack.c.bf16 %v839_v36, %v838_v35  ;;  %v274_v39 = vld [vmem:[#allocation2 + $0x40] sm:$0xff]  ;;  %v841_v42 = vld [vmem:[#allocation2 + $0x4b] sm:$0xff] }
  0x39   : > { %v840_v41 = vld [vmem:[#allocation2 + $0x43] sm:$0xff]  ;;  %v286_v43 = vpack.c.bf16 %v275_v40, %v274_v39  ;;  %v276_v45 = vld [vmem:[#allocation2 + $0x50] sm:$0xff]  ;;  %v843_v48 = vld [vmem:[#allocation2 + $0x5b] sm:$0xff] }
  0x3a   : > { %v852_v44 = vpack.c.bf16 %v841_v42, %v840_v41  ;;  %v278_v51 = vld [vmem:[#allocation2 + $0x60] sm:$0xff]  ;;  %v845_v54 = vld [vmem:[#allocation2 + $0x6b] sm:$0xff] }
  0x3b   : > { %1365 = vmatmul.mubr.msk.bf16.gmra.mrb[8].mxu1 %vm247_vm1, %v309_v46  ;;  %v277_v46 = vld [vmem:[#allocation2 + $0x58] sm:$0xff]  ;;  %v280_v57 = vld [vmem:[#allocation2 + $0x70] sm:$0xff] }
  0x3c   : > { %1386 = vmatmul.mubr.msk.bf16.gmra.mrb[8].mxu0 %vm247_vm1, %v640_v47  ;;  %419 = vmatprep.mubr.bf16.mxu1 %v1708_v4  ;;  %v842_v47 = vld [vmem:[#allocation2 + $0x53] sm:$0xff]  ;;  %v287_v49 = vpack.c.bf16 %v277_v46, %v276_v45  ;;  %v847_v60 = vld [vmem:[#allocation2 + $0x7b] sm:$0xff] }
  0x3d   : > { %749 = vmatprep.mubr.bf16.mxu0 %v1708_v4  ;;  %v853_v50 = vpack.c.bf16 %v843_v48, %v842_v47 }
  0x43   : > { %1366 = vmatmul.mubr.msk.bf16.gmra.mrb[12].mxu1 %vm247_vm1, %v310_v52  ;;  %v279_v52 = vld [vmem:[#allocation2 + $0x68] sm:$0xff] }
  0x44   : > { %1387 = vmatmul.mubr.msk.bf16.gmra.mrb[12].mxu0 %vm247_vm1, %v641_v53  ;;  %429 = vmatprep.mubr.bf16.mxu1 %v1708_v4  ;;  %v844_v53 = vld [vmem:[#allocation2 + $0x63] sm:$0xff]  ;;  %v288_v55 = vpack.c.bf16 %v279_v52, %v278_v51 }
  0x45   : > { %759 = vmatprep.mubr.bf16.mxu0 %v1708_v4  ;;  %v854_v56 = vpack.c.bf16 %v845_v54, %v844_v53 }
  0x4b   : > { %1367 = vmatmul.mubr.msk.bf16.gmra.mrb[16].mxu1 %vm247_vm1, %v311_v58  ;;  %v281_v58 = vld [vmem:[#allocation2 + $0x78] sm:$0xff] }
  0x4c   : > { %1388 = vmatmul.mubr.msk.bf16.gmra.mrb[16].mxu0 %vm247_vm1, %v642_v59  ;;  %439 = vmatprep.mubr.bf16.mxu1 %v1708_v4  ;;  %v846_v59 = vld [vmem:[#allocation2 + $0x73] sm:$0xff]  ;;  %v289_v61 = vpack.c.bf16 %v281_v58, %v280_v57 }
  0x4d   : > { %769 = vmatprep.mubr.bf16.mxu0 %v1708_v4  ;;  %v855_v62 = vpack.c.bf16 %v847_v60, %v846_v59 }
  0x53   : > { %1368 = vmatmul.mubr.msk.bf16.gmra.mrb[20].mxu1 %vm247_vm1, %v312_v0 }
  0x54   : > { %1389 = vmatmul.mubr.msk.bf16.gmra.mrb[20].mxu0 %vm247_vm1, %v643_v1  ;;  %449 = vmatprep.mubr.bf16.mxu1 %v1708_v4 }
  0x55   : > { %779 = vmatprep.mubr.bf16.mxu0 %v1708_v4 }
  0x5b   : > { %1369 = vmatmul.mubr.msk.bf16.gmra.mrb[24].mxu1 %vm247_vm1, %v313_v7 }
  0x5c   : > { %1390 = vmatmul.mubr.msk.bf16.gmra.mrb[24].mxu0 %vm247_vm1, %v644_v8  ;;  %459 = vmatprep.mubr.bf16.mxu1 %v1708_v4 }
  0x5d   : > { %789 = vmatprep.mubr.bf16.mxu0 %v1708_v4 }
  0x63   : > { %1370 = vmatmul.mubr.msk.bf16.gmra.mrb[28].mxu1 %vm247_vm1, %v314_v13 }
  0x64   : > { %1391 = vmatmul.mubr.msk.bf16.gmra.mrb[28].mxu0 %vm247_vm1, %v645_v14  ;;  %541 = vmatprep.mubr.bf16.mxu1 %v1708_v4 }
  0x65   : > { %929 = vmatprep.mubr.bf16.mxu0 %v1708_v4 }
  0x6b   : > { %1373 = vmatmul.mubr.msk.bf16.vlgmr.msra.gmra.mrb[0].mxu1 %vm247_vm1, %v282_v19 }
  0x6c   : > { %1395 = vmatmul.mubr.msk.bf16.vlgmr.msra.gmra.mrb[0].mxu0 %vm247_vm1, %v848_v20  ;;  %551 = vmatprep.mubr.bf16.mxu1 %v1708_v4 }
  0x6d   : > { %939 = vmatprep.mubr.bf16.mxu0 %v1708_v4 }
  0x73   : > { %1374 = vmatmul.mubr.msk.bf16.gmra.mrb[4].mxu1 %vm247_vm1, %v283_v25 }
  0x74   : > { %1396 = vmatmul.mubr.msk.bf16.gmra.mrb[4].mxu0 %vm247_vm1, %v849_v26  ;;  %561 = vmatprep.mubr.bf16.mxu1 %v1708_v4 }
  0x75   : > { %949 = vmatprep.mubr.bf16.mxu0 %v1708_v4 }
  0x7b   : > { %1375 = vmatmul.mubr.msk.bf16.gmra.mrb[8].mxu1 %vm247_vm1, %v284_v31 }
  0x7c   : > { %1397 = vmatmul.mubr.msk.bf16.gmra.mrb[8].mxu0 %vm247_vm1, %v850_v32  ;;  %571 = vmatprep.mubr.bf16.mxu1 %v1708_v4 }
  0x7d   : > { %959 = vmatprep.mubr.bf16.mxu0 %v1708_v4 }
  0x83   : > { %1376 = vmatmul.mubr.msk.bf16.gmra.mrb[12].mxu1 %vm247_vm1, %v285_v37 }
  0x84   : > { %1398 = vmatmul.mubr.msk.bf16.gmra.mrb[12].mxu0 %vm247_vm1, %v851_v38  ;;  %581 = vmatprep.mubr.bf16.mxu1 %v1708_v4 }
  0x85   : > { %969 = vmatprep.mubr.bf16.mxu0 %v1708_v4 }
  0x8b   : > { %1377 = vmatmul.mubr.msk.bf16.gmra.mrb[16].mxu1 %vm247_vm1, %v286_v43 }
  0x8c   : > { %1399 = vmatmul.mubr.msk.bf16.gmra.mrb[16].mxu0 %vm247_vm1, %v852_v44  ;;  %591 = vmatprep.mubr.bf16.mxu1 %v1708_v4 }
  0x8d   : > { %979 = vmatprep.mubr.bf16.mxu0 %v1708_v4 }
  0x93   : > { %1378 = vmatmul.mubr.msk.bf16.gmra.mrb[20].mxu1 %vm247_vm1, %v287_v49 }
  0x94   : > { %1400 = vmatmul.mubr.msk.bf16.gmra.mrb[20].mxu0 %vm247_vm1, %v853_v50  ;;  %601 = vmatprep.mubr.bf16.mxu1 %v1708_v4 }
  0x95   : > { %989 = vmatprep.mubr.bf16.mxu0 %v1708_v4 }
  0x9b   : > { %1379 = vmatmul.mubr.msk.bf16.gmra.mrb[24].mxu1 %vm247_vm1, %v288_v55 }
  0x9c   : > { %1401 = vmatmul.mubr.msk.bf16.gmra.mrb[24].mxu0 %vm247_vm1, %v854_v56  ;;  %611 = vmatprep.mubr.bf16.mxu1 %v1708_v4 }
  0x9d   : > { %999 = vmatprep.mubr.bf16.mxu0 %v1708_v4 }
  0xa3   : > { %1380 = vmatmul.mubr.msk.bf16.gmra.mrb[28].mxu1 %vm247_vm1, %v289_v61 }
  0xa4   : > { %1402 = vmatmul.mubr.msk.bf16.gmra.mrb[28].mxu0 %vm247_vm1, %v855_v62 }
 0x13e   : > { %v543_v63 = vpop.f32.mrb[0].mxu1 }
 0x13f   : > { %v931_v0 = vpop.f32.mrb[0].mxu0  ;;  %v545_v1 = vpop.f32.mrb[1].mxu1 }
 0x140   : > { %v1408_v2 = vadd.f32 %v931_v0, %v543_v63  ;;  %v933_v3 = vpop.f32.mrb[1].mxu0  ;;  %v547_v5 = vpop.f32.mrb[2].mxu1 }
 0x141   : > { %v1409_v6 = vadd.f32 %v933_v3, %v545_v1  ;;  %v935_v7 = vpop.f32.mrb[2].mxu0  ;;  %v549_v8 = vpop.f32.mrb[3].mxu1 }
 0x142   : > { %v1042_v9 = vmul.f32 %v1408_v2, %v1408_v2  ;;  %v1410_v10 = vadd.f32 %v935_v7, %v547_v5  ;;  %v937_v4 = vpop.f32.mrb[3].mxu0 }
 0x143   : > { %v1058_v11 = vmul.f32 %v1409_v6, %v1409_v6  ;;  %v1411_v12 = vadd.f32 %v937_v4, %v549_v8 }
 0x144   : > { %v1043_v13 = vmul.f32 %v1410_v10, %v1410_v10 }
 0x145   : > { %v1074_v14 = vadd.f32 %v1058_v11, %v1042_v9  ;;  %v1059_v15 = vmul.f32 %v1411_v12, %v1411_v12 }
 0x146   : > { %v553_v16 = vpop.f32.mrb[4].mxu1 }
 0x147   : > { %v1943_v17 = vadd.f32 %v1059_v15, %v1043_v13  ;;  %v941_v18 = vpop.f32.mrb[4].mxu0  ;;  %v555_v19 = vpop.f32.mrb[5].mxu1  ;;  %1580 = vrsqrt.f32 %v1074_v14  ;;  %vm1092_vm2 = vcmp.eq.f32.partialorder %v1074_v14, inf  ;;  %v1095_v52 = vand.u32 2147483648, %v1074_v14 }
 0x148   : > { %v1412_v20 = vadd.f32 %v941_v18, %v553_v16  ;;  %v943_v21 = vpop.f32.mrb[5].mxu0  ;;  %v557_v22 = vpop.f32.mrb[6].mxu1  ;;  %vm1094_vm3 = vcmp.eq.f32.partialorder %v1074_v14, 0.0 }
 0x149   : > { %v1413_v23 = vadd.f32 %v943_v21, %v555_v19  ;;  %v945_v24 = vpop.f32.mrb[6].mxu0  ;;  %v559_v25 = vpop.f32.mrb[7].mxu1  ;;  %1582 = vrsqrt.f32 %v1943_v17  ;;  %vm1099_vm4 = vcmp.eq.f32.partialorder %v1943_v17, inf  ;;  %v1102_v0 = vand.u32 2147483648, %v1943_v17 }
 0x14a   : > { %v1044_v26 = vmul.f32 %v1412_v20, %v1412_v20  ;;  %v1414_v27 = vadd.f32 %v945_v24, %v557_v22  ;;  %v947_v28 = vpop.f32.mrb[7].mxu0  ;;  %vm1101_vm5 = vcmp.eq.f32.partialorder %v1943_v17, 0.0 }
 0x14b   : > { %v1060_v29 = vmul.f32 %v1413_v23, %v1413_v23  ;;  %v1415_v30 = vadd.f32 %v947_v28, %v559_v25 }
 0x14c   : > { %v1045_v31 = vmul.f32 %v1414_v27, %v1414_v27 }
 0x14d   : > { %v1946_v32 = vadd.f32 %v1060_v29, %v1044_v26  ;;  %v1061_v33 = vmul.f32 %v1415_v30, %v1415_v30 }
 0x14e   : > { %v563_v34 = vpop.f32.mrb[8].mxu1 }
 0x14f   : > { %v1948_v35 = vadd.f32 %v1061_v33, %v1045_v31  ;;  %v951_v36 = vpop.f32.mrb[8].mxu0  ;;  %v565_v37 = vpop.f32.mrb[9].mxu1  ;;  %1584 = vrsqrt.f32 %v1946_v32  ;;  %vm1106_vm6 = vcmp.eq.f32.partialorder %v1946_v32, inf  ;;  %v1109_v16 = vand.u32 2147483648, %v1946_v32 }
 0x150   : > { %v1416_v38 = vadd.f32 %v951_v36, %v563_v34  ;;  %v953_v39 = vpop.f32.mrb[9].mxu0  ;;  %v567_v40 = vpop.f32.mrb[10].mxu1  ;;  %vm1108_vm7 = vcmp.eq.f32.partialorder %v1946_v32, 0.0 }
 0x151   : > { %v1581_v41 = vpop.eup %1580  ;;  %v1417_v42 = vadd.f32 %v953_v39, %v565_v37  ;;  %v955_v43 = vpop.f32.mrb[10].mxu0  ;;  %1586 = vrsqrt.f32 %v1948_v35  ;;  %vm1113_vm8 = vcmp.eq.f32.partialorder %v1948_v35, inf  ;;  %v1116_v28 = vand.u32 2147483648, %v1948_v35 }
 0x152   : > { %v569_v44 = vpop.f32.mrb[11].mxu1  ;;  %v1046_v45 = vmul.f32 %v1416_v38, %v1416_v38  ;;  %v1418_v46 = vadd.f32 %v955_v43, %v567_v40  ;;  %v957_v47 = vpop.f32.mrb[11].mxu0  ;;  %v1091_v48 = vmul.f32 %v1581_v41, %v1074_v14  ;;  %vm1115_vm9 = vcmp.eq.f32.partialorder %v1948_v35, 0.0 }
 0x153   : > { %v1583_v49 = vpop.eup %1582  ;;  %v1062_v50 = vmul.f32 %v1417_v42, %v1417_v42  ;;  %v1419_v51 = vadd.f32 %v957_v47, %v569_v44 }
 0x154   : > { %v1047_v53 = vmul.f32 %v1418_v46, %v1418_v46  ;;  %v1093_v54 = vsel %vm1092_vm2, %v1074_v14, %v1091_v48  ;;  %v1098_v55 = vmul.f32 %v1583_v49, %v1943_v17 }
 0x155   : > { %v1953_v56 = vadd.f32 %v1062_v50, %v1046_v45  ;;  %v1063_v57 = vmul.f32 %v1419_v51, %v1419_v51  ;;  %v1096_v58 = vsel %vm1094_vm3, %v1095_v52, %v1093_v54 }
 0x156   : > { %1202 = vxpose.xlu0.b32.start [1/16] (narrow) %v1096_v58, 16  ;;  %v573_v59 = vpop.f32.mrb[12].mxu1  ;;  %v1100_v60 = vsel %vm1099_vm4, %v1943_v17, %v1098_v55 }
 0x157   : > { %v1957_v61 = vadd.f32 %v1063_v57, %v1047_v53  ;;  %v961_v62 = vpop.f32.mrb[12].mxu0  ;;  %v575_v63 = vpop.f32.mrb[13].mxu1  ;;  %1588 = vrsqrt.f32 %v1953_v56  ;;  %v1103_v9 = vsel %vm1101_vm5, %v1102_v0, %v1100_v60  ;;  %vm1120_vm10 = vcmp.eq.f32.partialorder %v1953_v56, inf }
 0x158   : > { %v1420_v1 = vadd.f32 %v961_v62, %v573_v59  ;;  %v963_v2 = vpop.f32.mrb[13].mxu0  ;;  %v577_v3 = vpop.f32.mrb[14].mxu1  ;;  %vm1122_vm11 = vcmp.eq.f32.partialorder %v1953_v56, 0.0 }
 0x159   : > { %v1585_v5 = vpop.eup %1584  ;;  %v1421_v6 = vadd.f32 %v963_v2, %v575_v63  ;;  %v965_v7 = vpop.f32.mrb[14].mxu0  ;;  %1590 = vrsqrt.f32 %v1957_v61  ;;  %vm1127_vm12 = vcmp.eq.f32.partialorder %v1957_v61, inf  ;;  %v1130_v57 = vand.u32 2147483648, %v1957_v61 }
 0x15a   : > { %v579_v8 = vpop.f32.mrb[15].mxu1  ;;  %v1048_v10 = vmul.f32 %v1420_v1, %v1420_v1  ;;  %v1422_v4 = vadd.f32 %v965_v7, %v577_v3  ;;  %v967_v11 = vpop.f32.mrb[15].mxu0  ;;  %1203 = vxpose.xlu0.b32.cont [2/16] (narrow) %v1103_v9, 16  ;;  %v1105_v12 = vmul.f32 %v1585_v5, %v1946_v32  ;;  %vm1129_vm13 = vcmp.eq.f32.partialorder %v1957_v61, 0.0 }
 0x15b   : > { %v1587_v13 = vpop.eup %1586  ;;  %v1064_v14 = vmul.f32 %v1421_v6, %v1421_v6  ;;  %v1423_v15 = vadd.f32 %v967_v11, %v579_v8 }
 0x15c   : > { %v1049_v17 = vmul.f32 %v1422_v4, %v1422_v4  ;;  %v1107_v18 = vsel %vm1106_vm6, %v1946_v32, %v1105_v12  ;;  %v1112_v19 = vmul.f32 %v1587_v13, %v1948_v35 }
 0x15d   : > { %v1969_v20 = vadd.f32 %v1064_v14, %v1048_v10  ;;  %v1065_v21 = vmul.f32 %v1423_v15, %v1423_v15  ;;  %v1110_v22 = vsel %vm1108_vm7, %v1109_v16, %v1107_v18 }
 0x15e   : > { %1204 = vxpose.xlu0.b32.cont [3/16] (narrow) %v1110_v22, 16  ;;  %v583_v23 = vpop.f32.mrb[16].mxu1  ;;  %v1114_v24 = vsel %vm1113_vm8, %v1948_v35, %v1112_v19  ;;  %v1123_v35 = vand.u32 2147483648, %v1953_v56 }
 0x15f   : > { %v1973_v25 = vadd.f32 %v1065_v21, %v1049_v17  ;;  %v971_v26 = vpop.f32.mrb[16].mxu0  ;;  %v585_v27 = vpop.f32.mrb[17].mxu1  ;;  %1592 = vrsqrt.f32 %v1969_v20  ;;  %v1117_v37 = vsel %vm1115_vm9, %v1116_v28, %v1114_v24  ;;  %vm1134_vm14 = vcmp.eq.f32.partialorder %v1969_v20, inf }
 0x160   : > { %v1424_v29 = vadd.f32 %v971_v26, %v583_v23  ;;  %v973_v30 = vpop.f32.mrb[17].mxu0  ;;  %v587_v31 = vpop.f32.mrb[18].mxu1  ;;  %vm1136_vm15 = vcmp.eq.f32.partialorder %v1969_v20, 0.0 }
 0x161   : > { %v1589_v32 = vpop.eup %1588  ;;  %v1425_v33 = vadd.f32 %v973_v30, %v585_v27  ;;  %v975_v34 = vpop.f32.mrb[18].mxu0  ;;  %1594 = vrsqrt.f32 %v1973_v25  ;;  %vm1141_vm0 = vcmp.eq.f32.partialorder %v1973_v25, inf  ;;  %v1144_v21 = vand.u32 2147483648, %v1973_v25 }
 0x162   : > { %v589_v36 = vpop.f32.mrb[19].mxu1  ;;  %v1050_v38 = vmul.f32 %v1424_v29, %v1424_v29  ;;  %v1426_v39 = vadd.f32 %v975_v34, %v587_v31  ;;  %v977_v40 = vpop.f32.mrb[19].mxu0  ;;  %1205 = vxpose.xlu0.b32.cont [4/16] (narrow) %v1117_v37, 16  ;;  %v1119_v41 = vmul.f32 %v1589_v32, %v1953_v56  ;;  %vm1143_vm1 = vcmp.eq.f32.partialorder %v1973_v25, 0.0 }
 0x163   : > { %v1591_v42 = vpop.eup %1590  ;;  %v1066_v43 = vmul.f32 %v1425_v33, %v1425_v33  ;;  %v1427_v44 = vadd.f32 %v977_v40, %v589_v36 }
 0x164   : > { %v1051_v45 = vmul.f32 %v1426_v39, %v1426_v39  ;;  %v1121_v46 = vsel %vm1120_vm10, %v1953_v56, %v1119_v41  ;;  %v1126_v47 = vmul.f32 %v1591_v42, %v1957_v61 }
 0x165   : > { %v1985_v48 = vadd.f32 %v1066_v43, %v1050_v38  ;;  %v1067_v49 = vmul.f32 %v1427_v44, %v1427_v44  ;;  %v1124_v50 = vsel %vm1122_vm11, %v1123_v35, %v1121_v46 }
 0x166   : > { %1206 = vxpose.xlu0.b32.cont [5/16] (narrow) %v1124_v50, 16  ;;  %v593_v51 = vpop.f32.mrb[20].mxu1  ;;  %v1128_v52 = vsel %vm1127_vm12, %v1957_v61, %v1126_v47  ;;  %v1137_v61 = vand.u32 2147483648, %v1969_v20 }
 0x167   : > { %v1989_v53 = vadd.f32 %v1067_v49, %v1051_v45  ;;  %v981_v54 = vpop.f32.mrb[20].mxu0  ;;  %v595_v55 = vpop.f32.mrb[21].mxu1  ;;  %1596 = vrsqrt.f32 %v1985_v48  ;;  %v1131_v1 = vsel %vm1129_vm13, %v1130_v57, %v1128_v52  ;;  %vm1148_vm2 = vcmp.eq.f32.partialorder %v1985_v48, inf }
 0x168   : > { %v1428_v56 = vadd.f32 %v981_v54, %v593_v51  ;;  %v983_v58 = vpop.f32.mrb[21].mxu0  ;;  %v597_v59 = vpop.f32.mrb[22].mxu1  ;;  %vm1150_vm3 = vcmp.eq.f32.partialorder %v1985_v48, 0.0 }
 0x169   : > { %v1593_v60 = vpop.eup %1592  ;;  %v1429_v62 = vadd.f32 %v983_v58, %v595_v55  ;;  %v985_v63 = vpop.f32.mrb[22].mxu0  ;;  %1598 = vrsqrt.f32 %v1989_v53  ;;  %vm1155_vm4 = vcmp.eq.f32.partialorder %v1989_v53, inf  ;;  %v1158_v49 = vand.u32 2147483648, %v1989_v53 }
 0x16a   : > { %v599_v0 = vpop.f32.mrb[23].mxu1  ;;  %v1052_v2 = vmul.f32 %v1428_v56, %v1428_v56  ;;  %v1430_v3 = vadd.f32 %v985_v63, %v597_v59  ;;  %v987_v5 = vpop.f32.mrb[23].mxu0  ;;  %1207 = vxpose.xlu0.b32.cont [6/16] (narrow) %v1131_v1, 16  ;;  %v1133_v6 = vmul.f32 %v1593_v60, %v1969_v20  ;;  %vm1157_vm5 = vcmp.eq.f32.partialorder %v1989_v53, 0.0 }
 0x16b   : > { %v1595_v7 = vpop.eup %1594  ;;  %v1068_v8 = vmul.f32 %v1429_v62, %v1429_v62  ;;  %v1431_v9 = vadd.f32 %v987_v5, %v599_v0 }
 0x16c   : > { %v1053_v10 = vmul.f32 %v1430_v3, %v1430_v3  ;;  %v1135_v4 = vsel %vm1134_vm14, %v1969_v20, %v1133_v6  ;;  %v1140_v11 = vmul.f32 %v1595_v7, %v1973_v25 }
 0x16d   : > { %v2001_v12 = vadd.f32 %v1068_v8, %v1052_v2  ;;  %v1069_v13 = vmul.f32 %v1431_v9, %v1431_v9  ;;  %v1138_v14 = vsel %vm1136_vm15, %v1137_v61, %v1135_v4 }
 0x16e   : > { %1208 = vxpose.xlu0.b32.cont [7/16] (narrow) %v1138_v14, 16  ;;  %v603_v15 = vpop.f32.mrb[24].mxu1  ;;  %v1142_v16 = vsel %vm1141_vm0, %v1973_v25, %v1140_v11  ;;  %v1151_v25 = vand.u32 2147483648, %v1985_v48 }
 0x16f   : > { %v2005_v17 = vadd.f32 %v1069_v13, %v1053_v10  ;;  %v991_v18 = vpop.f32.mrb[24].mxu0  ;;  %v605_v19 = vpop.f32.mrb[25].mxu1  ;;  %1600 = vrsqrt.f32 %v2001_v12  ;;  %v1145_v29 = vsel %vm1143_vm1, %v1144_v21, %v1142_v16  ;;  %vm1162_vm6 = vcmp.eq.f32.partialorder %v2001_v12, inf }
 0x170   : > { %v1432_v20 = vadd.f32 %v991_v18, %v603_v15  ;;  %v993_v22 = vpop.f32.mrb[25].mxu0  ;;  %v607_v23 = vpop.f32.mrb[26].mxu1  ;;  %v1165_v2 = vand.u32 2147483648, %v2001_v12  ;;  %vm1164_vm7 = vcmp.eq.f32.partialorder %v2001_v12, 0.0 }
 0x171   : > { %v1597_v24 = vpop.eup %1596  ;;  %v1433_v26 = vadd.f32 %v993_v22, %v605_v19  ;;  %v995_v27 = vpop.f32.mrb[26].mxu0  ;;  %1602 = vrsqrt.f32 %v2005_v17  ;;  %vm1169_vm8 = vcmp.eq.f32.partialorder %v2005_v17, inf  ;;  %v1172_v10 = vand.u32 2147483648, %v2005_v17 }
 0x172   : > { %v609_v28 = vpop.f32.mrb[27].mxu1  ;;  %v1054_v30 = vmul.f32 %v1432_v20, %v1432_v20  ;;  %v1434_v31 = vadd.f32 %v995_v27, %v607_v23  ;;  %v997_v32 = vpop.f32.mrb[27].mxu0  ;;  %1209 = vxpose.xlu0.b32.cont [8/16] (narrow) %v1145_v29, 16  ;;  %v1147_v33 = vmul.f32 %v1597_v24, %v1985_v48  ;;  %vm1171_vm9 = vcmp.eq.f32.partialorder %v2005_v17, 0.0 }
 0x173   : > { %v1599_v34 = vpop.eup %1598  ;;  %v1070_v36 = vmul.f32 %v1433_v26, %v1433_v26  ;;  %v1435_v37 = vadd.f32 %v997_v32, %v609_v28 }
 0x174   : > { %v1055_v38 = vmul.f32 %v1434_v31, %v1434_v31  ;;  %v1149_v39 = vsel %vm1148_vm2, %v1985_v48, %v1147_v33  ;;  %v1154_v40 = vmul.f32 %v1599_v34, %v1989_v53 }
 0x175   : > { %v1086_v41 = vadd.f32 %v1070_v36, %v1054_v30  ;;  %v1071_v42 = vmul.f32 %v1435_v37, %v1435_v37  ;;  %v1152_v43 = vsel %vm1150_vm3, %v1151_v25, %v1149_v39 }
 0x176   : > { %1210 = vxpose.xlu0.b32.cont [9/16] (narrow) %v1152_v43, 16  ;;  %v613_v44 = vpop.f32.mrb[28].mxu1  ;;  %v1156_v35 = vsel %vm1155_vm4, %v1989_v53, %v1154_v40 }
 0x177   : > { %v1087_v45 = vadd.f32 %v1071_v42, %v1055_v38  ;;  %v1001_v46 = vpop.f32.mrb[28].mxu0  ;;  %v615_v47 = vpop.f32.mrb[29].mxu1  ;;  %1604 = vrsqrt.f32 %v1086_v41  ;;  %v1159_v56 = vsel %vm1157_vm5, %v1158_v49, %v1156_v35  ;;  %vm1176_vm10 = vcmp.eq.f32.partialorder %v1086_v41, inf }
 0x178   : > { %v1436_v50 = vadd.f32 %v1001_v46, %v613_v44  ;;  %v1003_v51 = vpop.f32.mrb[29].mxu0  ;;  %v617_v48 = vpop.f32.mrb[30].mxu1  ;;  %v1179_v14 = vand.u32 2147483648, %v1086_v41  ;;  %vm1178_vm11 = vcmp.eq.f32.partialorder %v1086_v41, 0.0 }
 0x179   : > { %v1601_v52 = vpop.eup %1600  ;;  %v1437_v54 = vadd.f32 %v1003_v51, %v615_v47  ;;  %v1005_v55 = vpop.f32.mrb[30].mxu0  ;;  %1606 = vrsqrt.f32 %v1087_v45  ;;  %vm1183_vm12 = vcmp.eq.f32.partialorder %v1087_v45, inf  ;;  %v1186_v21 = vand.u32 2147483648, %v1087_v45 }
 0x17a   : > { %v619_v57 = vpop.f32.mrb[31].mxu1  ;;  %v1056_v58 = vmul.f32 %v1436_v50, %v1436_v50  ;;  %v1438_v59 = vadd.f32 %v1005_v55, %v617_v48  ;;  %v1007_v60 = vpop.f32.mrb[31].mxu0  ;;  %1211 = vxpose.xlu0.b32.cont [10/16] (narrow) %v1159_v56, 16  ;;  %v1161_v62 = vmul.f32 %v1601_v52, %v2001_v12  ;;  %vm1185_vm13 = vcmp.eq.f32.partialorder %v1087_v45, 0.0 }
 0x17b   : > { %v1603_v63 = vpop.eup %1602  ;;  %v1072_v0 = vmul.f32 %v1437_v54, %v1437_v54  ;;  %v1439_v1 = vadd.f32 %v1007_v60, %v619_v57 }
 0x17c   : > { %v1057_v53 = vmul.f32 %v1438_v59, %v1438_v59  ;;  %v1163_v3 = vsel %vm1162_vm6, %v2001_v12, %v1161_v62  ;;  %v1168_v5 = vmul.f32 %v1603_v63, %v2005_v17 }
 0x17d   : > { %v1088_v6 = vadd.f32 %v1072_v0, %v1056_v58  ;;  %v1073_v7 = vmul.f32 %v1439_v1, %v1439_v1  ;;  %v1166_v8 = vsel %vm1164_vm7, %v1165_v2, %v1163_v3 }
 0x17e   : > { %1212 = vxpose.xlu0.b32.cont [11/16] (narrow) %v1166_v8, 16  ;;  %v1170_v9 = vsel %vm1169_vm8, %v2005_v17, %v1168_v5 }
 0x17f   : > { %v1089_v61 = vadd.f32 %v1073_v7, %v1057_v53  ;;  %1608 = vrsqrt.f32 %v1088_v6  ;;  %v1173_v11 = vsel %vm1171_vm9, %v1172_v10, %v1170_v9  ;;  %vm1190_vm14 = vcmp.eq.f32.partialorder %v1088_v6, inf }
 0x180   : > { %v1193_v24 = vand.u32 2147483648, %v1088_v6  ;;  %vm1192_vm15 = vcmp.eq.f32.partialorder %v1088_v6, 0.0 }
 0x181   : > { %v1605_v4 = vpop.eup %1604  ;;  %1610 = vrsqrt.f32 %v1089_v61  ;;  %vm1197_vm0 = vcmp.eq.f32.partialorder %v1089_v61, inf  ;;  %v1200_v30 = vand.u32 2147483648, %v1089_v61  ;;  %vm1199_vm1 = vcmp.eq.f32.partialorder %v1089_v61, 0.0 }
 0x182   : > { %1213 = vxpose.xlu0.b32.cont [12/16] (narrow) %v1173_v11, 16  ;;  %v1175_v12 = vmul.f32 %v1605_v4, %v1086_v41 }
 0x183   : > { %v1607_v13 = vpop.eup %1606 }
 0x184   : > { %v1177_v15 = vsel %vm1176_vm10, %v1086_v41, %v1175_v12  ;;  %v1182_v16 = vmul.f32 %v1607_v13, %v1087_v45 }
 0x185   : > { %v1180_v18 = vsel %vm1178_vm11, %v1179_v14, %v1177_v15 }
 0x186   : > { %1214 = vxpose.xlu0.b32.cont [13/16] (narrow) %v1180_v18, 16  ;;  %v1184_v19 = vsel %vm1183_vm12, %v1087_v45, %v1182_v16 }
 0x187   : > { %v1187_v22 = vsel %vm1185_vm13, %v1186_v21, %v1184_v19 }
 0x189   : > { %v1609_v20 = vpop.eup %1608 }
 0x18a   : > { %1215 = vxpose.xlu0.b32.cont [14/16] (narrow) %v1187_v22, 16  ;;  %v1189_v17 = vmul.f32 %v1609_v20, %v1088_v6 }
 0x18b   : > { %v1611_v23 = vpop.eup %1610 }
 0x18c   : > { %v1191_v26 = vsel %vm1190_vm14, %v1088_v6, %v1189_v17  ;;  %v1196_v27 = vmul.f32 %v1611_v23, %v1089_v61 }
 0x18d   : > { %v1194_v28 = vsel %vm1192_vm15, %v1193_v24, %v1191_v26 }
 0x18e   : > { %1216 = vxpose.xlu0.b32.cont [15/16] (narrow) %v1194_v28, 16  ;;  %v1198_v29 = vsel %vm1197_vm0, %v1089_v61, %v1196_v27 }
 0x18f   : > { %v1201_v31 = vsel %vm1199_vm1, %v1200_v30, %v1198_v29 }
 0x192   : > { %1217 = vxpose.xlu0.b32.end [16/16] (narrow) %v1201_v31, 16 }
 0x1d6   : > { %v1218_v32 = vpop.trf.xlu0 }
 0x1d7   : > { %1234 = vst [vmem:[%s211_s29] sm:$0xff] %v1218_v32 }
 0x1da   : > { %v1219_v33 = vpop.trf.xlu0 }
 0x1db   : > { %1235 = vst [vmem:[%s211_s29 + $0x8] sm:$0xff] %v1219_v33 }
 0x1dc   : > { %1625 = shalt.err (!%p1622_p9)
}
 0x1dd   : > { %s1626_s20 = scalar_lea.hbm %s2039_s8, 256  ;;  %s1630_s27 = scalar_lea.hbm %s2096_s3, 1024 }
 0x1de   : > { %p1627_p10 = scmp.ne.s32.totalorder %s2039_s8, %s1626_s20  ;;  %p1631_p13 = scmp.lt.u32.totalorder %s2039_s8, %s2096_s3 }
 0x1df   : > { %p1632_p0 = scmp.lt.u32.totalorder %s1630_s27, %s1626_s20  ;;  %p1634_p2 = scmp.lt.u32.totalorder %s1626_s20, %s2039_s8 }
 0x1e0   : > { %p1628_p11 = pnand %p1627_p10, %p1784_p3 }
 0x1e1   : > { %p1633_p1 = por %p1632_p0, %p1631_p13 }
 0x1e2   : > { %p1629_p12 = pneg %p1628_p11 }
 0x1e3   : > { %p1635_p4 = por %p1634_p2, %p1633_p1 }
 0x1e5   : > { %p1636_p5 = pnand %p1635_p4, %p1629_p12 }
 0x1e7   : > { %1639 = shalt.err (!%p1636_p5)
}
 0x1e8   : > { %s1710_s5 = smov 128   ;;  %s1711_s6 = smov 256  }
 0x1e9   : > { %s1712_s7 = smov 8  }
 0x1ea   : > { %1505 = dma.vmem_to_hbm [thread:$0]  (%p1784_p3), %s2034_s4, 256, %s2039_s8, %s2041_s16, %s1710_s5, %s1711_s6, %s1712_s7  }
 0x1eb PF: > { %p1511_p6 = scmp.ge.s32.totalorder %s1706_s19, 2  ;;  %s1266_s15 = sand.u32 1, %s1678_s12  }
 0x1ec   : > { %s1267_s9 = scalar_lea.sflag [#allocation4], %s1266_s15 }
 0x1ed   : > { %p1508_p7 = pnand %p1511_p6, %p1793_p8 }
 0x1ef   : > { %1673 = dma.done.wait (!%p1508_p7), %s1267_s9, 256  }
 0x1f0   : > { %1675 = vsyncadd (!%p1508_p7), %s1267_s9, 4294967040  ;;  %s16_s19 = sadd.s32 1, %s1706_s19   ;;  %s2099_s12 = smov %s1682_s13 }
 0x1f1   : > { %p13_p9 = scmp.ge.s32.totalorder %s16_s19, 6   ;;  %s2100_s13 = smov %s1686_s14 }
 0x1f2   : > { %s2101_s14 = smov %s1802_s30  ;;  %s2102_s15 = smov %s1698_s17 }
 0x1f3   : > { %s2103_s16 = smov %s1702_s18  ;;  %s2104_s17 = smov %s2107_s22 }
 0x1f4   : > { %s2105_s18 = smov %s2111_s23  ;;  %15 = sbr.rel (!%p13_p9) target bundleno = 5 (0x5), region = 73 }
 0x1fb   :  { %1272 = vsyncpa [#allocation4], 1 }
 0x1fc   :  { %1274 = vsyncpa [#allocation4 + $0x1], 1 }

</bundles_post_ra>
